<compile_context>
chip_gen: v7x
topology: tpu7x:2x2x1
jax: 0.10.0
libtpu: 0.0.40
codegen_flags: <defaults>
</compile_context>

<pallas_src>
import functools

import jax
import jax.numpy as jnp
from jax import lax
from jax.experimental import pallas as pl
from jax.experimental.pallas import tpu as pltpu


def _scaled_pointwise_conv_kernel(x_ref, s_ref, w_ref, o_ref):
    """Fused (scale * x) matmul, standard (1,0)x(0) contraction.

    x_ref : (Cin, M)         f32  activations (channels on sublanes)
    s_ref : (Cin, 1)         f32  per-input-channel scale (broadcast over pixels)
    w_ref : (Cout_blk, Cin)  bf16 1x1-conv weights, native PyTorch layout
    o_ref : (Cout_blk, M)    f32  output block
    """
    scaled = (x_ref[...] * s_ref[...]).astype(w_ref.dtype)       # VPU, tiny
    o_ref[...] = lax.dot_general(                                 # MXU: W @ X
        w_ref[...], scaled,
        dimension_numbers=(((1,), (0,)), ((), ())),
        preferred_element_type=jnp.float32,
    ).astype(o_ref.dtype)


def prepare_conv_weight(weight_oi, dtype=jnp.bfloat16):
    """One-time (model-load) weight prep: keep PyTorch (Cout, Cin), cast bf16."""
    return jnp.asarray(weight_oi).astype(dtype)


def _default_cout_splits():
    """Use both TensorCores on v7x (2 TCs/chip); single-shot elsewhere."""
    try:
        kind = jax.devices()[0].device_kind.lower()
    except Exception:
        return 1
    return 2 if any(tag in kind for tag in ("v7", "tpu7", "7x")) else 1


def scaled_pointwise_conv(x_nchw, scale_nc11, weight_oc, *, cout_splits=1):
    """Conv2d_1x1(x * scale), bias=False.

    x_nchw     : (1, Cin, H, W)   f32
    scale_nc11 : (1, Cin, 1, 1)   f32
    weight_oc  : (Cout, Cin)      pre-cast (typically bf16) conv weight
    returns    : (1, Cout, H, W)  in x's dtype
    """
    n, cin, h, w = x_nchw.shape
    assert n == 1, "wrapper assumes batch == 1 (as in the module's input)"
    cout = weight_oc.shape[0]
    assert weight_oc.shape == (cout, cin)
    assert scale_nc11.shape == (n, cin, 1, 1)
    assert cout % cout_splits == 0
    cout_blk = cout // cout_splits
    assert cout_blk % 8 == 0, "Cout block must respect sublane granularity"
    m = n * h * w

    x2d = x_nchw.reshape(cin, m)        # free reshape (contiguous for N == 1)
    s2d = scale_nc11.reshape(cin, 1)

    bytes_accessed = (x2d.size * x2d.dtype.itemsize
                      + s2d.size * s2d.dtype.itemsize
                      + weight_oc.size * weight_oc.dtype.itemsize
                      + cout * m * x_nchw.dtype.itemsize)

    out2d = pl.pallas_call(
        _scaled_pointwise_conv_kernel,
        out_shape=jax.ShapeDtypeStruct((cout, m), x_nchw.dtype),
        grid=(cout_splits,),
        in_specs=[
            pl.BlockSpec((cin, m), lambda i: (0, 0)),
            pl.BlockSpec((cin, 1), lambda i: (0, 0)),
            pl.BlockSpec((cout_blk, cin), lambda i: (i, 0)),
        ],
        out_specs=pl.BlockSpec((cout_blk, m), lambda i: (i, 0)),
        compiler_params=pltpu.CompilerParams(
            dimension_semantics=("parallel",),
        ),
        cost_estimate=pl.CostEstimate(
            flops=2 * m * cin * cout,
            transcendentals=0,
            bytes_accessed=int(bytes_accessed),
        ),
    )(x2d, s2d, weight_oc)

    # (Cout, M) is already NCHW-contiguous for N == 1: free reshape, no transpose.
    return out2d.reshape(n, cout, h, w)


if __name__ == "__main__":
    # Shapes implied by the module: x625 (1,2304,7,7), x630 (1,2304,1,1),
    # Conv2d(2304 -> 384, 1x1, bias=False).
    N, CIN, H, W = 1, 2304, 7, 7
    COUT = 384

    key = jax.random.PRNGKey(0)
    kx, ks, kw = jax.random.split(key, 3)

    x625 = jax.random.normal(kx, (N, CIN, H, W), dtype=jnp.float32)
    x630 = jax.random.normal(ks, (N, CIN, 1, 1), dtype=jnp.float32)
    # Synthetic conv weight in PyTorch layout (Cout, Cin), 1x1 kernel squeezed.
    conv_w = (jax.random.normal(kw, (COUT, CIN), dtype=jnp.float32)
              * (1.0 / jnp.sqrt(jnp.float32(CIN))))

    # One-time weight prep (model-load time, outside jit): (Cout, Cin) bf16.
    w_prepped = prepare_conv_weight(conv_w, dtype=jnp.bfloat16)

    splits = _default_cout_splits()          # 2 on v7x (both TCs), else 1
    fn = jax.jit(functools.partial(scaled_pointwise_conv, cout_splits=splits))
    out = jax.block_until_ready(fn(x625, x630, w_prepped))
    assert out.shape == (N, COUT, H, W), out.shape

    # Check 1: against the exact f32 module math (bf16-matmul tolerance).
    ref_f32 = jnp.einsum("nchw,oc->nohw", x625 * x630, conv_w)
    assert jnp.allclose(out, ref_f32, atol=5e-2, rtol=5e-2), float(
        jnp.max(jnp.abs(out - ref_f32)))

    # Check 2: against a reference using the same bf16 operand rounding
    # (isolates kernel correctness from the intended precision change).
    xs_bf = (x625 * x630).astype(jnp.bfloat16).astype(jnp.float32)
    ref_bf = jnp.einsum("nchw,oc->nohw", xs_bf, w_prepped.astype(jnp.float32))
    assert jnp.allclose(out, ref_bf, atol=1e-2, rtol=1e-2), float(
        jnp.max(jnp.abs(out - ref_bf)))

    print("KERNEL_OK")
</pallas_src>

<mosaic_0001>
module attributes {stable_mosaic.version = 11 : i64} {
  func.func @_scaled_pointwise_conv_kernel(%arg0: i32, %arg1: memref<2304x49xf32, #tpu.memory_space<vmem>>, %arg2: memref<2304x1xf32, #tpu.memory_space<vmem>>, %arg3: memref<384x2304xbf16, #tpu.memory_space<vmem>>, %arg4: memref<384x49xf32, #tpu.memory_space<vmem>>) attributes {dimension_semantics = [#tpu.dimension_semantics<parallel>], iteration_bounds = array<i64: 1>, scalar_prefetch = 0 : i64, scratch_operands = 0 : i64, tpu.core_type = #tpu.core_type<tc>, window_params = [{pipeline_mode = #tpu.pipeline_mode<synchronous>, transform_indices = @transform_0, window_bounds = array<i64: 2304, 49>}, {pipeline_mode = #tpu.pipeline_mode<synchronous>, transform_indices = @transform_1, window_bounds = array<i64: 2304, 1>}, {transform_indices = @transform_2, window_bounds = array<i64: 384, 2304>}, {transform_indices = @transform_3, window_bounds = array<i64: 384, 49>}]} {
    %c0 = arith.constant 0 : index
    %c0_0 = arith.constant 0 : index
    %0 = vector.load %arg1[%c0, %c0_0] : memref<2304x49xf32, #tpu.memory_space<vmem>>, vector<2304x49xf32>
    %c0_1 = arith.constant 0 : index
    %c0_2 = arith.constant 0 : index
    %1 = vector.load %arg2[%c0_1, %c0_2] : memref<2304x1xf32, #tpu.memory_space<vmem>>, vector<2304x1xf32>
    %2 = vector.broadcast %1 : vector<2304x1xf32> to vector<2304x49xf32>
    %3 = arith.mulf %0, %2 : vector<2304x49xf32>
    %4 = arith.truncf %3 : vector<2304x49xf32> to vector<2304x49xbf16>
    %c0_3 = arith.constant 0 : index
    %c0_4 = arith.constant 0 : index
    %5 = vector.load %arg3[%c0_3, %c0_4] : memref<384x2304xbf16, #tpu.memory_space<vmem>>, vector<384x2304xbf16>
    %cst = arith.constant dense<0.000000e+00> : vector<384x49xf32>
    %6 = tpu.matmul %5, %4, %cst {dimension_numbers = #tpu.dot_dimension_numbers<[1], [0], [0], [1], [0, 0, 1, 1], [], []>} : vector<384x2304xbf16>, vector<2304x49xbf16>, vector<384x49xf32> -> vector<384x49xf32>
    %c0_5 = arith.constant 0 : index
    %c0_6 = arith.constant 0 : index
    %7 = vector.load %arg4[%c0_5, %c0_6] : memref<384x49xf32, #tpu.memory_space<vmem>>, vector<384x49xf32>
    tpu.vector_store %arg4[%c0_5, %c0_6], %6 {strides = array<i32>} : memref<384x49xf32, #tpu.memory_space<vmem>>, vector<384x49xf32>,
    return
  }
  func.func @transform_0(%arg0: i32) -> (i32, i32) {
    %c0_i32 = arith.constant 0 : i32
    %c0_i32_0 = arith.constant 0 : i32
    %c0_i32_1 = arith.constant 0 : i32
    return %c0_i32, %c0_i32_0 : i32, i32
  }
  func.func @transform_1(%arg0: i32) -> (i32, i32) {
    %c0_i32 = arith.constant 0 : i32
    %c0_i32_0 = arith.constant 0 : i32
    %c0_i32_1 = arith.constant 0 : i32
    return %c0_i32, %c0_i32_0 : i32, i32
  }
  func.func @transform_2(%arg0: i32) -> (i32, i32) {
    %c0_i32 = arith.constant 0 : i32
    %c0_i32_0 = arith.constant 0 : i32
    return %arg0, %c0_i32 : i32, i32
  }
  func.func @transform_3(%arg0: i32) -> (i32, i32) {
    %c0_i32 = arith.constant 0 : i32
    %c0_i32_0 = arith.constant 0 : i32
    return %arg0, %c0_i32 : i32, i32
  }
}

</mosaic_0001>

<bundles_post_ra>
// kernel: scaled_pointwise_conv.1
= control target key start
LH: loop header
LB: loop body
LE: loop exit
PB: predicated region body
PF: predicated region fallthrough
CT: control target
= control target key end

     0   :  { %v8968_v0 = vmov 0   ;;  %vm7080_vm0 = vcmask 400384   ;;  %s12587_s1 = inlined_call_operand.vmem [shape: f32[2304,1], index: 1, kind: input, shape index: {}]   ;;  %s12588_s0 = inlined_call_operand.vmem [shape: f32[2304,49], index: 0, kind: input, shape index: {}]   ;;  %s12589_s2 = inlined_call_operand.vmem [shape: bf16[384,2304], index: 2, kind: input, shape index: {}]   ;;  %s12590_s3 = inlined_call_operand.vmem [shape: f32[384,49], index: 3, kind: output, shape index: {}]  }
   0x1   :  { %8319 = vset.pattern.permute.xlu1 %v8968_v0  ;;  %8318 = vset.pattern.permute.xlu0 %v8968_v0  ;;  %v431_v1 = vld [vmem:[%s12587_s1 + $0x400] sm:$0xff]  ;;  %v432_v3 = vld [vmem:[%s12587_s1 + $0x408] sm:$0xff]  ;;  %v306_v5 = vld [vmem:[%s12587_s1 + $0x18] sm:$0xff] }
   0x2   :  { %v303_v2 = vld [vmem:[%s12587_s1] sm:$0xff]  ;;  %1233 = vperm.xlu1 %8319, %v431_v1   ;;  %v304_v4 = vld [vmem:[%s12587_s1 + $0x8] sm:$0xff]  ;;  %5055 = vmatprep.subr.bf16.mxu1 %v8968_v0  ;;  %v305_v6 = vld [vmem:[%s12587_s1 + $0x10] sm:$0xff] }
   0x3   :  { %593 = vperm.xlu0 %8318, %v303_v2   ;;  %5955 = vmatprep.subr.bf16.mxu0 %v8968_v0  ;;  %v434_v7 = vld [vmem:[%s12587_s1 + $0x418] sm:$0xff]  ;;  %v433_v8 = vld [vmem:[%s12587_s1 + $0x410] sm:$0xff]  ;;  %v308_v9 = vld [vmem:[%s12587_s1 + $0x28] sm:$0xff] }
   0x4   :  { %v307_v10 = vld [vmem:[%s12587_s1 + $0x20] sm:$0xff]  ;;  %v436_v11 = vld [vmem:[%s12587_s1 + $0x428] sm:$0xff]  ;;  %v310_v13 = vld [vmem:[%s12587_s1 + $0x38] sm:$0xff] }
   0x5   :  { %v435_v12 = vld [vmem:[%s12587_s1 + $0x420] sm:$0xff]  ;;  %v309_v14 = vld [vmem:[%s12587_s1 + $0x30] sm:$0xff]  ;;  %v438_v15 = vld [vmem:[%s12587_s1 + $0x438] sm:$0xff] }
   0x6   :  { %1238 = vperm.xlu1 %8319, %v432_v3   ;;  %v437_v16 = vld [vmem:[%s12587_s1 + $0x430] sm:$0xff]  ;;  %v312_v17 = vld [vmem:[%s12587_s1 + $0x48] sm:$0xff]  ;;  %v311_v18 = vld [vmem:[%s12587_s1 + $0x40] sm:$0xff] }
   0x7   :  { %598 = vperm.xlu0 %8318, %v304_v4   ;;  %v440_v19 = vld [vmem:[%s12587_s1 + $0x448] sm:$0xff]  ;;  %v439_v20 = vld [vmem:[%s12587_s1 + $0x440] sm:$0xff]  ;;  %v314_v21 = vld [vmem:[%s12587_s1 + $0x58] sm:$0xff] }
   0x8   :  { %v313_v22 = vld [vmem:[%s12587_s1 + $0x50] sm:$0xff]  ;;  %v442_v23 = vld [vmem:[%s12587_s1 + $0x458] sm:$0xff]  ;;  %v316_v25 = vld [vmem:[%s12587_s1 + $0x68] sm:$0xff] }
   0x9   :  { %v441_v24 = vld [vmem:[%s12587_s1 + $0x450] sm:$0xff]  ;;  %v315_v26 = vld [vmem:[%s12587_s1 + $0x60] sm:$0xff]  ;;  %v444_v27 = vld [vmem:[%s12587_s1 + $0x468] sm:$0xff] }
   0xa   :  { %608 = vperm.xlu1 %8319, %v306_v5   ;;  %v443_v28 = vld [vmem:[%s12587_s1 + $0x460] sm:$0xff]  ;;  %v318_v29 = vld [vmem:[%s12587_s1 + $0x78] sm:$0xff]  ;;  %v317_v30 = vld [vmem:[%s12587_s1 + $0x70] sm:$0xff] }
   0xb   :  { %603 = vperm.xlu0 %8318, %v305_v6   ;;  %v446_v31 = vld [vmem:[%s12587_s1 + $0x478] sm:$0xff]  ;;  %v445_v32 = vld [vmem:[%s12587_s1 + $0x470] sm:$0xff]  ;;  %v320_v33 = vld [vmem:[%s12587_s1 + $0x88] sm:$0xff] }
   0xc   :  { %v319_v34 = vld [vmem:[%s12587_s1 + $0x80] sm:$0xff]  ;;  %v448_v35 = vld [vmem:[%s12587_s1 + $0x488] sm:$0xff]  ;;  %v322_v37 = vld [vmem:[%s12587_s1 + $0x98] sm:$0xff] }
   0xd   :  { %v447_v36 = vld [vmem:[%s12587_s1 + $0x480] sm:$0xff]  ;;  %v321_v38 = vld [vmem:[%s12587_s1 + $0x90] sm:$0xff]  ;;  %v450_v39 = vld [vmem:[%s12587_s1 + $0x498] sm:$0xff] }
   0xe   :  { %1248 = vperm.xlu1 %8319, %v434_v7   ;;  %v449_v40 = vld [vmem:[%s12587_s1 + $0x490] sm:$0xff]  ;;  %v324_v41 = vld [vmem:[%s12587_s1 + $0xa8] sm:$0xff]  ;;  %v323_v42 = vld [vmem:[%s12587_s1 + $0xa0] sm:$0xff] }
   0xf   :  { %1243 = vperm.xlu0 %8318, %v433_v8   ;;  %v452_v43 = vld [vmem:[%s12587_s1 + $0x4a8] sm:$0xff]  ;;  %v451_v44 = vld [vmem:[%s12587_s1 + $0x4a0] sm:$0xff]  ;;  %v326_v45 = vld [vmem:[%s12587_s1 + $0xb8] sm:$0xff] }
  0x10   :  { %v325_v46 = vld [vmem:[%s12587_s1 + $0xb0] sm:$0xff]  ;;  %v454_v47 = vld [vmem:[%s12587_s1 + $0x4b8] sm:$0xff]  ;;  %v328_v49 = vld [vmem:[%s12587_s1 + $0xc8] sm:$0xff] }
  0x11   :  { %v453_v48 = vld [vmem:[%s12587_s1 + $0x4b0] sm:$0xff]  ;;  %v327_v50 = vld [vmem:[%s12587_s1 + $0xc0] sm:$0xff]  ;;  %v456_v51 = vld [vmem:[%s12587_s1 + $0x4c8] sm:$0xff] }
  0x12   :  { %618 = vperm.xlu1 %8319, %v308_v9   ;;  %v455_v52 = vld [vmem:[%s12587_s1 + $0x4c0] sm:$0xff]  ;;  %v330_v53 = vld [vmem:[%s12587_s1 + $0xd8] sm:$0xff]  ;;  %v329_v54 = vld [vmem:[%s12587_s1 + $0xd0] sm:$0xff] }
  0x13   :  { %613 = vperm.xlu0 %8318, %v307_v10   ;;  %v458_v55 = vld [vmem:[%s12587_s1 + $0x4d8] sm:$0xff]  ;;  %v457_v56 = vld [vmem:[%s12587_s1 + $0x4d0] sm:$0xff]  ;;  %v332_v57 = vld [vmem:[%s12587_s1 + $0xe8] sm:$0xff] }
  0x14   :  { %v331_v58 = vld [vmem:[%s12587_s1 + $0xe0] sm:$0xff]  ;;  %v460_v59 = vld [vmem:[%s12587_s1 + $0x4e8] sm:$0xff]  ;;  %v334_v61 = vld [vmem:[%s12587_s1 + $0xf8] sm:$0xff] }
  0x15   :  { %v459_v60 = vld [vmem:[%s12587_s1 + $0x4e0] sm:$0xff]  ;;  %v333_v62 = vld [vmem:[%s12587_s1 + $0xf0] sm:$0xff]  ;;  %v462_v63 = vld [vmem:[%s12587_s1 + $0x4f8] sm:$0xff] }
  0x16   :  { %1258 = vperm.xlu1 %8319, %v436_v11   ;;  %v461_v1 = vld [vmem:[%s12587_s1 + $0x4f0] sm:$0xff]  ;;  %v464_v2 = vld [vmem:[%s12587_s1 + $0x508] sm:$0xff]  ;;  %v463_v3 = vld [vmem:[%s12587_s1 + $0x500] sm:$0xff] }
  0x17   :  { %1253 = vperm.xlu0 %8318, %v435_v12   ;;  %v8322_v4 = vld [vmem:[%s12589_s2 + $0x4] ss:$72 sps:$4 sm:$0xff]   ;;  %v466_v11 = vld [vmem:[%s12587_s1 + $0x518] sm:$0xff]  ;;  %v465_v12 = vld [vmem:[%s12587_s1 + $0x510] sm:$0xff] }
  0x18   :  { %v143_v5 = vld [vmem:[%s12588_s0 + $0x400] sm:$0xff]  ;;  %v144_v9 = vld [vmem:[%s12588_s0 + $0x408] sm:$0xff]  ;;  %5087 = vmatprep.mubr.bf16.mxu1 %v8322_v4  ;;  %v149_v4 = vld [vmem:[%s12588_s0 + $0x430] sm:$0xff] }
  0x19   :  { %v15_v8 = vld [vmem:[%s12588_s0] sm:$0xff]  ;;  %v16_v10 = vld [vmem:[%s12588_s0 + $0x8] sm:$0xff] }
  0x1a   :  { %628 = vperm.xlu1 %8319, %v310_v13   ;;  %v8325_v13 = vld [vmem:[%s12589_s2 + $0x24] ss:$72 sps:$4 sm:$0xff]  }
  0x1b   :  { %623 = vperm.xlu0 %8318, %v309_v14   ;;  %5987 = vmatprep.mubr.bf16.mxu0 %v8325_v13  ;;  %v23_v13 = vld [vmem:[%s12588_s0 + $0x40] sm:$0xff] }
  0x1e   :  { %1268 = vperm.xlu1 %8319, %v438_v15  }
  0x1f   :  { %1263 = vperm.xlu0 %8318, %v437_v16  }
  0x22   :  { %638 = vperm.xlu1 %8319, %v312_v17  }
  0x23   :  { %633 = vperm.xlu0 %8318, %v311_v18  }
  0x26   :  { %1278 = vperm.xlu1 %8319, %v440_v19  }
  0x27   :  { %1273 = vperm.xlu0 %8318, %v439_v20   ;;  %v18_v20 = vld [vmem:[%s12588_s0 + $0x18] sm:$0xff] }
  0x2a   :  { %648 = vperm.xlu1 %8319, %v314_v21   ;;  %v17_v21 = vld [vmem:[%s12588_s0 + $0x10] sm:$0xff] }
  0x2b   :  { %643 = vperm.xlu0 %8318, %v313_v22   ;;  %v468_v22 = vld [vmem:[%s12587_s1 + $0x528] sm:$0xff] }
  0x2e   :  { %1288 = vperm.xlu1 %8319, %v442_v23   ;;  %v467_v23 = vld [vmem:[%s12587_s1 + $0x520] sm:$0xff] }
  0x2f   :  { %1283 = vperm.xlu0 %8318, %v441_v24  }
  0x32   :  { %658 = vperm.xlu1 %8319, %v316_v25  }
  0x33   :  { %653 = vperm.xlu0 %8318, %v315_v26  }
  0x36   :  { %1298 = vperm.xlu1 %8319, %v444_v27  }
  0x37   :  { %1293 = vperm.xlu0 %8318, %v443_v28  }
  0x3a   :  { %668 = vperm.xlu1 %8319, %v318_v29  }
  0x3b   :  { %663 = vperm.xlu0 %8318, %v317_v30   ;;  %v146_v30 = vld [vmem:[%s12588_s0 + $0x418] sm:$0xff] }
  0x3e   :  { %1308 = vperm.xlu1 %8319, %v446_v31   ;;  %v145_v31 = vld [vmem:[%s12588_s0 + $0x410] sm:$0xff] }
  0x3f   :  { %1303 = vperm.xlu0 %8318, %v445_v32   ;;  %v470_v32 = vld [vmem:[%s12587_s1 + $0x538] sm:$0xff] }
  0x42   :  { %678 = vperm.xlu1 %8319, %v320_v33   ;;  %v469_v33 = vld [vmem:[%s12587_s1 + $0x530] sm:$0xff] }
  0x43   :  { %673 = vperm.xlu0 %8318, %v319_v34  }
  0x46   :  { %1318 = vperm.xlu1 %8319, %v448_v35  }
  0x47   :  { %1313 = vperm.xlu0 %8318, %v447_v36  }
  0x4a   :  { %688 = vperm.xlu1 %8319, %v322_v37  }
  0x4b   :  { %683 = vperm.xlu0 %8318, %v321_v38  }
  0x4e   :  { %1328 = vperm.xlu1 %8319, %v450_v39   ;;  %v20_v39 = vld [vmem:[%s12588_s0 + $0x28] sm:$0xff] }
  0x4f   :  { %1323 = vperm.xlu0 %8318, %v449_v40   ;;  %v19_v40 = vld [vmem:[%s12588_s0 + $0x20] sm:$0xff] }
  0x52   :  { %698 = vperm.xlu1 %8319, %v324_v41   ;;  %v472_v41 = vld [vmem:[%s12587_s1 + $0x548] sm:$0xff] }
  0x53   :  { %693 = vperm.xlu0 %8318, %v323_v42   ;;  %v471_v42 = vld [vmem:[%s12587_s1 + $0x540] sm:$0xff] }
  0x56   :  { %1338 = vperm.xlu1 %8319, %v452_v43  }
  0x57   :  { %1333 = vperm.xlu0 %8318, %v451_v44  }
  0x5a   :  { %708 = vperm.xlu1 %8319, %v326_v45  }
  0x5b   :  { %703 = vperm.xlu0 %8318, %v325_v46  }
  0x5e   :  { %1348 = vperm.xlu1 %8319, %v454_v47  }
  0x5f   :  { %1343 = vperm.xlu0 %8318, %v453_v48   ;;  %v148_v48 = vld [vmem:[%s12588_s0 + $0x428] sm:$0xff] }
  0x62   :  { %718 = vperm.xlu1 %8319, %v328_v49   ;;  %v147_v49 = vld [vmem:[%s12588_s0 + $0x420] sm:$0xff] }
  0x63   :  { %713 = vperm.xlu0 %8318, %v327_v50   ;;  %v474_v50 = vld [vmem:[%s12587_s1 + $0x558] sm:$0xff] }
  0x66   :  { %1358 = vperm.xlu1 %8319, %v456_v51   ;;  %v473_v51 = vld [vmem:[%s12587_s1 + $0x550] sm:$0xff] }
  0x67   :  { %1353 = vperm.xlu0 %8318, %v455_v52  }
  0x6a   :  { %728 = vperm.xlu1 %8319, %v330_v53  }
  0x6b   :  { %723 = vperm.xlu0 %8318, %v329_v54  }
  0x6e   :  { %1368 = vperm.xlu1 %8319, %v458_v55  }
  0x6f   :  { %1363 = vperm.xlu0 %8318, %v457_v56  }
  0x72   :  { %738 = vperm.xlu1 %8319, %v332_v57   ;;  %v22_v57 = vld [vmem:[%s12588_s0 + $0x38] sm:$0xff] }
  0x73   :  { %733 = vperm.xlu0 %8318, %v331_v58   ;;  %v21_v58 = vld [vmem:[%s12588_s0 + $0x30] sm:$0xff] }
  0x76   :  { %1378 = vperm.xlu1 %8319, %v460_v59   ;;  %v476_v59 = vld [vmem:[%s12587_s1 + $0x568] sm:$0xff] }
  0x77   :  { %1373 = vperm.xlu0 %8318, %v459_v60   ;;  %v475_v60 = vld [vmem:[%s12587_s1 + $0x560] sm:$0xff] }
  0x7a   :  { %748 = vperm.xlu1 %8319, %v334_v61  }
  0x7b   :  { %743 = vperm.xlu0 %8318, %v333_v62  }
  0x7e   :  { %1388 = vperm.xlu1 %8319, %v462_v63  }
  0x7f   :  { %1383 = vperm.xlu0 %8318, %v461_v1  }
  0x81   :  { %v1234_v6 = vpop.permute.xlu1 %1233 }
  0x82   :  { %v594_v7 = vpop.permute.xlu0 %593  ;;  %1398 = vperm.xlu1 %8319, %v464_v2   ;;  %v2159_v14 = vmul.f32 %v1234_v6, %v143_v5  ;;  %v478_v5 = vld [vmem:[%s12587_s1 + $0x578] sm:$0xff]  ;;  %v477_v6 = vld [vmem:[%s12587_s1 + $0x570] sm:$0xff] }
  0x83   :  { %1393 = vperm.xlu0 %8318, %v463_v3   ;;  %v2031_v17 = vmul.f32 %v594_v7, %v15_v8  ;;  %v150_v3 = vld [vmem:[%s12588_s0 + $0x438] sm:$0xff] }
  0x85   :  { %v1239_v15 = vpop.permute.xlu1 %1238 }
  0x86   :  { %v599_v16 = vpop.permute.xlu0 %598  ;;  %v2160_v18 = vmul.f32 %v1239_v15, %v144_v9  ;;  %1408 = vperm.xlu1 %8319, %v466_v11   ;;  %v479_v15 = vld [vmem:[%s12587_s1 + $0x580] sm:$0xff] }
  0x87   :  { %v2032_v19 = vmul.f32 %v599_v16, %v16_v10  ;;  %1403 = vperm.xlu0 %8318, %v465_v12   ;;  %v24_v12 = vld [vmem:[%s12588_s0 + $0x48] sm:$0xff] }
  0x88   :  { %v9227_v25 = vpack.c.bf16 %v2160_v18, %v2159_v14  ;;  %v480_v14 = vld [vmem:[%s12587_s1 + $0x588] sm:$0xff] }
  0x89   :  { %v2319_v24 = vpack.c.bf16 %v2032_v19, %v2031_v17  ;;  %v609_v26 = vpop.permute.xlu1 %608 }
  0x8a   :  { %v604_v27 = vpop.permute.xlu0 %603  ;;  %v2034_v28 = vmul.f32 %v609_v26, %v18_v20  ;;  %1418 = vperm.xlu1 %8319, %v468_v22   ;;  %5956 = vmatpush1.bf16.msra.mxu0 %v9227_v25  ;;  %v151_v22 = vld [vmem:[%s12588_s0 + $0x440] sm:$0xff] }
  0x8b   :  { %v2033_v29 = vmul.f32 %v604_v27, %v17_v21  ;;  %1413 = vperm.xlu0 %8318, %v467_v23   ;;  %5056 = vmatpush1.bf16.msra.mxu1 %v2319_v24  ;;  %v152_v21 = vld [vmem:[%s12588_s0 + $0x448] sm:$0xff]  ;;  %v482_v23 = vld [vmem:[%s12587_s1 + $0x598] sm:$0xff]  ;;  %v481_v24 = vld [vmem:[%s12587_s1 + $0x590] sm:$0xff] }
  0x8c   :  { %5057 = vmatprep.subr.bf16.mxu1 %v8968_v0  ;;  %5957 = vmatprep.subr.bf16.mxu0 %v8968_v0 }
  0x8d   :  { %v2320_v34 = vpack.c.bf16 %v2034_v28, %v2033_v29  ;;  %v1249_v35 = vpop.permute.xlu1 %1248 }
  0x8e   :  { %v1244_v36 = vpop.permute.xlu0 %1243  ;;  %v2162_v37 = vmul.f32 %v1249_v35, %v146_v30  ;;  %1428 = vperm.xlu1 %8319, %v470_v32   ;;  %v25_v32 = vld [vmem:[%s12588_s0 + $0x50] sm:$0xff] }
  0x8f   :  { %v2161_v38 = vmul.f32 %v1244_v36, %v145_v31  ;;  %1423 = vperm.xlu0 %8318, %v469_v33   ;;  %5058 = vmatpush1.bf16.msra.mxu1 %v2320_v34  ;;  %v26_v31 = vld [vmem:[%s12588_s0 + $0x58] sm:$0xff]  ;;  %v484_v33 = vld [vmem:[%s12587_s1 + $0x5a8] sm:$0xff]  ;;  %v483_v34 = vld [vmem:[%s12587_s1 + $0x5a0] sm:$0xff] }
  0x90   :  { %5059 = vmatprep.subr.bf16.mxu1 %v8968_v0 }
  0x91   :  { %v9256_v43 = vpack.c.bf16 %v2162_v37, %v2161_v38  ;;  %v619_v44 = vpop.permute.xlu1 %618 }
  0x92   :  { %v614_v45 = vpop.permute.xlu0 %613  ;;  %v2036_v46 = vmul.f32 %v619_v44, %v20_v39  ;;  %1438 = vperm.xlu1 %8319, %v472_v41   ;;  %v153_v41 = vld [vmem:[%s12588_s0 + $0x450] sm:$0xff] }
  0x93   :  { %v2035_v47 = vmul.f32 %v614_v45, %v19_v40  ;;  %1433 = vperm.xlu0 %8318, %v471_v42   ;;  %5958 = vmatpush1.bf16.msra.mxu0 %v9256_v43  ;;  %v154_v40 = vld [vmem:[%s12588_s0 + $0x458] sm:$0xff]  ;;  %v485_v44 = vld [vmem:[%s12587_s1 + $0x5b0] sm:$0xff] }
  0x94   :  { %5959 = vmatprep.subr.bf16.mxu0 %v8968_v0  ;;  %v486_v42 = vld [vmem:[%s12587_s1 + $0x5b8] sm:$0xff] }
  0x95   :  { %v2321_v52 = vpack.c.bf16 %v2036_v46, %v2035_v47  ;;  %v1259_v53 = vpop.permute.xlu1 %1258 }
  0x96   :  { %v1254_v54 = vpop.permute.xlu0 %1253  ;;  %v2164_v55 = vmul.f32 %v1259_v53, %v148_v48  ;;  %1448 = vperm.xlu1 %8319, %v474_v50   ;;  %v28_v50 = vld [vmem:[%s12588_s0 + $0x68] sm:$0xff]  ;;  %v487_v53 = vld [vmem:[%s12587_s1 + $0x5c0] sm:$0xff] }
  0x97   :  { %v2163_v56 = vmul.f32 %v1254_v54, %v147_v49  ;;  %1443 = vperm.xlu0 %8318, %v473_v51   ;;  %5060 = vmatpush1.bf16.msra.mxu1 %v2321_v52  ;;  %v27_v51 = vld [vmem:[%s12588_s0 + $0x60] sm:$0xff]  ;;  %v488_v52 = vld [vmem:[%s12587_s1 + $0x5c8] sm:$0xff] }
  0x98   :  { %5061 = vmatprep.subr.bf16.mxu1 %v8968_v0 }
  0x99   :  { %v9285_v61 = vpack.c.bf16 %v2164_v55, %v2163_v56  ;;  %v629_v62 = vpop.permute.xlu1 %628 }
  0x9a   :  { %v624_v63 = vpop.permute.xlu0 %623  ;;  %v2038_v1 = vmul.f32 %v629_v62, %v22_v57  ;;  %1458 = vperm.xlu1 %8319, %v476_v59   ;;  %v156_v59 = vld [vmem:[%s12588_s0 + $0x468] sm:$0xff]  ;;  %v490_v62 = vld [vmem:[%s12587_s1 + $0x5d8] sm:$0xff] }
  0x9b   :  { %v2037_v2 = vmul.f32 %v624_v63, %v21_v58  ;;  %1453 = vperm.xlu0 %8318, %v475_v60   ;;  %5960 = vmatpush1.bf16.msra.mxu0 %v9285_v61  ;;  %v155_v60 = vld [vmem:[%s12588_s0 + $0x460] sm:$0xff]  ;;  %v489_v63 = vld [vmem:[%s12587_s1 + $0x5d0] sm:$0xff] }
  0x9c   :  { %5961 = vmatprep.subr.bf16.mxu0 %v8968_v0 }
  0x9d   :  { %v2322_v7 = vpack.c.bf16 %v2038_v1, %v2037_v2  ;;  %v1269_v8 = vpop.permute.xlu1 %1268 }
  0x9e   :  { %v1264_v9 = vpop.permute.xlu0 %1263  ;;  %v2166_v10 = vmul.f32 %v1269_v8, %v150_v3  ;;  %1468 = vperm.xlu1 %8319, %v478_v5   ;;  %v492_v8 = vld [vmem:[%s12587_s1 + $0x5e8] sm:$0xff] }
  0x9f   :  { %v2165_v11 = vmul.f32 %v1264_v9, %v149_v4  ;;  %1463 = vperm.xlu0 %8318, %v477_v6   ;;  %5062 = vmatpush1.bf16.msra.mxu1 %v2322_v7  ;;  %v30_v6 = vld [vmem:[%s12588_s0 + $0x78] sm:$0xff]  ;;  %v29_v7 = vld [vmem:[%s12588_s0 + $0x70] sm:$0xff]  ;;  %v491_v9 = vld [vmem:[%s12587_s1 + $0x5e0] sm:$0xff] }
  0xa0   :  { %5063 = vmatprep.subr.bf16.mxu1 %v8968_v0 }
  0xa1   :  { %v9314_v16 = vpack.c.bf16 %v2166_v10, %v2165_v11  ;;  %v639_v17 = vpop.permute.xlu1 %638 }
  0xa2   :  { %v634_v18 = vpop.permute.xlu0 %633  ;;  %v2040_v19 = vmul.f32 %v639_v17, %v24_v12  ;;  %1478 = vperm.xlu1 %8319, %v480_v14   ;;  %v157_v17 = vld [vmem:[%s12588_s0 + $0x470] sm:$0xff] }
  0xa3   :  { %v2039_v20 = vmul.f32 %v634_v18, %v23_v13  ;;  %1473 = vperm.xlu0 %8318, %v479_v15   ;;  %5962 = vmatpush1.bf16.msra.mxu0 %v9314_v16  ;;  %v158_v15 = vld [vmem:[%s12588_s0 + $0x478] sm:$0xff] }
  0xa4   :  { %5963 = vmatprep.subr.bf16.mxu0 %v8968_v0  ;;  %v494_v18 = vld [vmem:[%s12587_s1 + $0x5f8] sm:$0xff] }
  0xa5   :  { %v2323_v26 = vpack.c.bf16 %v2040_v19, %v2039_v20  ;;  %v1279_v27 = vpop.permute.xlu1 %1278  ;;  %v493_v19 = vld [vmem:[%s12587_s1 + $0x5f0] sm:$0xff] }
  0xa6   :  { %v1274_v28 = vpop.permute.xlu0 %1273  ;;  %v2168_v29 = vmul.f32 %v1279_v27, %v152_v21  ;;  %1488 = vperm.xlu1 %8319, %v482_v23   ;;  %v31_v27 = vld [vmem:[%s12588_s0 + $0x80] sm:$0xff] }
  0xa7   :  { %v2167_v30 = vmul.f32 %v1274_v28, %v151_v22  ;;  %1483 = vperm.xlu0 %8318, %v481_v24   ;;  %5064 = vmatpush1.bf16.msra.mxu1 %v2323_v26  ;;  %v32_v26 = vld [vmem:[%s12588_s0 + $0x88] sm:$0xff] }
  0xa8   :  { %5065 = vmatprep.subr.bf16.mxu1 %v8968_v0  ;;  %v336_v28 = vld [vmem:[%s12587_s1 + $0x108] sm:$0xff] }
  0xa9   :  { %v9343_v35 = vpack.c.bf16 %v2168_v29, %v2167_v30  ;;  %v649_v36 = vpop.permute.xlu1 %648  ;;  %v335_v29 = vld [vmem:[%s12587_s1 + $0x100] sm:$0xff] }
  0xaa   :  { %v644_v37 = vpop.permute.xlu0 %643  ;;  %v2042_v38 = vmul.f32 %v649_v36, %v26_v31  ;;  %1498 = vperm.xlu1 %8319, %v484_v33   ;;  %v160_v36 = vld [vmem:[%s12588_s0 + $0x488] sm:$0xff] }
  0xab   :  { %v2041_v39 = vmul.f32 %v644_v37, %v25_v32  ;;  %1493 = vperm.xlu0 %8318, %v483_v34   ;;  %5964 = vmatpush1.bf16.msra.mxu0 %v9343_v35  ;;  %v159_v37 = vld [vmem:[%s12588_s0 + $0x480] sm:$0xff] }
  0xac   :  { %5965 = vmatprep.subr.bf16.mxu0 %v8968_v0 }
  0xad   :  { %v2324_v45 = vpack.c.bf16 %v2042_v38, %v2041_v39  ;;  %v1289_v46 = vpop.permute.xlu1 %1288  ;;  %v338_v38 = vld [vmem:[%s12587_s1 + $0x118] sm:$0xff]  ;;  %v337_v39 = vld [vmem:[%s12587_s1 + $0x110] sm:$0xff] }
  0xae   :  { %v1284_v47 = vpop.permute.xlu0 %1283  ;;  %v2170_v48 = vmul.f32 %v1289_v46, %v154_v40  ;;  %1508 = vperm.xlu1 %8319, %v486_v42   ;;  %v34_v46 = vld [vmem:[%s12588_s0 + $0x98] sm:$0xff] }
  0xaf   :  { %v2169_v49 = vmul.f32 %v1284_v47, %v153_v41  ;;  %1503 = vperm.xlu0 %8318, %v485_v44   ;;  %5066 = vmatpush1.bf16.msra.mxu1 %v2324_v45  ;;  %v33_v47 = vld [vmem:[%s12588_s0 + $0x90] sm:$0xff] }
  0xb0   :  { %5067 = vmatprep.subr.bf16.mxu1 %v8968_v0 }
  0xb1   :  { %v9372_v54 = vpack.c.bf16 %v2170_v48, %v2169_v49  ;;  %v659_v55 = vpop.permute.xlu1 %658  ;;  %v340_v48 = vld [vmem:[%s12587_s1 + $0x128] sm:$0xff]  ;;  %v339_v49 = vld [vmem:[%s12587_s1 + $0x120] sm:$0xff] }
  0xb2   :  { %v654_v56 = vpop.permute.xlu0 %653  ;;  %v2044_v57 = vmul.f32 %v659_v55, %v28_v50  ;;  %1518 = vperm.xlu1 %8319, %v488_v52  }
  0xb3   :  { %v2043_v58 = vmul.f32 %v654_v56, %v27_v51  ;;  %1513 = vperm.xlu0 %8318, %v487_v53   ;;  %5966 = vmatpush1.bf16.msra.mxu0 %v9372_v54  ;;  %v162_v56 = vld [vmem:[%s12588_s0 + $0x498] sm:$0xff] }
  0xb4   :  { %5967 = vmatprep.subr.bf16.mxu0 %v8968_v0 }
  0xb5   :  { %v2325_v1 = vpack.c.bf16 %v2044_v57, %v2043_v58  ;;  %v1299_v2 = vpop.permute.xlu1 %1298  ;;  %v161_v57 = vld [vmem:[%s12588_s0 + $0x490] sm:$0xff]  ;;  %v342_v58 = vld [vmem:[%s12587_s1 + $0x138] sm:$0xff] }
  0xb6   :  { %v1294_v3 = vpop.permute.xlu0 %1293  ;;  %v2172_v4 = vmul.f32 %v1299_v2, %v156_v59  ;;  %1528 = vperm.xlu1 %8319, %v490_v62   ;;  %v341_v59 = vld [vmem:[%s12587_s1 + $0x130] sm:$0xff] }
  0xb7   :  { %v2171_v5 = vmul.f32 %v1294_v3, %v155_v60  ;;  %1523 = vperm.xlu0 %8318, %v489_v63   ;;  %5068 = vmatpush1.bf16.msra.mxu1 %v2325_v1  ;;  %v36_v3 = vld [vmem:[%s12588_s0 + $0xa8] sm:$0xff] }
  0xb8   :  { %5069 = vmatprep.subr.bf16.mxu1 %v8968_v0 }
  0xb9   :  { %v9401_v10 = vpack.c.bf16 %v2172_v4, %v2171_v5  ;;  %v669_v11 = vpop.permute.xlu1 %668  ;;  %v35_v4 = vld [vmem:[%s12588_s0 + $0xa0] sm:$0xff]  ;;  %v344_v5 = vld [vmem:[%s12587_s1 + $0x148] sm:$0xff] }
  0xba   :  { %v664_v12 = vpop.permute.xlu0 %663  ;;  %v2046_v13 = vmul.f32 %v669_v11, %v30_v6  ;;  %1538 = vperm.xlu1 %8319, %v492_v8   ;;  %v343_v6 = vld [vmem:[%s12587_s1 + $0x140] sm:$0xff] }
  0xbb   :  { %v2045_v14 = vmul.f32 %v664_v12, %v29_v7  ;;  %1533 = vperm.xlu0 %8318, %v491_v9   ;;  %5968 = vmatpush1.bf16.msra.mxu0 %v9401_v10 }
  0xbc   :  { %5969 = vmatprep.subr.bf16.mxu0 %v8968_v0 }
  0xbd   :  { %v2326_v20 = vpack.c.bf16 %v2046_v13, %v2045_v14  ;;  %v1309_v21 = vpop.permute.xlu1 %1308  ;;  %v164_v13 = vld [vmem:[%s12588_s0 + $0x4a8] sm:$0xff]  ;;  %v163_v14 = vld [vmem:[%s12588_s0 + $0x4a0] sm:$0xff] }
  0xbe   :  { %v1304_v22 = vpop.permute.xlu0 %1303  ;;  %v2174_v23 = vmul.f32 %v1309_v21, %v158_v15  ;;  %1548 = vperm.xlu1 %8319, %v494_v18   ;;  %v346_v15 = vld [vmem:[%s12587_s1 + $0x158] sm:$0xff] }
  0xbf   :  { %v2173_v24 = vmul.f32 %v1304_v22, %v157_v17  ;;  %1543 = vperm.xlu0 %8318, %v493_v19   ;;  %5070 = vmatpush1.bf16.msra.mxu1 %v2326_v20  ;;  %v345_v17 = vld [vmem:[%s12587_s1 + $0x150] sm:$0xff] }
  0xc0   :  { %5071 = vmatprep.subr.bf16.mxu1 %v8968_v0 }
  0xc1   :  { %v9430_v30 = vpack.c.bf16 %v2174_v23, %v2173_v24  ;;  %v679_v31 = vpop.permute.xlu1 %678  ;;  %v38_v23 = vld [vmem:[%s12588_s0 + $0xb8] sm:$0xff]  ;;  %v37_v24 = vld [vmem:[%s12588_s0 + $0xb0] sm:$0xff] }
  0xc2   :  { %v674_v32 = vpop.permute.xlu0 %673  ;;  %v2048_v33 = vmul.f32 %v679_v31, %v32_v26  ;;  %758 = vperm.xlu1 %8319, %v336_v28   ;;  %v348_v26 = vld [vmem:[%s12587_s1 + $0x168] sm:$0xff] }
  0xc3   :  { %v2047_v34 = vmul.f32 %v674_v32, %v31_v27  ;;  %753 = vperm.xlu0 %8318, %v335_v29   ;;  %5970 = vmatpush1.bf16.msra.mxu0 %v9430_v30  ;;  %v347_v27 = vld [vmem:[%s12587_s1 + $0x160] sm:$0xff] }
  0xc4   :  { %5971 = vmatprep.subr.bf16.mxu0 %v8968_v0 }
  0xc5   :  { %v2327_v40 = vpack.c.bf16 %v2048_v33, %v2047_v34  ;;  %v1319_v41 = vpop.permute.xlu1 %1318  ;;  %v166_v34 = vld [vmem:[%s12588_s0 + $0x4b8] sm:$0xff] }
  0xc6   :  { %v1314_v42 = vpop.permute.xlu0 %1313  ;;  %v2176_v44 = vmul.f32 %v1319_v41, %v160_v36  ;;  %768 = vperm.xlu1 %8319, %v338_v38   ;;  %v165_v36 = vld [vmem:[%s12588_s0 + $0x4b0] sm:$0xff] }
  0xc7   :  { %v2175_v45 = vmul.f32 %v1314_v42, %v159_v37  ;;  %763 = vperm.xlu0 %8318, %v337_v39   ;;  %5072 = vmatpush1.bf16.msra.mxu1 %v2327_v40  ;;  %v350_v37 = vld [vmem:[%s12587_s1 + $0x178] sm:$0xff]  ;;  %v349_v38 = vld [vmem:[%s12587_s1 + $0x170] sm:$0xff] }
  0xc8   :  { %5073 = vmatprep.subr.bf16.mxu1 %v8968_v0 }
  0xc9   :  { %v9459_v50 = vpack.c.bf16 %v2176_v44, %v2175_v45  ;;  %v689_v51 = vpop.permute.xlu1 %688  ;;  %v40_v45 = vld [vmem:[%s12588_s0 + $0xc8] sm:$0xff] }
  0xca   :  { %v684_v52 = vpop.permute.xlu0 %683  ;;  %v2050_v53 = vmul.f32 %v689_v51, %v34_v46  ;;  %778 = vperm.xlu1 %8319, %v340_v48   ;;  %v39_v46 = vld [vmem:[%s12588_s0 + $0xc0] sm:$0xff] }
  0xcb   :  { %v2049_v55 = vmul.f32 %v684_v52, %v33_v47  ;;  %773 = vperm.xlu0 %8318, %v339_v49   ;;  %5972 = vmatpush1.bf16.msra.mxu0 %v9459_v50  ;;  %v352_v47 = vld [vmem:[%s12587_s1 + $0x188] sm:$0xff]  ;;  %v351_v48 = vld [vmem:[%s12587_s1 + $0x180] sm:$0xff] }
  0xcc   :  { %5973 = vmatprep.subr.bf16.mxu0 %v8968_v0 }
  0xcd   :  { %v2328_v60 = vpack.c.bf16 %v2050_v53, %v2049_v55  ;;  %v1329_v62 = vpop.permute.xlu1 %1328 }
  0xce   :  { %v1324_v63 = vpop.permute.xlu0 %1323  ;;  %v2178_v1 = vmul.f32 %v1329_v62, %v162_v56  ;;  %788 = vperm.xlu1 %8319, %v342_v58   ;;  %v168_v56 = vld [vmem:[%s12588_s0 + $0x4c8] sm:$0xff]  ;;  %v354_v58 = vld [vmem:[%s12587_s1 + $0x198] sm:$0xff] }
  0xcf   :  { %v2177_v2 = vmul.f32 %v1324_v63, %v161_v57  ;;  %783 = vperm.xlu0 %8318, %v341_v59   ;;  %5074 = vmatpush1.bf16.msra.mxu1 %v2328_v60  ;;  %v167_v57 = vld [vmem:[%s12588_s0 + $0x4c0] sm:$0xff]  ;;  %v353_v59 = vld [vmem:[%s12587_s1 + $0x190] sm:$0xff] }
  0xd0   :  { %5075 = vmatprep.subr.bf16.mxu1 %v8968_v0 }
  0xd1   :  { %v9488_v7 = vpack.c.bf16 %v2178_v1, %v2177_v2  ;;  %v699_v8 = vpop.permute.xlu1 %698 }
  0xd2   :  { %v694_v9 = vpop.permute.xlu0 %693  ;;  %v2052_v11 = vmul.f32 %v699_v8, %v36_v3  ;;  %798 = vperm.xlu1 %8319, %v344_v5   ;;  %v42_v3 = vld [vmem:[%s12588_s0 + $0xd8] sm:$0xff]  ;;  %v356_v5 = vld [vmem:[%s12587_s1 + $0x1a8] sm:$0xff] }
  0xd3   :  { %v2051_v12 = vmul.f32 %v694_v9, %v35_v4  ;;  %793 = vperm.xlu0 %8318, %v343_v6   ;;  %5974 = vmatpush1.bf16.msra.mxu0 %v9488_v7  ;;  %v41_v4 = vld [vmem:[%s12588_s0 + $0xd0] sm:$0xff]  ;;  %v355_v6 = vld [vmem:[%s12587_s1 + $0x1a0] sm:$0xff] }
  0xd4   :  { %5975 = vmatprep.subr.bf16.mxu0 %v8968_v0 }
  0xd5   :  { %v2329_v18 = vpack.c.bf16 %v2052_v11, %v2051_v12  ;;  %v1339_v19 = vpop.permute.xlu1 %1338 }
  0xd6   :  { %v1334_v20 = vpop.permute.xlu0 %1333  ;;  %v2180_v21 = vmul.f32 %v1339_v19, %v164_v13  ;;  %808 = vperm.xlu1 %8319, %v346_v15   ;;  %v169_v15 = vld [vmem:[%s12588_s0 + $0x4d0] sm:$0xff] }
  0xd7   :  { %v2179_v22 = vmul.f32 %v1334_v20, %v163_v14  ;;  %803 = vperm.xlu0 %8318, %v345_v17   ;;  %5076 = vmatpush1.bf16.msra.mxu1 %v2329_v18  ;;  %v170_v14 = vld [vmem:[%s12588_s0 + $0x4d8] sm:$0xff]  ;;  %v357_v18 = vld [vmem:[%s12587_s1 + $0x1b0] sm:$0xff] }
  0xd8   :  { %5077 = vmatprep.subr.bf16.mxu1 %v8968_v0  ;;  %v358_v17 = vld [vmem:[%s12587_s1 + $0x1b8] sm:$0xff] }
  0xd9   :  { %v9517_v28 = vpack.c.bf16 %v2180_v21, %v2179_v22  ;;  %v709_v29 = vpop.permute.xlu1 %708 }
  0xda   :  { %v704_v31 = vpop.permute.xlu0 %703  ;;  %v2054_v32 = vmul.f32 %v709_v29, %v38_v23  ;;  %818 = vperm.xlu1 %8319, %v348_v26   ;;  %v43_v26 = vld [vmem:[%s12588_s0 + $0xe0] sm:$0xff] }
  0xdb   :  { %v2053_v33 = vmul.f32 %v704_v31, %v37_v24  ;;  %813 = vperm.xlu0 %8318, %v347_v27   ;;  %5976 = vmatpush1.bf16.msra.mxu0 %v9517_v28  ;;  %v44_v24 = vld [vmem:[%s12588_s0 + $0xe8] sm:$0xff]  ;;  %v359_v29 = vld [vmem:[%s12587_s1 + $0x1c0] sm:$0xff] }
  0xdc   :  { %5977 = vmatprep.subr.bf16.mxu0 %v8968_v0  ;;  %v360_v27 = vld [vmem:[%s12587_s1 + $0x1c8] sm:$0xff] }
  0xdd   :  { %v2330_v39 = vpack.c.bf16 %v2054_v32, %v2053_v33  ;;  %v1349_v40 = vpop.permute.xlu1 %1348 }
  0xde   :  { %v1344_v41 = vpop.permute.xlu0 %1343  ;;  %v2182_v42 = vmul.f32 %v1349_v40, %v166_v34  ;;  %828 = vperm.xlu1 %8319, %v350_v37   ;;  %v172_v37 = vld [vmem:[%s12588_s0 + $0x4e8] sm:$0xff]  ;;  %v361_v40 = vld [vmem:[%s12587_s1 + $0x1d0] sm:$0xff] }
  0xdf   :  { %v2181_v44 = vmul.f32 %v1344_v41, %v165_v36  ;;  %823 = vperm.xlu0 %8318, %v349_v38   ;;  %5078 = vmatpush1.bf16.msra.mxu1 %v2330_v39  ;;  %v171_v38 = vld [vmem:[%s12588_s0 + $0x4e0] sm:$0xff]  ;;  %v362_v39 = vld [vmem:[%s12587_s1 + $0x1d8] sm:$0xff] }
  0xe0   :  { %5079 = vmatprep.subr.bf16.mxu1 %v8968_v0 }
  0xe1   :  { %v9546_v49 = vpack.c.bf16 %v2182_v42, %v2181_v44  ;;  %v719_v51 = vpop.permute.xlu1 %718 }
  0xe2   :  { %v714_v52 = vpop.permute.xlu0 %713  ;;  %v2056_v53 = vmul.f32 %v719_v51, %v40_v45  ;;  %838 = vperm.xlu1 %8319, %v352_v47   ;;  %v46_v47 = vld [vmem:[%s12588_s0 + $0xf8] sm:$0xff]  ;;  %v364_v51 = vld [vmem:[%s12587_s1 + $0x1e8] sm:$0xff] }
  0xe3   :  { %v2055_v55 = vmul.f32 %v714_v52, %v39_v46  ;;  %833 = vperm.xlu0 %8318, %v351_v48   ;;  %5978 = vmatpush1.bf16.msra.mxu0 %v9546_v49  ;;  %v45_v48 = vld [vmem:[%s12588_s0 + $0xf0] sm:$0xff]  ;;  %v363_v52 = vld [vmem:[%s12587_s1 + $0x1e0] sm:$0xff] }
  0xe4   :  { %5979 = vmatprep.subr.bf16.mxu0 %v8968_v0 }
  0xe5   :  { %v2331_v60 = vpack.c.bf16 %v2056_v53, %v2055_v55  ;;  %v1359_v62 = vpop.permute.xlu1 %1358 }
  0xe6   :  { %v1354_v63 = vpop.permute.xlu0 %1353  ;;  %v2184_v1 = vmul.f32 %v1359_v62, %v168_v56  ;;  %848 = vperm.xlu1 %8319, %v354_v58   ;;  %v366_v62 = vld [vmem:[%s12587_s1 + $0x1f8] sm:$0xff] }
  0xe7   :  { %v2183_v2 = vmul.f32 %v1354_v63, %v167_v57  ;;  %843 = vperm.xlu0 %8318, %v353_v59   ;;  %5080 = vmatpush1.bf16.msra.mxu1 %v2331_v60  ;;  %v174_v59 = vld [vmem:[%s12588_s0 + $0x4f8] sm:$0xff]  ;;  %v173_v60 = vld [vmem:[%s12588_s0 + $0x4f0] sm:$0xff] }
  0xe8   :  { %5081 = vmatprep.subr.bf16.mxu1 %v8968_v0  ;;  %v365_v63 = vld [vmem:[%s12587_s1 + $0x1f0] sm:$0xff] }
  0xe9   :  { %v9575_v8 = vpack.c.bf16 %v2184_v1, %v2183_v2  ;;  %v729_v9 = vpop.permute.xlu1 %728 }
  0xea   :  { %v724_v11 = vpop.permute.xlu0 %723  ;;  %v2058_v12 = vmul.f32 %v729_v9, %v42_v3  ;;  %858 = vperm.xlu1 %8319, %v356_v5   ;;  %v176_v9 = vld [vmem:[%s12588_s0 + $0x508] sm:$0xff] }
  0xeb   :  { %v2057_v13 = vmul.f32 %v724_v11, %v41_v4  ;;  %853 = vperm.xlu0 %8318, %v355_v6   ;;  %5980 = vmatpush1.bf16.msra.mxu0 %v9575_v8  ;;  %v8320_v4 = vld [vmem:[%s12589_s2] ss:$72 sps:$4 sm:$0xff]  }
  0xec   :  { %5981 = vmatprep.subr.bf16.mxu0 %v8968_v0  ;;  %v175_v11 = vld [vmem:[%s12588_s0 + $0x500] sm:$0xff] }
  0xed   :  { %v2332_v19 = vpack.c.bf16 %v2058_v12, %v2057_v13  ;;  %v1369_v20 = vpop.permute.xlu1 %1368  ;;  %v496_v12 = vld [vmem:[%s12587_s1 + $0x608] sm:$0xff]  ;;  %v495_v13 = vld [vmem:[%s12587_s1 + $0x600] sm:$0xff] }
  0xee   :  { %v1364_v21 = vpop.permute.xlu0 %1363  ;;  %v2186_v22 = vmul.f32 %v1369_v20, %v170_v14  ;;  %868 = vperm.xlu1 %8319, %v358_v17  }
  0xef   :  { %v2185_v23 = vmul.f32 %v1364_v21, %v169_v15  ;;  %863 = vperm.xlu0 %8318, %v357_v18   ;;  %5082 = vmatpush1.bf16.msra.mxu1 %v2332_v19  ;;  %v8326_v15 = vld [vmem:[%s12589_s2 + $0x94] ss:$72 sps:$4 sm:$0xff]   ;;  %v8323_v19 = vld [vmem:[%s12589_s2 + $0x20] ss:$72 sps:$4 sm:$0xff]  }
  0xf0   :  { %5083 = vmatprep.subr.bf16.mxu1 %v8968_v0 }
  0xf1   :  { %v9604_v31 = vpack.c.bf16 %v2186_v22, %v2185_v23  ;;  %v739_v32 = vpop.permute.xlu1 %738  ;;  %v178_v22 = vld [vmem:[%s12588_s0 + $0x518] sm:$0xff]  ;;  %v177_v23 = vld [vmem:[%s12588_s0 + $0x510] sm:$0xff] }
  0xf2   :  { %v734_v33 = vpop.permute.xlu0 %733  ;;  %v2060_v34 = vmul.f32 %v739_v32, %v44_v24  ;;  %878 = vperm.xlu1 %8319, %v360_v27   ;;  %v498_v24 = vld [vmem:[%s12587_s1 + $0x618] sm:$0xff] }
  0xf3   :  { %v2059_v36 = vmul.f32 %v734_v33, %v43_v26  ;;  %873 = vperm.xlu0 %8318, %v359_v29   ;;  %5982 = vmatpush1.bf16.msra.mxu0 %v9604_v31  ;;  %v497_v26 = vld [vmem:[%s12587_s1 + $0x610] sm:$0xff] }
  0xf4   :  { %5983 = vmatprep.subr.bf16.mxu0 %v8968_v0  ;;  %v8329_v29 = vld [vmem:[%s12589_s2 + $0xb4] ss:$72 sps:$4 sm:$0xff]  }
  0xf5   :  { %v2333_v41 = vpack.c.bf16 %v2060_v34, %v2059_v36  ;;  %v1379_v42 = vpop.permute.xlu1 %1378  ;;  %v8328_v34 = vld [vmem:[%s12589_s2 + $0x90] ss:$72 sps:$4 sm:$0xff]  }
  0xf6   :  { %v1374_v44 = vpop.permute.xlu0 %1373  ;;  %v2188_v45 = vmul.f32 %v1379_v42, %v172_v37  ;;  %888 = vperm.xlu1 %8319, %v362_v39   ;;  %v179_v39 = vld [vmem:[%s12588_s0 + $0x520] sm:$0xff] }
  0xf7   :  { %v2187_v46 = vmul.f32 %v1374_v44, %v171_v38  ;;  %883 = vperm.xlu0 %8318, %v361_v40   ;;  %5084 = vmatpush1.bf16.msra.mxu1 %v2333_v41  ;;  %v180_v38 = vld [vmem:[%s12588_s0 + $0x528] sm:$0xff]  ;;  %v499_v41 = vld [vmem:[%s12587_s1 + $0x620] sm:$0xff] }
  0xf8   :  { %5085 = vmatprep.subr.bf16.mxu1 %v8968_v0  ;;  %v500_v40 = vld [vmem:[%s12587_s1 + $0x628] sm:$0xff] }
  0xf9   :  { %v9633_v53 = vpack.c.bf16 %v2188_v45, %v2187_v46  ;;  %v749_v55 = vpop.permute.xlu1 %748  ;;  %v8332_v44 = vld [vmem:[%s12589_s2 + $0x124] ss:$72 sps:$4 sm:$0xff]  }
  0xfa   :  { %v744_v56 = vpop.permute.xlu0 %743  ;;  %v2062_v57 = vmul.f32 %v749_v55, %v46_v47  ;;  %898 = vperm.xlu1 %8319, %v364_v51   ;;  %v8331_v47 = vld [vmem:[%s12589_s2 + $0xb0] ss:$72 sps:$4 sm:$0xff]  }
  0xfb   :  { %v2061_v58 = vmul.f32 %v744_v56, %v45_v48  ;;  %893 = vperm.xlu0 %8318, %v363_v52   ;;  %5984 = vmatpush1.bf16.msra.mxu0 %v9633_v53  ;;  %v182_v52 = vld [vmem:[%s12588_s0 + $0x538] sm:$0xff]  ;;  %v181_v55 = vld [vmem:[%s12588_s0 + $0x530] sm:$0xff] }
  0xfc   :  { %5985 = vmatprep.subr.bf16.mxu0 %v8968_v0  ;;  %v502_v56 = vld [vmem:[%s12587_s1 + $0x638] sm:$0xff] }
  0xfd   :  { %v2334_v1 = vpack.c.bf16 %v2062_v57, %v2061_v58  ;;  %v1389_v2 = vpop.permute.xlu1 %1388  ;;  %v501_v57 = vld [vmem:[%s12587_s1 + $0x630] sm:$0xff] }
  0xfe   :  { %v1384_v3 = vpop.permute.xlu0 %1383  ;;  %v2190_v5 = vmul.f32 %v1389_v2, %v174_v59  ;;  %908 = vperm.xlu1 %8319, %v366_v62   ;;  %v8335_v59 = vld [vmem:[%s12589_s2 + $0x144] ss:$72 sps:$4 sm:$0xff]  }
  0xff   :  { %v2189_v6 = vmul.f32 %v1384_v3, %v173_v60  ;;  %903 = vperm.xlu0 %8318, %v365_v63   ;;  %5086 = vmatpush1.bf16.msra.mxu1 %v2334_v1  ;;  %v8334_v63 = vld [vmem:[%s12589_s2 + $0x120] ss:$72 sps:$4 sm:$0xff]  }
 0x100   :  { %5280 = vmatprep.subr.bf16.mxu1 %v8968_v0  ;;  %v184_v3 = vld [vmem:[%s12588_s0 + $0x548] sm:$0xff] }
 0x101   :  { %v9665_v14 = vpack.c.bf16 %v2190_v5, %v2189_v6  ;;  %v1399_v17 = vpop.permute.xlu1 %1398  ;;  %v504_v5 = vld [vmem:[%s12587_s1 + $0x648] sm:$0xff]  ;;  %v503_v6 = vld [vmem:[%s12587_s1 + $0x640] sm:$0xff] }
 0x102   :  { %v1394_v18 = vpop.permute.xlu0 %1393  ;;  %v2192_v20 = vmul.f32 %v1399_v17, %v176_v9  ;;  %5088 = vmatmul.mubr.bf16.vlgmr.msra.gmra.mrb[0].mxu1 %v8320_v4  ;;  %1558 = vperm.xlu1 %8319, %v496_v12   ;;  %v183_v4 = vld [vmem:[%s12588_s0 + $0x540] sm:$0xff] }
 0x103   :  { %v2191_v21 = vmul.f32 %v1394_v18, %v175_v11  ;;  %1553 = vperm.xlu0 %8318, %v495_v13   ;;  %5986 = vmatpush1.bf16.msra.mxu0 %v9665_v14  ;;  %v8338_v11 = vld [vmem:[%s12589_s2 + $0x1b4] ss:$72 sps:$4 sm:$0xff]  }
 0x104   :  { %6180 = vmatprep.subr.bf16.mxu0 %v8968_v0  ;;  %5095 = vmatprep.mubr.bf16.mxu1 %v8326_v15  ;;  %v8337_v15 = vld [vmem:[%s12589_s2 + $0x140] ss:$72 sps:$4 sm:$0xff]  }
 0x105   :  { %v2399_v27 = vpack.c.bf16 %v2192_v20, %v2191_v21  ;;  %v1409_v32 = vpop.permute.xlu1 %1408  ;;  %v185_v20 = vld [vmem:[%s12588_s0 + $0x550] sm:$0xff]  ;;  %v506_v21 = vld [vmem:[%s12587_s1 + $0x658] sm:$0xff] }
 0x106   :  { %v1404_v33 = vpop.permute.xlu0 %1403  ;;  %v2194_v36 = vmul.f32 %v1409_v32, %v178_v22  ;;  %5988 = vmatmul.mubr.bf16.vlgmr.msra.gmra.mrb[0].mxu0 %v8323_v19  ;;  %1568 = vperm.xlu1 %8319, %v498_v24   ;;  %v186_v19 = vld [vmem:[%s12588_s0 + $0x558] sm:$0xff]  ;;  %v505_v22 = vld [vmem:[%s12587_s1 + $0x650] sm:$0xff] }
 0x107   :  { %v2193_v37 = vmul.f32 %v1404_v33, %v177_v23  ;;  %1563 = vperm.xlu0 %8318, %v497_v26   ;;  %6181 = vmatpush1.bf16.msra.mxu0 %v2399_v27  ;;  %v8341_v24 = vld [vmem:[%s12589_s2 + $0x1d4] ss:$72 sps:$4 sm:$0xff]  }
 0x108   :  { %6182 = vmatprep.subr.bf16.mxu0 %v8968_v0  ;;  %5995 = vmatprep.mubr.bf16.mxu0 %v8329_v29  ;;  %v8340_v29 = vld [vmem:[%s12589_s2 + $0x1b0] ss:$72 sps:$4 sm:$0xff]  }
 0x109   :  { %v2400_v42 = vpack.c.bf16 %v2194_v36, %v2193_v37  ;;  %v1419_v45 = vpop.permute.xlu1 %1418  ;;  %v187_v36 = vld [vmem:[%s12588_s0 + $0x560] sm:$0xff]  ;;  %v508_v37 = vld [vmem:[%s12587_s1 + $0x668] sm:$0xff] }
 0x10a   :  { %v1414_v46 = vpop.permute.xlu0 %1413  ;;  %v2196_v48 = vmul.f32 %v1419_v45, %v180_v38  ;;  %5096 = vmatmul.mubr.bf16.gmra.mrb[4].mxu1 %v8328_v34  ;;  %1578 = vperm.xlu1 %8319, %v500_v40   ;;  %v188_v34 = vld [vmem:[%s12588_s0 + $0x568] sm:$0xff]  ;;  %v507_v38 = vld [vmem:[%s12587_s1 + $0x660] sm:$0xff] }
 0x10b   :  { %v2195_v51 = vmul.f32 %v1414_v46, %v179_v39  ;;  %1573 = vperm.xlu0 %8318, %v499_v41   ;;  %6183 = vmatpush1.bf16.msra.mxu0 %v2400_v42  ;;  %v8344_v40 = vld [vmem:[%s12589_s2 + $0x244] ss:$72 sps:$4 sm:$0xff]  }
 0x10c   :  { %6184 = vmatprep.subr.bf16.mxu0 %v8968_v0  ;;  %5103 = vmatprep.mubr.bf16.mxu1 %v8332_v44  ;;  %v8343_v44 = vld [vmem:[%s12589_s2 + $0x1d0] ss:$72 sps:$4 sm:$0xff]  }
 0x10d   :  { %v2401_v58 = vpack.c.bf16 %v2196_v48, %v2195_v51  ;;  %v1429_v60 = vpop.permute.xlu1 %1428  ;;  %v189_v48 = vld [vmem:[%s12588_s0 + $0x570] sm:$0xff]  ;;  %v510_v51 = vld [vmem:[%s12587_s1 + $0x678] sm:$0xff] }
 0x10e   :  { %v1424_v62 = vpop.permute.xlu0 %1423  ;;  %v2198_v1 = vmul.f32 %v1429_v60, %v182_v52  ;;  %5996 = vmatmul.mubr.bf16.gmra.mrb[4].mxu0 %v8331_v47  ;;  %1588 = vperm.xlu1 %8319, %v502_v56   ;;  %v190_v47 = vld [vmem:[%s12588_s0 + $0x578] sm:$0xff]  ;;  %v509_v52 = vld [vmem:[%s12587_s1 + $0x670] sm:$0xff]  ;;  %v8347_v56 = vld [vmem:[%s12589_s2 + $0x264] ss:$72 sps:$4 sm:$0xff]  }
 0x10f   :  { %v2197_v2 = vmul.f32 %v1424_v62, %v181_v55  ;;  %1583 = vperm.xlu0 %8318, %v501_v57   ;;  %6185 = vmatpush1.bf16.msra.mxu0 %v2401_v58 }
 0x110   :  { %6186 = vmatprep.subr.bf16.mxu0 %v8968_v0  ;;  %6003 = vmatprep.mubr.bf16.mxu0 %v8335_v59  ;;  %v8346_v59 = vld [vmem:[%s12589_s2 + $0x240] ss:$72 sps:$4 sm:$0xff]  }
 0x111   :  { %v2402_v9 = vpack.c.bf16 %v2198_v1, %v2197_v2  ;;  %v1439_v12 = vpop.permute.xlu1 %1438  ;;  %v191_v1 = vld [vmem:[%s12588_s0 + $0x580] sm:$0xff]  ;;  %v512_v2 = vld [vmem:[%s12587_s1 + $0x688] sm:$0xff] }
 0x112   :  { %v1434_v13 = vpop.permute.xlu0 %1433  ;;  %v2200_v17 = vmul.f32 %v1439_v12, %v184_v3  ;;  %5104 = vmatmul.mubr.bf16.gmra.mrb[8].mxu1 %v8334_v63  ;;  %1598 = vperm.xlu1 %8319, %v504_v5   ;;  %v192_v63 = vld [vmem:[%s12588_s0 + $0x588] sm:$0xff]  ;;  %v511_v3 = vld [vmem:[%s12587_s1 + $0x680] sm:$0xff]  ;;  %v8350_v5 = vld [vmem:[%s12589_s2 + $0x2d4] ss:$72 sps:$4 sm:$0xff]  }
 0x113   :  { %v2199_v18 = vmul.f32 %v1434_v13, %v183_v4  ;;  %1593 = vperm.xlu0 %8318, %v503_v6   ;;  %6187 = vmatpush1.bf16.msra.mxu0 %v2402_v9 }
 0x114   :  { %6188 = vmatprep.subr.bf16.mxu0 %v8968_v0  ;;  %5111 = vmatprep.mubr.bf16.mxu1 %v8338_v11  ;;  %v8349_v11 = vld [vmem:[%s12589_s2 + $0x260] ss:$72 sps:$4 sm:$0xff]  }
 0x115   :  { %v2403_v23 = vpack.c.bf16 %v2200_v17, %v2199_v18  ;;  %v1449_v26 = vpop.permute.xlu1 %1448  ;;  %v193_v17 = vld [vmem:[%s12588_s0 + $0x590] sm:$0xff]  ;;  %v514_v18 = vld [vmem:[%s12587_s1 + $0x698] sm:$0xff] }
 0x116   :  { %v1444_v27 = vpop.permute.xlu0 %1443  ;;  %v2202_v32 = vmul.f32 %v1449_v26, %v186_v19  ;;  %6004 = vmatmul.mubr.bf16.gmra.mrb[8].mxu0 %v8337_v15  ;;  %1608 = vperm.xlu1 %8319, %v506_v21   ;;  %v194_v15 = vld [vmem:[%s12588_s0 + $0x598] sm:$0xff]  ;;  %v513_v19 = vld [vmem:[%s12587_s1 + $0x690] sm:$0xff] }
 0x117   :  { %v2201_v33 = vmul.f32 %v1444_v27, %v185_v20  ;;  %1603 = vperm.xlu0 %8318, %v505_v22   ;;  %6189 = vmatpush1.bf16.msra.mxu0 %v2403_v23  ;;  %v8353_v21 = vld [vmem:[%s12589_s2 + $0x2f4] ss:$72 sps:$4 sm:$0xff]  }
 0x118   :  { %6190 = vmatprep.subr.bf16.mxu0 %v8968_v0  ;;  %6011 = vmatprep.mubr.bf16.mxu0 %v8341_v24  ;;  %v8352_v24 = vld [vmem:[%s12589_s2 + $0x2d0] ss:$72 sps:$4 sm:$0xff]  }
 0x119   :  { %v2404_v39 = vpack.c.bf16 %v2202_v32, %v2201_v33  ;;  %v1459_v41 = vpop.permute.xlu1 %1458  ;;  %v195_v32 = vld [vmem:[%s12588_s0 + $0x5a0] sm:$0xff]  ;;  %v516_v33 = vld [vmem:[%s12587_s1 + $0x6a8] sm:$0xff] }
 0x11a   :  { %v1454_v42 = vpop.permute.xlu0 %1453  ;;  %v2204_v45 = vmul.f32 %v1459_v41, %v188_v34  ;;  %5112 = vmatmul.mubr.bf16.gmra.mrb[12].mxu1 %v8340_v29  ;;  %1618 = vperm.xlu1 %8319, %v508_v37   ;;  %v196_v29 = vld [vmem:[%s12588_s0 + $0x5a8] sm:$0xff]  ;;  %v515_v34 = vld [vmem:[%s12587_s1 + $0x6a0] sm:$0xff] }
 0x11b   :  { %v2203_v46 = vmul.f32 %v1454_v42, %v187_v36  ;;  %1613 = vperm.xlu0 %8318, %v507_v38   ;;  %6191 = vmatpush1.bf16.msra.mxu0 %v2404_v39  ;;  %v8356_v37 = vld [vmem:[%s12589_s2 + $0x364] ss:$72 sps:$4 sm:$0xff]  }
 0x11c   :  { %6192 = vmatprep.subr.bf16.mxu0 %v8968_v0  ;;  %5119 = vmatprep.mubr.bf16.mxu1 %v8344_v40  ;;  %v8355_v40 = vld [vmem:[%s12589_s2 + $0x2f0] ss:$72 sps:$4 sm:$0xff]  }
 0x11d   :  { %v2405_v55 = vpack.c.bf16 %v2204_v45, %v2203_v46  ;;  %v1469_v57 = vpop.permute.xlu1 %1468  ;;  %v197_v45 = vld [vmem:[%s12588_s0 + $0x5b0] sm:$0xff]  ;;  %v518_v46 = vld [vmem:[%s12587_s1 + $0x6b8] sm:$0xff] }
 0x11e   :  { %v1464_v58 = vpop.permute.xlu0 %1463  ;;  %v2206_v60 = vmul.f32 %v1469_v57, %v190_v47  ;;  %6012 = vmatmul.mubr.bf16.gmra.mrb[12].mxu0 %v8343_v44  ;;  %1628 = vperm.xlu1 %8319, %v510_v51   ;;  %v198_v44 = vld [vmem:[%s12588_s0 + $0x5b8] sm:$0xff]  ;;  %v517_v47 = vld [vmem:[%s12587_s1 + $0x6b0] sm:$0xff]  ;;  %v8359_v51 = vld [vmem:[%s12589_s2 + $0x384] ss:$72 sps:$4 sm:$0xff]  }
 0x11f   :  { %v2205_v62 = vmul.f32 %v1464_v58, %v189_v48  ;;  %1623 = vperm.xlu0 %8318, %v509_v52   ;;  %6193 = vmatpush1.bf16.msra.mxu0 %v2405_v55 }
 0x120   :  { %6194 = vmatprep.subr.bf16.mxu0 %v8968_v0  ;;  %6019 = vmatprep.mubr.bf16.mxu0 %v8347_v56  ;;  %v8358_v56 = vld [vmem:[%s12589_s2 + $0x360] ss:$72 sps:$4 sm:$0xff]  }
 0x121   :  { %v2406_v4 = vpack.c.bf16 %v2206_v60, %v2205_v62  ;;  %v1479_v6 = vpop.permute.xlu1 %1478  ;;  %v199_v60 = vld [vmem:[%s12588_s0 + $0x5c0] sm:$0xff]  ;;  %v520_v62 = vld [vmem:[%s12587_s1 + $0x6c8] sm:$0xff] }
 0x122   :  { %v1474_v9 = vpop.permute.xlu0 %1473  ;;  %v2208_v12 = vmul.f32 %v1479_v6, %v192_v63  ;;  %5120 = vmatmul.mubr.bf16.gmra.mrb[16].mxu1 %v8346_v59  ;;  %1638 = vperm.xlu1 %8319, %v512_v2   ;;  %v200_v59 = vld [vmem:[%s12588_s0 + $0x5c8] sm:$0xff]  ;;  %v519_v63 = vld [vmem:[%s12587_s1 + $0x6c0] sm:$0xff]  ;;  %v8362_v2 = vld [vmem:[%s12589_s2 + $0x3f4] ss:$72 sps:$4 sm:$0xff]  }
 0x123   :  { %v2207_v13 = vmul.f32 %v1474_v9, %v191_v1  ;;  %1633 = vperm.xlu0 %8318, %v511_v3   ;;  %6195 = vmatpush1.bf16.msra.mxu0 %v2406_v4 }
 0x124   :  { %6196 = vmatprep.subr.bf16.mxu0 %v8968_v0  ;;  %5127 = vmatprep.mubr.bf16.mxu1 %v8350_v5  ;;  %v8361_v5 = vld [vmem:[%s12589_s2 + $0x380] ss:$72 sps:$4 sm:$0xff]  }
 0x125   :  { %v2407_v20 = vpack.c.bf16 %v2208_v12, %v2207_v13  ;;  %v1489_v22 = vpop.permute.xlu1 %1488  ;;  %v201_v12 = vld [vmem:[%s12588_s0 + $0x5d0] sm:$0xff]  ;;  %v522_v13 = vld [vmem:[%s12587_s1 + $0x6d8] sm:$0xff] }
 0x126   :  { %v1484_v23 = vpop.permute.xlu0 %1483  ;;  %v2210_v26 = vmul.f32 %v1489_v22, %v194_v15  ;;  %6020 = vmatmul.mubr.bf16.gmra.mrb[16].mxu0 %v8349_v11  ;;  %1648 = vperm.xlu1 %8319, %v514_v18   ;;  %v202_v11 = vld [vmem:[%s12588_s0 + $0x5d8] sm:$0xff]  ;;  %v521_v15 = vld [vmem:[%s12587_s1 + $0x6d0] sm:$0xff] }
 0x127   :  { %v2209_v27 = vmul.f32 %v1484_v23, %v193_v17  ;;  %1643 = vperm.xlu0 %8318, %v513_v19   ;;  %6197 = vmatpush1.bf16.msra.mxu0 %v2407_v20  ;;  %v8365_v18 = vld [vmem:[%s12589_s2 + $0x414] ss:$72 sps:$4 sm:$0xff]  }
 0x128   :  { %6198 = vmatprep.subr.bf16.mxu0 %v8968_v0  ;;  %6027 = vmatprep.mubr.bf16.mxu0 %v8353_v21  ;;  %v8364_v21 = vld [vmem:[%s12589_s2 + $0x3f0] ss:$72 sps:$4 sm:$0xff]  }
 0x129   :  { %v2408_v36 = vpack.c.bf16 %v2210_v26, %v2209_v27  ;;  %v1499_v38 = vpop.permute.xlu1 %1498  ;;  %v203_v26 = vld [vmem:[%s12588_s0 + $0x5e0] sm:$0xff]  ;;  %v524_v27 = vld [vmem:[%s12587_s1 + $0x6e8] sm:$0xff] }
 0x12a   :  { %v1494_v39 = vpop.permute.xlu0 %1493  ;;  %v2212_v41 = vmul.f32 %v1499_v38, %v196_v29  ;;  %5128 = vmatmul.mubr.bf16.gmra.mrb[20].mxu1 %v8352_v24  ;;  %1658 = vperm.xlu1 %8319, %v516_v33   ;;  %v204_v24 = vld [vmem:[%s12588_s0 + $0x5e8] sm:$0xff]  ;;  %v523_v29 = vld [vmem:[%s12587_s1 + $0x6e0] sm:$0xff] }
 0x12b   :  { %v2211_v42 = vmul.f32 %v1494_v39, %v195_v32  ;;  %1653 = vperm.xlu0 %8318, %v515_v34   ;;  %6199 = vmatpush1.bf16.msra.mxu0 %v2408_v36  ;;  %v8368_v33 = vld [vmem:[%s12589_s2 + $0x484] ss:$72 sps:$4 sm:$0xff]  }
 0x12c   :  { %6200 = vmatprep.subr.bf16.mxu0 %v8968_v0  ;;  %5135 = vmatprep.mubr.bf16.mxu1 %v8356_v37  ;;  %v8367_v37 = vld [vmem:[%s12589_s2 + $0x410] ss:$72 sps:$4 sm:$0xff]  }
 0x12d   :  { %v2409_v48 = vpack.c.bf16 %v2212_v41, %v2211_v42  ;;  %v1509_v52 = vpop.permute.xlu1 %1508  ;;  %v205_v41 = vld [vmem:[%s12588_s0 + $0x5f0] sm:$0xff]  ;;  %v526_v42 = vld [vmem:[%s12587_s1 + $0x6f8] sm:$0xff] }
 0x12e   :  { %v1504_v55 = vpop.permute.xlu0 %1503  ;;  %v2214_v57 = vmul.f32 %v1509_v52, %v198_v44  ;;  %6028 = vmatmul.mubr.bf16.gmra.mrb[20].mxu0 %v8355_v40  ;;  %1668 = vperm.xlu1 %8319, %v518_v46   ;;  %v206_v40 = vld [vmem:[%s12588_s0 + $0x5f8] sm:$0xff]  ;;  %v525_v44 = vld [vmem:[%s12587_s1 + $0x6f0] sm:$0xff]  ;;  %v8371_v46 = vld [vmem:[%s12589_s2 + $0x4a4] ss:$72 sps:$4 sm:$0xff]  }
 0x12f   :  { %v2213_v58 = vmul.f32 %v1504_v55, %v197_v45  ;;  %1663 = vperm.xlu0 %8318, %v517_v47   ;;  %6201 = vmatpush1.bf16.msra.mxu0 %v2409_v48 }
 0x130   :  { %6202 = vmatprep.subr.bf16.mxu0 %v8968_v0  ;;  %6035 = vmatprep.mubr.bf16.mxu0 %v8359_v51  ;;  %v8370_v51 = vld [vmem:[%s12589_s2 + $0x480] ss:$72 sps:$4 sm:$0xff]  }
 0x131   :  { %v2410_v1 = vpack.c.bf16 %v2214_v57, %v2213_v58  ;;  %v1519_v3 = vpop.permute.xlu1 %1518  ;;  %v47_v57 = vld [vmem:[%s12588_s0 + $0x100] sm:$0xff]  ;;  %v368_v58 = vld [vmem:[%s12587_s1 + $0x208] sm:$0xff] }
 0x132   :  { %v1514_v4 = vpop.permute.xlu0 %1513  ;;  %v2216_v6 = vmul.f32 %v1519_v3, %v200_v59  ;;  %5136 = vmatmul.mubr.bf16.gmra.mrb[24].mxu1 %v8358_v56  ;;  %1678 = vperm.xlu1 %8319, %v520_v62   ;;  %v48_v56 = vld [vmem:[%s12588_s0 + $0x108] sm:$0xff]  ;;  %v367_v59 = vld [vmem:[%s12587_s1 + $0x200] sm:$0xff]  ;;  %v8374_v62 = vld [vmem:[%s12589_s2 + $0x514] ss:$72 sps:$4 sm:$0xff]  }
 0x133   :  { %v2215_v9 = vmul.f32 %v1514_v4, %v199_v60  ;;  %1673 = vperm.xlu0 %8318, %v519_v63   ;;  %6203 = vmatpush1.bf16.msra.mxu0 %v2410_v1 }
 0x134   :  { %6204 = vmatprep.subr.bf16.mxu0 %v8968_v0  ;;  %5143 = vmatprep.mubr.bf16.mxu1 %v8362_v2  ;;  %v8373_v2 = vld [vmem:[%s12589_s2 + $0x4a0] ss:$72 sps:$4 sm:$0xff]  }
 0x135   :  { %v2411_v17 = vpack.c.bf16 %v2216_v6, %v2215_v9  ;;  %v1529_v19 = vpop.permute.xlu1 %1528  ;;  %v49_v6 = vld [vmem:[%s12588_s0 + $0x110] sm:$0xff]  ;;  %v370_v9 = vld [vmem:[%s12587_s1 + $0x218] sm:$0xff] }
 0x136   :  { %v1524_v20 = vpop.permute.xlu0 %1523  ;;  %v2218_v22 = vmul.f32 %v1529_v19, %v202_v11  ;;  %6036 = vmatmul.mubr.bf16.gmra.mrb[24].mxu0 %v8361_v5  ;;  %1688 = vperm.xlu1 %8319, %v522_v13   ;;  %v50_v5 = vld [vmem:[%s12588_s0 + $0x118] sm:$0xff]  ;;  %v369_v11 = vld [vmem:[%s12587_s1 + $0x210] sm:$0xff] }
 0x137   :  { %v2217_v23 = vmul.f32 %v1524_v20, %v201_v12  ;;  %1683 = vperm.xlu0 %8318, %v521_v15   ;;  %6205 = vmatpush1.bf16.msra.mxu0 %v2411_v17  ;;  %v8377_v13 = vld [vmem:[%s12589_s2 + $0x534] ss:$72 sps:$4 sm:$0xff]  }
 0x138   :  { %6206 = vmatprep.subr.bf16.mxu0 %v8968_v0  ;;  %6043 = vmatprep.mubr.bf16.mxu0 %v8365_v18  ;;  %v8376_v18 = vld [vmem:[%s12589_s2 + $0x510] ss:$72 sps:$4 sm:$0xff]  }
 0x139   :  { %v2412_v32 = vpack.c.bf16 %v2218_v22, %v2217_v23  ;;  %v1539_v34 = vpop.permute.xlu1 %1538  ;;  %v51_v22 = vld [vmem:[%s12588_s0 + $0x120] sm:$0xff]  ;;  %v372_v23 = vld [vmem:[%s12587_s1 + $0x228] sm:$0xff] }
 0x13a   :  { %v1534_v36 = vpop.permute.xlu0 %1533  ;;  %v2220_v38 = vmul.f32 %v1539_v34, %v204_v24  ;;  %5144 = vmatmul.mubr.bf16.gmra.mrb[28].mxu1 %v8364_v21  ;;  %1698 = vperm.xlu1 %8319, %v524_v27   ;;  %v52_v21 = vld [vmem:[%s12588_s0 + $0x128] sm:$0xff]  ;;  %v371_v24 = vld [vmem:[%s12587_s1 + $0x220] sm:$0xff] }
 0x13b   :  { %v2219_v39 = vmul.f32 %v1534_v36, %v203_v26  ;;  %1693 = vperm.xlu0 %8318, %v523_v29   ;;  %6207 = vmatpush1.bf16.msra.mxu0 %v2412_v32  ;;  %v8380_v27 = vld [vmem:[%s12589_s2 + $0x5a4] ss:$72 sps:$4 sm:$0xff]  }
 0x13c   :  { %6208 = vmatprep.subr.bf16.mxu0 %v8968_v0  ;;  %5151 = vmatprep.mubr.bf16.mxu1 %v8368_v33  ;;  %v8379_v33 = vld [vmem:[%s12589_s2 + $0x530] ss:$72 sps:$4 sm:$0xff]  }
 0x13d   :  { %v2413_v45 = vpack.c.bf16 %v2220_v38, %v2219_v39  ;;  %v1549_v47 = vpop.permute.xlu1 %1548  ;;  %v53_v38 = vld [vmem:[%s12588_s0 + $0x130] sm:$0xff]  ;;  %v374_v39 = vld [vmem:[%s12587_s1 + $0x238] sm:$0xff] }
 0x13e   :  { %v1544_v48 = vpop.permute.xlu0 %1543  ;;  %v2222_v52 = vmul.f32 %v1549_v47, %v206_v40  ;;  %6044 = vmatmul.mubr.bf16.gmra.mrb[28].mxu0 %v8367_v37  ;;  %1708 = vperm.xlu1 %8319, %v526_v42   ;;  %v54_v37 = vld [vmem:[%s12588_s0 + $0x138] sm:$0xff]  ;;  %v373_v40 = vld [vmem:[%s12587_s1 + $0x230] sm:$0xff]  ;;  %v8383_v42 = vld [vmem:[%s12589_s2 + $0x5c4] ss:$72 sps:$4 sm:$0xff]  }
 0x13f   :  { %v2221_v55 = vmul.f32 %v1544_v48, %v205_v41  ;;  %1703 = vperm.xlu0 %8318, %v525_v44   ;;  %6209 = vmatpush1.bf16.msra.mxu0 %v2413_v45 }
 0x140   :  { %6210 = vmatprep.subr.bf16.mxu0 %v8968_v0  ;;  %6051 = vmatprep.mubr.bf16.mxu0 %v8371_v46  ;;  %v8382_v46 = vld [vmem:[%s12589_s2 + $0x5a0] ss:$72 sps:$4 sm:$0xff]  }
 0x141   :  { %v2414_v60 = vpack.c.bf16 %v2222_v52, %v2221_v55  ;;  %v759_v63 = vpop.permute.xlu1 %758  ;;  %v55_v52 = vld [vmem:[%s12588_s0 + $0x140] sm:$0xff]  ;;  %v376_v55 = vld [vmem:[%s12587_s1 + $0x248] sm:$0xff] }
 0x142   :  { %v754_v1 = vpop.permute.xlu0 %753  ;;  %v2064_v3 = vmul.f32 %v759_v63, %v48_v56  ;;  %5152 = vmatmul.mubr.bf16.gmra.mrb[32].mxu1 %v8370_v51  ;;  %918 = vperm.xlu1 %8319, %v368_v58   ;;  %v56_v51 = vld [vmem:[%s12588_s0 + $0x148] sm:$0xff]  ;;  %v375_v56 = vld [vmem:[%s12587_s1 + $0x240] sm:$0xff]  ;;  %v8386_v58 = vld [vmem:[%s12589_s2 + $0x634] ss:$72 sps:$4 sm:$0xff]  }
 0x143   :  { %v2063_v4 = vmul.f32 %v754_v1, %v47_v57  ;;  %913 = vperm.xlu0 %8318, %v367_v59   ;;  %6211 = vmatpush1.bf16.msra.mxu0 %v2414_v60 }
 0x144   :  { %5159 = vmatprep.mubr.bf16.mxu1 %v8374_v62  ;;  %6405 = vmatprep.subr.bf16.mxu0 %v8968_v0  ;;  %v8385_v62 = vld [vmem:[%s12589_s2 + $0x5c0] ss:$72 sps:$4 sm:$0xff]  }
 0x145   :  { %v2335_v12 = vpack.c.bf16 %v2064_v3, %v2063_v4  ;;  %v769_v15 = vpop.permute.xlu1 %768  ;;  %v57_v3 = vld [vmem:[%s12588_s0 + $0x150] sm:$0xff]  ;;  %v378_v4 = vld [vmem:[%s12587_s1 + $0x258] sm:$0xff] }
 0x146   :  { %v764_v17 = vpop.permute.xlu0 %763  ;;  %v2066_v19 = vmul.f32 %v769_v15, %v50_v5  ;;  %6052 = vmatmul.mubr.bf16.gmra.mrb[32].mxu0 %v8373_v2  ;;  %928 = vperm.xlu1 %8319, %v370_v9   ;;  %v58_v2 = vld [vmem:[%s12588_s0 + $0x158] sm:$0xff]  ;;  %v377_v5 = vld [vmem:[%s12587_s1 + $0x250] sm:$0xff] }
 0x147   :  { %v2065_v20 = vmul.f32 %v764_v17, %v49_v6  ;;  %923 = vperm.xlu0 %8318, %v369_v11   ;;  %5281 = vmatpush1.bf16.msra.mxu1 %v2335_v12  ;;  %v8389_v9 = vld [vmem:[%s12589_s2 + $0x654] ss:$72 sps:$4 sm:$0xff]  }
 0x148   :  { %5282 = vmatprep.subr.bf16.mxu1 %v8968_v0  ;;  %6059 = vmatprep.mubr.bf16.mxu0 %v8377_v13  ;;  %v8388_v13 = vld [vmem:[%s12589_s2 + $0x630] ss:$72 sps:$4 sm:$0xff]  }
 0x149   :  { %v2336_v26 = vpack.c.bf16 %v2066_v19, %v2065_v20  ;;  %v779_v29 = vpop.permute.xlu1 %778  ;;  %v59_v19 = vld [vmem:[%s12588_s0 + $0x160] sm:$0xff]  ;;  %v380_v20 = vld [vmem:[%s12587_s1 + $0x268] sm:$0xff] }
 0x14a   :  { %v774_v32 = vpop.permute.xlu0 %773  ;;  %v2068_v34 = vmul.f32 %v779_v29, %v52_v21  ;;  %5160 = vmatmul.mubr.bf16.gmra.mrb[36].mxu1 %v8376_v18  ;;  %938 = vperm.xlu1 %8319, %v372_v23   ;;  %v60_v18 = vld [vmem:[%s12588_s0 + $0x168] sm:$0xff]  ;;  %v379_v21 = vld [vmem:[%s12587_s1 + $0x260] sm:$0xff] }
 0x14b   :  { %v2067_v36 = vmul.f32 %v774_v32, %v51_v22  ;;  %933 = vperm.xlu0 %8318, %v371_v24   ;;  %5283 = vmatpush1.bf16.msra.mxu1 %v2336_v26  ;;  %v8392_v23 = vld [vmem:[%s12589_s2 + $0x6c4] ss:$72 sps:$4 sm:$0xff]  }
 0x14c   :  { %5284 = vmatprep.subr.bf16.mxu1 %v8968_v0  ;;  %5167 = vmatprep.mubr.bf16.mxu1 %v8380_v27  ;;  %v8391_v27 = vld [vmem:[%s12589_s2 + $0x650] ss:$72 sps:$4 sm:$0xff]  }
 0x14d   :  { %v2337_v41 = vpack.c.bf16 %v2068_v34, %v2067_v36  ;;  %v789_v44 = vpop.permute.xlu1 %788  ;;  %v61_v34 = vld [vmem:[%s12588_s0 + $0x170] sm:$0xff]  ;;  %v382_v36 = vld [vmem:[%s12587_s1 + $0x278] sm:$0xff] }
 0x14e   :  { %v784_v45 = vpop.permute.xlu0 %783  ;;  %v2070_v47 = vmul.f32 %v789_v44, %v54_v37  ;;  %6060 = vmatmul.mubr.bf16.gmra.mrb[36].mxu0 %v8379_v33  ;;  %948 = vperm.xlu1 %8319, %v374_v39   ;;  %v62_v33 = vld [vmem:[%s12588_s0 + $0x178] sm:$0xff]  ;;  %v381_v37 = vld [vmem:[%s12587_s1 + $0x270] sm:$0xff] }
 0x14f   :  { %v2069_v48 = vmul.f32 %v784_v45, %v53_v38  ;;  %943 = vperm.xlu0 %8318, %v373_v40   ;;  %5285 = vmatpush1.bf16.msra.mxu1 %v2337_v41  ;;  %v8397_v39 = vld [vmem:[%s12589_s2 + $0x2c] ss:$72 sps:$4 sm:$0xff]  }
 0x150   :  { %5286 = vmatprep.subr.bf16.mxu1 %v8968_v0  ;;  %6067 = vmatprep.mubr.bf16.mxu0 %v8383_v42  ;;  %v8394_v42 = vld [vmem:[%s12589_s2 + $0x6c0] ss:$72 sps:$4 sm:$0xff]  }
 0x151   :  { %v2338_v57 = vpack.c.bf16 %v2070_v47, %v2069_v48  ;;  %v799_v59 = vpop.permute.xlu1 %798  ;;  %v63_v47 = vld [vmem:[%s12588_s0 + $0x180] sm:$0xff]  ;;  %v384_v48 = vld [vmem:[%s12587_s1 + $0x288] sm:$0xff] }
 0x152   :  { %v794_v60 = vpop.permute.xlu0 %793  ;;  %v2072_v63 = vmul.f32 %v799_v59, %v56_v51  ;;  %5168 = vmatmul.mubr.bf16.gmra.mrb[40].mxu1 %v8382_v46  ;;  %958 = vperm.xlu1 %8319, %v376_v55   ;;  %v64_v46 = vld [vmem:[%s12588_s0 + $0x188] sm:$0xff]  ;;  %v383_v51 = vld [vmem:[%s12587_s1 + $0x280] sm:$0xff]  ;;  %v8398_v55 = vld [vmem:[%s12589_s2 + $0x754] ss:$72 sps:$4 sm:$0xff]  }
 0x153   :  { %v2071_v1 = vmul.f32 %v794_v60, %v55_v52  ;;  %953 = vperm.xlu0 %8318, %v375_v56   ;;  %5287 = vmatpush1.bf16.msra.mxu1 %v2338_v57 }
 0x154   :  { %5288 = vmatprep.subr.bf16.mxu1 %v8968_v0  ;;  %5175 = vmatprep.mubr.bf16.mxu1 %v8386_v58  ;;  %v8395_v58 = vld [vmem:[%s12589_s2 + $0x28] ss:$72 sps:$4 sm:$0xff]  }
 0x155   :  { %v2339_v6 = vpack.c.bf16 %v2072_v63, %v2071_v1  ;;  %v809_v11 = vpop.permute.xlu1 %808  ;;  %v65_v63 = vld [vmem:[%s12588_s0 + $0x190] sm:$0xff]  ;;  %v386_v1 = vld [vmem:[%s12587_s1 + $0x298] sm:$0xff] }
 0x156   :  { %v804_v12 = vpop.permute.xlu0 %803  ;;  %v2074_v15 = vmul.f32 %v809_v11, %v58_v2  ;;  %6068 = vmatmul.mubr.bf16.gmra.mrb[40].mxu0 %v8385_v62  ;;  %968 = vperm.xlu1 %8319, %v378_v4   ;;  %v66_v62 = vld [vmem:[%s12588_s0 + $0x198] sm:$0xff]  ;;  %v385_v2 = vld [vmem:[%s12587_s1 + $0x290] sm:$0xff] }
 0x157   :  { %v2073_v17 = vmul.f32 %v804_v12, %v57_v3  ;;  %963 = vperm.xlu0 %8318, %v377_v5   ;;  %5289 = vmatpush1.bf16.msra.mxu1 %v2339_v6  ;;  %v8401_v4 = vld [vmem:[%s12589_s2 + $0xbc] ss:$72 sps:$4 sm:$0xff]  }
 0x158   :  { %5290 = vmatprep.subr.bf16.mxu1 %v8968_v0  ;;  %6075 = vmatprep.mubr.bf16.mxu0 %v8389_v9  ;;  %v8400_v9 = vld [vmem:[%s12589_s2 + $0x750] ss:$72 sps:$4 sm:$0xff]  }
 0x159   :  { %v2340_v22 = vpack.c.bf16 %v2074_v15, %v2073_v17  ;;  %v819_v24 = vpop.permute.xlu1 %818  ;;  %v67_v15 = vld [vmem:[%s12588_s0 + $0x1a0] sm:$0xff]  ;;  %v388_v17 = vld [vmem:[%s12587_s1 + $0x2a8] sm:$0xff] }
 0x15a   :  { %v814_v26 = vpop.permute.xlu0 %813  ;;  %v2076_v29 = vmul.f32 %v819_v24, %v60_v18  ;;  %5176 = vmatmul.mubr.bf16.gmra.mrb[44].mxu1 %v8388_v13  ;;  %978 = vperm.xlu1 %8319, %v380_v20   ;;  %v68_v13 = vld [vmem:[%s12588_s0 + $0x1a8] sm:$0xff]  ;;  %v387_v18 = vld [vmem:[%s12587_s1 + $0x2a0] sm:$0xff] }
 0x15b   :  { %v2075_v32 = vmul.f32 %v814_v26, %v59_v19  ;;  %973 = vperm.xlu0 %8318, %v379_v21   ;;  %5291 = vmatpush1.bf16.msra.mxu1 %v2340_v22  ;;  %v8404_v20 = vld [vmem:[%s12589_s2 + $0x7e4] ss:$72 sps:$4 sm:$0xff]  }
 0x15c   :  { %5292 = vmatprep.subr.bf16.mxu1 %v8968_v0  ;;  %5183 = vmatprep.mubr.bf16.mxu1 %v8392_v23  ;;  %v8403_v23 = vld [vmem:[%s12589_s2 + $0xb8] ss:$72 sps:$4 sm:$0xff]  }
 0x15d   :  { %v2341_v38 = vpack.c.bf16 %v2076_v29, %v2075_v32  ;;  %v829_v40 = vpop.permute.xlu1 %828  ;;  %v69_v29 = vld [vmem:[%s12588_s0 + $0x1b0] sm:$0xff]  ;;  %v390_v32 = vld [vmem:[%s12587_s1 + $0x2b8] sm:$0xff] }
 0x15e   :  { %v824_v41 = vpop.permute.xlu0 %823  ;;  %v2078_v44 = vmul.f32 %v829_v40, %v62_v33  ;;  %6076 = vmatmul.mubr.bf16.gmra.mrb[44].mxu0 %v8391_v27  ;;  %988 = vperm.xlu1 %8319, %v382_v36   ;;  %v70_v27 = vld [vmem:[%s12588_s0 + $0x1b8] sm:$0xff]  ;;  %v389_v33 = vld [vmem:[%s12587_s1 + $0x2b0] sm:$0xff] }
 0x15f   :  { %v2077_v45 = vmul.f32 %v824_v41, %v61_v34  ;;  %983 = vperm.xlu0 %8318, %v381_v37   ;;  %5293 = vmatpush1.bf16.msra.mxu1 %v2341_v38  ;;  %v8407_v36 = vld [vmem:[%s12589_s2 + $0x14c] ss:$72 sps:$4 sm:$0xff]  }
 0x160   :  { %5294 = vmatprep.subr.bf16.mxu1 %v8968_v0  ;;  %6212 = vmatprep.mubr.bf16.mxu0 %v8397_v39  ;;  %v8406_v39 = vld [vmem:[%s12589_s2 + $0x7e0] ss:$72 sps:$4 sm:$0xff]  }
 0x161   :  { %v2342_v52 = vpack.c.bf16 %v2078_v44, %v2077_v45  ;;  %v839_v56 = vpop.permute.xlu1 %838  ;;  %v71_v44 = vld [vmem:[%s12588_s0 + $0x1c0] sm:$0xff]  ;;  %v392_v45 = vld [vmem:[%s12587_s1 + $0x2c8] sm:$0xff] }
 0x162   :  { %v834_v57 = vpop.permute.xlu0 %833  ;;  %v2080_v59 = vmul.f32 %v839_v56, %v64_v46  ;;  %5184 = vmatmul.mubr.bf16.gmra.mrb[48].mxu1 %v8394_v42  ;;  %998 = vperm.xlu1 %8319, %v384_v48   ;;  %v72_v42 = vld [vmem:[%s12588_s0 + $0x1c8] sm:$0xff]  ;;  %v391_v46 = vld [vmem:[%s12587_s1 + $0x2c0] sm:$0xff]  ;;  %v8410_v48 = vld [vmem:[%s12589_s2 + $0x874] ss:$72 sps:$4 sm:$0xff]  }
 0x163   :  { %v2079_v60 = vmul.f32 %v834_v57, %v63_v47  ;;  %993 = vperm.xlu0 %8318, %v383_v51   ;;  %5295 = vmatpush1.bf16.msra.mxu1 %v2342_v52 }
 0x164   :  { %5296 = vmatprep.subr.bf16.mxu1 %v8968_v0  ;;  %5191 = vmatprep.mubr.bf16.mxu1 %v8398_v55  ;;  %v8409_v55 = vld [vmem:[%s12589_s2 + $0x148] ss:$72 sps:$4 sm:$0xff]  }
 0x165   :  { %v2343_v3 = vpack.c.bf16 %v2080_v59, %v2079_v60  ;;  %v849_v5 = vpop.permute.xlu1 %848  ;;  %v73_v59 = vld [vmem:[%s12588_s0 + $0x1d0] sm:$0xff]  ;;  %v394_v60 = vld [vmem:[%s12587_s1 + $0x2d8] sm:$0xff] }
 0x166   :  { %v844_v6 = vpop.permute.xlu0 %843  ;;  %v2082_v11 = vmul.f32 %v849_v5, %v66_v62  ;;  %6213 = vmatmul.mubr.bf16.vlgmr.msra.gmra.mrb[0].mxu0 %v8395_v58  ;;  %1008 = vperm.xlu1 %8319, %v386_v1   ;;  %v74_v58 = vld [vmem:[%s12588_s0 + $0x1d8] sm:$0xff]  ;;  %v393_v62 = vld [vmem:[%s12587_s1 + $0x2d0] sm:$0xff] }
 0x167   :  { %v2081_v12 = vmul.f32 %v844_v6, %v65_v63  ;;  %1003 = vperm.xlu0 %8318, %v385_v2   ;;  %5297 = vmatpush1.bf16.msra.mxu1 %v2343_v3  ;;  %v8413_v1 = vld [vmem:[%s12589_s2 + $0x1dc] ss:$72 sps:$4 sm:$0xff]  }
 0x168   :  { %5298 = vmatprep.subr.bf16.mxu1 %v8968_v0  ;;  %6220 = vmatprep.mubr.bf16.mxu0 %v8401_v4  ;;  %v8412_v4 = vld [vmem:[%s12589_s2 + $0x870] ss:$72 sps:$4 sm:$0xff]  }
 0x169   :  { %v2344_v19 = vpack.c.bf16 %v2082_v11, %v2081_v12  ;;  %v859_v21 = vpop.permute.xlu1 %858  ;;  %v75_v11 = vld [vmem:[%s12588_s0 + $0x1e0] sm:$0xff]  ;;  %v396_v12 = vld [vmem:[%s12587_s1 + $0x2e8] sm:$0xff] }
 0x16a   :  { %v854_v22 = vpop.permute.xlu0 %853  ;;  %v2084_v24 = vmul.f32 %v859_v21, %v68_v13  ;;  %5192 = vmatmul.mubr.bf16.gmra.mrb[52].mxu1 %v8400_v9  ;;  %1018 = vperm.xlu1 %8319, %v388_v17   ;;  %v76_v9 = vld [vmem:[%s12588_s0 + $0x1e8] sm:$0xff]  ;;  %v395_v13 = vld [vmem:[%s12587_s1 + $0x2e0] sm:$0xff] }
 0x16b   :  { %v2083_v26 = vmul.f32 %v854_v22, %v67_v15  ;;  %1013 = vperm.xlu0 %8318, %v387_v18   ;;  %5299 = vmatpush1.bf16.msra.mxu1 %v2344_v19  ;;  %v8416_v17 = vld [vmem:[%s12589_s2 + $0x904] ss:$72 sps:$4 sm:$0xff]  }
 0x16c   :  { %5300 = vmatprep.subr.bf16.mxu1 %v8968_v0  ;;  %5199 = vmatprep.mubr.bf16.mxu1 %v8404_v20  ;;  %v8415_v20 = vld [vmem:[%s12589_s2 + $0x1d8] ss:$72 sps:$4 sm:$0xff]  }
 0x16d   :  { %v2345_v34 = vpack.c.bf16 %v2084_v24, %v2083_v26  ;;  %v869_v37 = vpop.permute.xlu1 %868  ;;  %v77_v24 = vld [vmem:[%s12588_s0 + $0x1f0] sm:$0xff]  ;;  %v398_v26 = vld [vmem:[%s12587_s1 + $0x2f8] sm:$0xff] }
 0x16e   :  { %v864_v38 = vpop.permute.xlu0 %863  ;;  %v2086_v40 = vmul.f32 %v869_v37, %v70_v27  ;;  %6221 = vmatmul.mubr.bf16.gmra.mrb[4].mxu0 %v8403_v23  ;;  %1028 = vperm.xlu1 %8319, %v390_v32   ;;  %v78_v23 = vld [vmem:[%s12588_s0 + $0x1f8] sm:$0xff]  ;;  %v397_v27 = vld [vmem:[%s12587_s1 + $0x2f0] sm:$0xff] }
 0x16f   :  { %v2085_v41 = vmul.f32 %v864_v38, %v69_v29  ;;  %1023 = vperm.xlu0 %8318, %v389_v33   ;;  %5301 = vmatpush1.bf16.msra.mxu1 %v2345_v34  ;;  %v8419_v32 = vld [vmem:[%s12589_s2 + $0x26c] ss:$72 sps:$4 sm:$0xff]  }
 0x170   :  { %5302 = vmatprep.subr.bf16.mxu1 %v8968_v0  ;;  %6228 = vmatprep.mubr.bf16.mxu0 %v8407_v36  ;;  %v8418_v36 = vld [vmem:[%s12589_s2 + $0x900] ss:$72 sps:$4 sm:$0xff]  }
 0x171   :  { %v2346_v47 = vpack.c.bf16 %v2086_v40, %v2085_v41  ;;  %v879_v51 = vpop.permute.xlu1 %878  ;;  %v207_v40 = vld [vmem:[%s12588_s0 + $0x600] sm:$0xff]  ;;  %v528_v41 = vld [vmem:[%s12587_s1 + $0x708] sm:$0xff] }
 0x172   :  { %v874_v52 = vpop.permute.xlu0 %873  ;;  %v2088_v56 = vmul.f32 %v879_v51, %v72_v42  ;;  %5200 = vmatmul.mubr.bf16.gmra.mrb[56].mxu1 %v8406_v39  ;;  %1038 = vperm.xlu1 %8319, %v392_v45   ;;  %v208_v39 = vld [vmem:[%s12588_s0 + $0x608] sm:$0xff]  ;;  %v527_v42 = vld [vmem:[%s12587_s1 + $0x700] sm:$0xff]  ;;  %v8422_v45 = vld [vmem:[%s12589_s2 + $0x994] ss:$72 sps:$4 sm:$0xff]  }
 0x173   :  { %v2087_v57 = vmul.f32 %v874_v52, %v71_v44  ;;  %1033 = vperm.xlu0 %8318, %v391_v46   ;;  %5303 = vmatpush1.bf16.msra.mxu1 %v2346_v47  ;;  %v8421_v47 = vld [vmem:[%s12589_s2 + $0x268] ss:$72 sps:$4 sm:$0xff]   ;;  %v210_v52 = vld [vmem:[%s12588_s0 + $0x618] sm:$0xff] }
 0x174   :  { %5304 = vmatprep.subr.bf16.mxu1 %v8968_v0  ;;  %5207 = vmatprep.mubr.bf16.mxu1 %v8410_v48 }
 0x175   :  { %v2347_v63 = vpack.c.bf16 %v2088_v56, %v2087_v57  ;;  %v889_v2 = vpop.permute.xlu1 %888  ;;  %v530_v56 = vld [vmem:[%s12587_s1 + $0x718] sm:$0xff] }
 0x176   :  { %v884_v3 = vpop.permute.xlu0 %883  ;;  %v2090_v5 = vmul.f32 %v889_v2, %v74_v58  ;;  %6229 = vmatmul.mubr.bf16.gmra.mrb[8].mxu0 %v8409_v55  ;;  %1048 = vperm.xlu1 %8319, %v394_v60   ;;  %v209_v55 = vld [vmem:[%s12588_s0 + $0x610] sm:$0xff] }
 0x177   :  { %v2089_v6 = vmul.f32 %v884_v3, %v73_v59  ;;  %1043 = vperm.xlu0 %8318, %v393_v62   ;;  %5305 = vmatpush1.bf16.msra.mxu1 %v2347_v63  ;;  %v529_v58 = vld [vmem:[%s12587_s1 + $0x710] sm:$0xff]  ;;  %v8425_v59 = vld [vmem:[%s12589_s2 + $0x2fc] ss:$72 sps:$4 sm:$0xff]   ;;  %v212_v3 = vld [vmem:[%s12588_s0 + $0x628] sm:$0xff] }
 0x178   :  { %5306 = vmatprep.subr.bf16.mxu1 %v8968_v0  ;;  %6236 = vmatprep.mubr.bf16.mxu0 %v8413_v1  ;;  %v8424_v63 = vld [vmem:[%s12589_s2 + $0x990] ss:$72 sps:$4 sm:$0xff]  }
 0x179   :  { %v2348_v15 = vpack.c.bf16 %v2090_v5, %v2089_v6  ;;  %v899_v18 = vpop.permute.xlu1 %898  ;;  %v532_v5 = vld [vmem:[%s12587_s1 + $0x728] sm:$0xff] }
 0x17a   :  { %v894_v19 = vpop.permute.xlu0 %893  ;;  %v2092_v21 = vmul.f32 %v899_v18, %v76_v9  ;;  %5208 = vmatmul.mubr.bf16.gmra.mrb[60].mxu1 %v8412_v4  ;;  %1058 = vperm.xlu1 %8319, %v396_v12   ;;  %v211_v4 = vld [vmem:[%s12588_s0 + $0x620] sm:$0xff] }
 0x17b   :  { %v2091_v22 = vmul.f32 %v894_v19, %v75_v11  ;;  %1053 = vperm.xlu0 %8318, %v395_v13   ;;  %5307 = vmatpush1.bf16.msra.mxu1 %v2348_v15  ;;  %v531_v9 = vld [vmem:[%s12587_s1 + $0x720] sm:$0xff]  ;;  %v214_v19 = vld [vmem:[%s12588_s0 + $0x638] sm:$0xff] }
 0x17c   :  { %5308 = vmatprep.subr.bf16.mxu1 %v8968_v0  ;;  %5215 = vmatprep.mubr.bf16.mxu1 %v8416_v17  ;;  %v8428_v11 = vld [vmem:[%s12589_s2 + $0xa24] ss:$72 sps:$4 sm:$0xff]   ;;  %v8427_v15 = vld [vmem:[%s12589_s2 + $0x2f8] ss:$72 sps:$4 sm:$0xff]  }
 0x17d   :  { %v2349_v29 = vpack.c.bf16 %v2092_v21, %v2091_v22  ;;  %v909_v33 = vpop.permute.xlu1 %908  ;;  %v534_v21 = vld [vmem:[%s12587_s1 + $0x738] sm:$0xff] }
 0x17e   :  { %v904_v34 = vpop.permute.xlu0 %903  ;;  %v2094_v37 = vmul.f32 %v909_v33, %v78_v23  ;;  %6237 = vmatmul.mubr.bf16.gmra.mrb[12].mxu0 %v8415_v20  ;;  %1068 = vperm.xlu1 %8319, %v398_v26   ;;  %v213_v20 = vld [vmem:[%s12588_s0 + $0x630] sm:$0xff] }
 0x17f   :  { %v2093_v38 = vmul.f32 %v904_v34, %v77_v24  ;;  %1063 = vperm.xlu0 %8318, %v397_v27   ;;  %5309 = vmatpush1.bf16.msra.mxu1 %v2349_v29  ;;  %v533_v23 = vld [vmem:[%s12587_s1 + $0x730] sm:$0xff]  ;;  %v8430_v29 = vld [vmem:[%s12589_s2 + $0xa20] ss:$72 sps:$4 sm:$0xff]  }
 0x180   :  { %5310 = vmatprep.subr.bf16.mxu1 %v8968_v0  ;;  %6244 = vmatprep.mubr.bf16.mxu0 %v8419_v32  ;;  %v8431_v24 = vld [vmem:[%s12589_s2 + $0x38c] ss:$72 sps:$4 sm:$0xff]  }
 0x181   :  { %v2350_v44 = vpack.c.bf16 %v2094_v37, %v2093_v38  ;;  %v1559_v46 = vpop.permute.xlu1 %1558  ;;  %v216_v34 = vld [vmem:[%s12588_s0 + $0x648] sm:$0xff] }
 0x182   :  { %v2224_v48 = vmul.f32 %v1559_v46, %v208_v39  ;;  %v1554_v51 = vpop.permute.xlu0 %1553  ;;  %5216 = vmatmul.mubr.bf16.gmra.mrb[64].mxu1 %v8418_v36  ;;  %1718 = vperm.xlu1 %8319, %v528_v41   ;;  %v215_v36 = vld [vmem:[%s12588_s0 + $0x640] sm:$0xff]  ;;  %v536_v37 = vld [vmem:[%s12587_s1 + $0x748] sm:$0xff] }
 0x183   :  { %v2223_v57 = vmul.f32 %v1554_v51, %v207_v40  ;;  %1713 = vperm.xlu0 %8318, %v527_v42   ;;  %5311 = vmatpush1.bf16.msra.mxu1 %v2350_v44  ;;  %v535_v39 = vld [vmem:[%s12587_s1 + $0x740] sm:$0xff]  ;;  %v8434_v40 = vld [vmem:[%s12589_s2 + $0xab4] ss:$72 sps:$4 sm:$0xff]   ;;  %v8433_v44 = vld [vmem:[%s12589_s2 + $0x388] ss:$72 sps:$4 sm:$0xff]  }
 0x184   :  { %5223 = vmatprep.mubr.bf16.mxu1 %v8422_v45  ;;  %5505 = vmatprep.subr.bf16.mxu1 %v8968_v0  ;;  %v538_v51 = vld [vmem:[%s12587_s1 + $0x758] sm:$0xff] }
 0x185   :  { %v2415_v60 = vpack.c.bf16 %v2224_v48, %v2223_v57  ;;  %v1569_v62 = vpop.permute.xlu1 %1568  ;;  %v217_v48 = vld [vmem:[%s12588_s0 + $0x650] sm:$0xff] }
 0x186   :  { %v2226_v1 = vmul.f32 %v1569_v62, %v210_v52  ;;  %v1564_v2 = vpop.permute.xlu0 %1563  ;;  %6245 = vmatmul.mubr.bf16.gmra.mrb[16].mxu0 %v8421_v47  ;;  %1728 = vperm.xlu1 %8319, %v530_v56   ;;  %v218_v47 = vld [vmem:[%s12588_s0 + $0x658] sm:$0xff] }
 0x187   :  { %v2225_v6 = vmul.f32 %v1564_v2, %v209_v55  ;;  %1723 = vperm.xlu0 %8318, %v529_v58   ;;  %6406 = vmatpush1.bf16.msra.mxu0 %v2415_v60  ;;  %v537_v55 = vld [vmem:[%s12587_s1 + $0x750] sm:$0xff]  ;;  %v8437_v56 = vld [vmem:[%s12589_s2 + $0x41c] ss:$72 sps:$4 sm:$0xff]   ;;  %v540_v2 = vld [vmem:[%s12587_s1 + $0x768] sm:$0xff] }
 0x188   :  { %6407 = vmatprep.subr.bf16.mxu0 %v8968_v0  ;;  %6252 = vmatprep.mubr.bf16.mxu0 %v8425_v59  ;;  %v8436_v59 = vld [vmem:[%s12589_s2 + $0xab0] ss:$72 sps:$4 sm:$0xff]  }
 0x189   :  { %v2416_v12 = vpack.c.bf16 %v2226_v1, %v2225_v6  ;;  %v1579_v13 = vpop.permute.xlu1 %1578  ;;  %v219_v1 = vld [vmem:[%s12588_s0 + $0x660] sm:$0xff] }
 0x18a   :  { %v2228_v17 = vmul.f32 %v1579_v13, %v212_v3  ;;  %v1574_v18 = vpop.permute.xlu0 %1573  ;;  %5224 = vmatmul.mubr.bf16.gmra.mrb[68].mxu1 %v8424_v63  ;;  %1738 = vperm.xlu1 %8319, %v532_v5   ;;  %v220_v63 = vld [vmem:[%s12588_s0 + $0x668] sm:$0xff] }
 0x18b   :  { %v2227_v22 = vmul.f32 %v1574_v18, %v211_v4  ;;  %1733 = vperm.xlu0 %8318, %v531_v9   ;;  %6408 = vmatpush1.bf16.msra.mxu0 %v2416_v12  ;;  %v539_v4 = vld [vmem:[%s12587_s1 + $0x760] sm:$0xff]  ;;  %v542_v18 = vld [vmem:[%s12587_s1 + $0x778] sm:$0xff] }
 0x18c   :  { %6409 = vmatprep.subr.bf16.mxu0 %v8968_v0  ;;  %5231 = vmatprep.mubr.bf16.mxu1 %v8428_v11  ;;  %v8440_v5 = vld [vmem:[%s12589_s2 + $0xb44] ss:$72 sps:$4 sm:$0xff]   ;;  %v8439_v11 = vld [vmem:[%s12589_s2 + $0x418] ss:$72 sps:$4 sm:$0xff]  }
 0x18d   :  { %v2417_v26 = vpack.c.bf16 %v2228_v17, %v2227_v22  ;;  %v1589_v27 = vpop.permute.xlu1 %1588  ;;  %v221_v17 = vld [vmem:[%s12588_s0 + $0x670] sm:$0xff] }
 0x18e   :  { %v2230_v32 = vmul.f32 %v1589_v27, %v214_v19  ;;  %v1584_v33 = vpop.permute.xlu0 %1583  ;;  %6253 = vmatmul.mubr.bf16.gmra.mrb[20].mxu0 %v8427_v15  ;;  %1748 = vperm.xlu1 %8319, %v534_v21   ;;  %v222_v15 = vld [vmem:[%s12588_s0 + $0x678] sm:$0xff]  ;;  %v8443_v21 = vld [vmem:[%s12589_s2 + $0x4ac] ss:$72 sps:$4 sm:$0xff]   ;;  %v8442_v27 = vld [vmem:[%s12589_s2 + $0xb40] ss:$72 sps:$4 sm:$0xff]  }
 0x18f   :  { %v2229_v38 = vmul.f32 %v1584_v33, %v213_v20  ;;  %1743 = vperm.xlu0 %8318, %v533_v23   ;;  %6410 = vmatpush1.bf16.msra.mxu0 %v2417_v26  ;;  %v541_v20 = vld [vmem:[%s12587_s1 + $0x770] sm:$0xff]  ;;  %v544_v33 = vld [vmem:[%s12587_s1 + $0x788] sm:$0xff] }
 0x190   :  { %6411 = vmatprep.subr.bf16.mxu0 %v8968_v0  ;;  %6260 = vmatprep.mubr.bf16.mxu0 %v8431_v24 }
 0x191   :  { %v2418_v41 = vpack.c.bf16 %v2230_v32, %v2229_v38  ;;  %v1599_v42 = vpop.permute.xlu1 %1598  ;;  %v224_v32 = vld [vmem:[%s12588_s0 + $0x688] sm:$0xff] }
 0x192   :  { %v2232_v45 = vmul.f32 %v1599_v42, %v216_v34  ;;  %v1594_v46 = vpop.permute.xlu0 %1593  ;;  %5232 = vmatmul.mubr.bf16.gmra.mrb[72].mxu1 %v8430_v29  ;;  %1758 = vperm.xlu1 %8319, %v536_v37   ;;  %v223_v34 = vld [vmem:[%s12588_s0 + $0x680] sm:$0xff]  ;;  %v8446_v37 = vld [vmem:[%s12589_s2 + $0xbd4] ss:$72 sps:$4 sm:$0xff]   ;;  %v8445_v42 = vld [vmem:[%s12589_s2 + $0x4a8] ss:$72 sps:$4 sm:$0xff]  }
 0x193   :  { %v2231_v52 = vmul.f32 %v1594_v46, %v215_v36  ;;  %1753 = vperm.xlu0 %8318, %v535_v39   ;;  %6412 = vmatpush1.bf16.msra.mxu0 %v2418_v41  ;;  %v543_v36 = vld [vmem:[%s12587_s1 + $0x780] sm:$0xff]  ;;  %v546_v46 = vld [vmem:[%s12587_s1 + $0x798] sm:$0xff] }
 0x194   :  { %6413 = vmatprep.subr.bf16.mxu0 %v8968_v0  ;;  %5239 = vmatprep.mubr.bf16.mxu1 %v8434_v40 }
 0x195   :  { %v2419_v57 = vpack.c.bf16 %v2232_v45, %v2231_v52  ;;  %v1609_v58 = vpop.permute.xlu1 %1608  ;;  %v226_v45 = vld [vmem:[%s12588_s0 + $0x698] sm:$0xff] }
 0x196   :  { %v2234_v60 = vmul.f32 %v1609_v58, %v218_v47  ;;  %v1604_v62 = vpop.permute.xlu0 %1603  ;;  %6261 = vmatmul.mubr.bf16.gmra.mrb[24].mxu0 %v8433_v44  ;;  %1768 = vperm.xlu1 %8319, %v538_v51   ;;  %v225_v47 = vld [vmem:[%s12588_s0 + $0x690] sm:$0xff]  ;;  %v8449_v51 = vld [vmem:[%s12589_s2 + $0x53c] ss:$72 sps:$4 sm:$0xff]  }
 0x197   :  { %v2233_v3 = vmul.f32 %v1604_v62, %v217_v48  ;;  %1763 = vperm.xlu0 %8318, %v537_v55   ;;  %6414 = vmatpush1.bf16.msra.mxu0 %v2419_v57  ;;  %v545_v48 = vld [vmem:[%s12587_s1 + $0x790] sm:$0xff]  ;;  %v548_v62 = vld [vmem:[%s12587_s1 + $0x7a8] sm:$0xff] }
 0x198   :  { %6415 = vmatprep.subr.bf16.mxu0 %v8968_v0  ;;  %6268 = vmatprep.mubr.bf16.mxu0 %v8437_v56  ;;  %v8448_v58 = vld [vmem:[%s12589_s2 + $0xbd0] ss:$72 sps:$4 sm:$0xff]  }
 0x199   :  { %v2420_v6 = vpack.c.bf16 %v2234_v60, %v2233_v3  ;;  %v1619_v9 = vpop.permute.xlu1 %1618  ;;  %v228_v60 = vld [vmem:[%s12588_s0 + $0x6a8] sm:$0xff] }
 0x19a   :  { %v2236_v12 = vmul.f32 %v1619_v9, %v220_v63  ;;  %v1614_v13 = vpop.permute.xlu0 %1613  ;;  %5240 = vmatmul.mubr.bf16.gmra.mrb[76].mxu1 %v8436_v59  ;;  %1778 = vperm.xlu1 %8319, %v540_v2   ;;  %v227_v63 = vld [vmem:[%s12588_s0 + $0x6a0] sm:$0xff] }
 0x19b   :  { %v2235_v19 = vmul.f32 %v1614_v13, %v219_v1  ;;  %1773 = vperm.xlu0 %8318, %v539_v4   ;;  %6416 = vmatpush1.bf16.msra.mxu0 %v2420_v6  ;;  %v547_v1 = vld [vmem:[%s12587_s1 + $0x7a0] sm:$0xff]  ;;  %v550_v13 = vld [vmem:[%s12587_s1 + $0x7b8] sm:$0xff] }
 0x19c   :  { %6417 = vmatprep.subr.bf16.mxu0 %v8968_v0  ;;  %5247 = vmatprep.mubr.bf16.mxu1 %v8440_v5  ;;  %v8452_v2 = vld [vmem:[%s12589_s2 + $0xc64] ss:$72 sps:$4 sm:$0xff]   ;;  %v8451_v9 = vld [vmem:[%s12589_s2 + $0x538] ss:$72 sps:$4 sm:$0xff]  }
 0x19d   :  { %v2421_v22 = vpack.c.bf16 %v2236_v12, %v2235_v19  ;;  %v1629_v23 = vpop.permute.xlu1 %1628  ;;  %v230_v12 = vld [vmem:[%s12588_s0 + $0x6b8] sm:$0xff] }
 0x19e   :  { %v2238_v24 = vmul.f32 %v1629_v23, %v222_v15  ;;  %v1624_v26 = vpop.permute.xlu0 %1623  ;;  %6269 = vmatmul.mubr.bf16.gmra.mrb[28].mxu0 %v8439_v11  ;;  %1788 = vperm.xlu1 %8319, %v542_v18   ;;  %v229_v15 = vld [vmem:[%s12588_s0 + $0x6b0] sm:$0xff]  ;;  %v8454_v23 = vld [vmem:[%s12589_s2 + $0xc60] ss:$72 sps:$4 sm:$0xff]  }
 0x19f   :  { %v2237_v29 = vmul.f32 %v1624_v26, %v221_v17  ;;  %1783 = vperm.xlu0 %8318, %v541_v20   ;;  %6418 = vmatpush1.bf16.msra.mxu0 %v2421_v22  ;;  %v549_v17 = vld [vmem:[%s12587_s1 + $0x7b0] sm:$0xff]  ;;  %v232_v26 = vld [vmem:[%s12588_s0 + $0x6c8] sm:$0xff] }
 0x1a0   :  { %6419 = vmatprep.subr.bf16.mxu0 %v8968_v0  ;;  %6276 = vmatprep.mubr.bf16.mxu0 %v8443_v21  ;;  %v8455_v18 = vld [vmem:[%s12589_s2 + $0x5cc] ss:$72 sps:$4 sm:$0xff]  }
 0x1a1   :  { %v2422_v38 = vpack.c.bf16 %v2238_v24, %v2237_v29  ;;  %v1639_v39 = vpop.permute.xlu1 %1638  ;;  %v231_v29 = vld [vmem:[%s12588_s0 + $0x6c0] sm:$0xff] }
 0x1a2   :  { %v2240_v40 = vmul.f32 %v1639_v39, %v224_v32  ;;  %v1634_v41 = vpop.permute.xlu0 %1633  ;;  %5248 = vmatmul.mubr.bf16.gmra.mrb[80].mxu1 %v8442_v27  ;;  %1798 = vperm.xlu1 %8319, %v544_v33   ;;  %v552_v27 = vld [vmem:[%s12587_s1 + $0x7c8] sm:$0xff]  ;;  %v551_v32 = vld [vmem:[%s12587_s1 + $0x7c0] sm:$0xff]  ;;  %v8458_v33 = vld [vmem:[%s12589_s2 + $0xcf4] ss:$72 sps:$4 sm:$0xff]  }
 0x1a3   :  { %v2239_v44 = vmul.f32 %v1634_v41, %v223_v34  ;;  %1793 = vperm.xlu0 %8318, %v543_v36   ;;  %6420 = vmatpush1.bf16.msra.mxu0 %v2422_v38  ;;  %v8457_v39 = vld [vmem:[%s12589_s2 + $0x5c8] ss:$72 sps:$4 sm:$0xff]   ;;  %v234_v41 = vld [vmem:[%s12588_s0 + $0x6d8] sm:$0xff] }
 0x1a4   :  { %6421 = vmatprep.subr.bf16.mxu0 %v8968_v0  ;;  %5255 = vmatprep.mubr.bf16.mxu1 %v8446_v37 }
 0x1a5   :  { %v2423_v52 = vpack.c.bf16 %v2240_v40, %v2239_v44  ;;  %v1649_v55 = vpop.permute.xlu1 %1648  ;;  %v233_v44 = vld [vmem:[%s12588_s0 + $0x6d0] sm:$0xff] }
 0x1a6   :  { %v2242_v56 = vmul.f32 %v1649_v55, %v226_v45  ;;  %v1644_v57 = vpop.permute.xlu0 %1643  ;;  %6277 = vmatmul.mubr.bf16.gmra.mrb[32].mxu0 %v8445_v42  ;;  %1808 = vperm.xlu1 %8319, %v546_v46   ;;  %v554_v42 = vld [vmem:[%s12587_s1 + $0x7d8] sm:$0xff]  ;;  %v553_v45 = vld [vmem:[%s12587_s1 + $0x7d0] sm:$0xff] }
 0x1a7   :  { %v2241_v59 = vmul.f32 %v1644_v57, %v225_v47  ;;  %1803 = vperm.xlu0 %8318, %v545_v48   ;;  %6422 = vmatpush1.bf16.msra.mxu0 %v2423_v52  ;;  %v8461_v46 = vld [vmem:[%s12589_s2 + $0x65c] ss:$72 sps:$4 sm:$0xff]   ;;  %v8460_v55 = vld [vmem:[%s12589_s2 + $0xcf0] ss:$72 sps:$4 sm:$0xff]   ;;  %v236_v57 = vld [vmem:[%s12588_s0 + $0x6e8] sm:$0xff] }
 0x1a8   :  { %6423 = vmatprep.subr.bf16.mxu0 %v8968_v0  ;;  %6284 = vmatprep.mubr.bf16.mxu0 %v8449_v51 }
 0x1a9   :  { %v2424_v3 = vpack.c.bf16 %v2242_v56, %v2241_v59  ;;  %v1659_v4 = vpop.permute.xlu1 %1658  ;;  %v235_v59 = vld [vmem:[%s12588_s0 + $0x6e0] sm:$0xff] }
 0x1aa   :  { %v2244_v5 = vmul.f32 %v1659_v4, %v228_v60  ;;  %v1654_v6 = vpop.permute.xlu0 %1653  ;;  %5256 = vmatmul.mubr.bf16.gmra.mrb[84].mxu1 %v8448_v58  ;;  %1818 = vperm.xlu1 %8319, %v548_v62   ;;  %v556_v58 = vld [vmem:[%s12587_s1 + $0x7e8] sm:$0xff]  ;;  %v555_v60 = vld [vmem:[%s12587_s1 + $0x7e0] sm:$0xff] }
 0x1ab   :  { %v2243_v11 = vmul.f32 %v1654_v6, %v227_v63  ;;  %1813 = vperm.xlu0 %8318, %v547_v1   ;;  %6424 = vmatpush1.bf16.msra.mxu0 %v2424_v3  ;;  %v8466_v62 = vld [vmem:[%s12589_s2 + $0xc] ss:$72 sps:$4 sm:$0xff]   ;;  %v8463_v4 = vld [vmem:[%s12589_s2 + $0x658] ss:$72 sps:$4 sm:$0xff]  }
 0x1ac   :  { %6425 = vmatprep.subr.bf16.mxu0 %v8968_v0  ;;  %5263 = vmatprep.mubr.bf16.mxu1 %v8452_v2  ;;  %v238_v6 = vld [vmem:[%s12588_s0 + $0x6f8] sm:$0xff] }
 0x1ad   :  { %v2425_v19 = vpack.c.bf16 %v2244_v5, %v2243_v11  ;;  %v1669_v20 = vpop.permute.xlu1 %1668  ;;  %v237_v11 = vld [vmem:[%s12588_s0 + $0x6f0] sm:$0xff] }
 0x1ae   :  { %v2246_v21 = vmul.f32 %v1669_v20, %v230_v12  ;;  %v1664_v22 = vpop.permute.xlu0 %1663  ;;  %6285 = vmatmul.mubr.bf16.gmra.mrb[36].mxu0 %v8451_v9  ;;  %1828 = vperm.xlu1 %8319, %v550_v13   ;;  %v558_v9 = vld [vmem:[%s12587_s1 + $0x7f8] sm:$0xff]  ;;  %v557_v12 = vld [vmem:[%s12587_s1 + $0x7f0] sm:$0xff] }
 0x1af   :  { %v2245_v24 = vmul.f32 %v1664_v22, %v229_v15  ;;  %1823 = vperm.xlu0 %8318, %v549_v17   ;;  %6426 = vmatpush1.bf16.msra.mxu0 %v2425_v19  ;;  %v8467_v13 = vld [vmem:[%s12589_s2 + $0x6ec] ss:$72 sps:$4 sm:$0xff]   ;;  %v8464_v20 = vld [vmem:[%s12589_s2 + $0x8] ss:$72 sps:$4 sm:$0xff]  }
 0x1b0   :  { %6427 = vmatprep.subr.bf16.mxu0 %v8968_v0  ;;  %6292 = vmatprep.mubr.bf16.mxu0 %v8455_v18  ;;  %v80_v22 = vld [vmem:[%s12588_s0 + $0x208] sm:$0xff] }
 0x1b1   :  { %v2426_v34 = vpack.c.bf16 %v2246_v21, %v2245_v24  ;;  %v1679_v36 = vpop.permute.xlu1 %1678  ;;  %v79_v24 = vld [vmem:[%s12588_s0 + $0x200] sm:$0xff] }
 0x1b2   :  { %v2248_v37 = vmul.f32 %v1679_v36, %v232_v26  ;;  %v1674_v38 = vpop.permute.xlu0 %1673  ;;  %5264 = vmatmul.mubr.bf16.gmra.mrb[88].mxu1 %v8454_v23  ;;  %1838 = vperm.xlu1 %8319, %v552_v27   ;;  %v400_v23 = vld [vmem:[%s12587_s1 + $0x308] sm:$0xff]  ;;  %v399_v26 = vld [vmem:[%s12587_s1 + $0x300] sm:$0xff] }
 0x1b3   :  { %v2247_v40 = vmul.f32 %v1674_v38, %v231_v29  ;;  %1833 = vperm.xlu0 %8318, %v551_v32   ;;  %6428 = vmatpush1.bf16.msra.mxu0 %v2426_v34  ;;  %v8470_v27 = vld [vmem:[%s12589_s2 + $0x9c] ss:$72 sps:$4 sm:$0xff]   ;;  %v8469_v36 = vld [vmem:[%s12589_s2 + $0x6e8] ss:$72 sps:$4 sm:$0xff]  }
 0x1b4   :  { %6429 = vmatprep.subr.bf16.mxu0 %v8968_v0  ;;  %5271 = vmatprep.mubr.bf16.mxu1 %v8458_v33  ;;  %v82_v38 = vld [vmem:[%s12588_s0 + $0x218] sm:$0xff] }
 0x1b5   :  { %v2427_v47 = vpack.c.bf16 %v2248_v37, %v2247_v40  ;;  %v1689_v48 = vpop.permute.xlu1 %1688  ;;  %v81_v40 = vld [vmem:[%s12588_s0 + $0x210] sm:$0xff] }
 0x1b6   :  { %v2250_v51 = vmul.f32 %v1689_v48, %v234_v41  ;;  %v1684_v52 = vpop.permute.xlu0 %1683  ;;  %6293 = vmatmul.mubr.bf16.gmra.mrb[40].mxu0 %v8457_v39  ;;  %1848 = vperm.xlu1 %8319, %v554_v42   ;;  %v402_v39 = vld [vmem:[%s12587_s1 + $0x318] sm:$0xff]  ;;  %v401_v41 = vld [vmem:[%s12587_s1 + $0x310] sm:$0xff] }
 0x1b7   :  { %v2249_v56 = vmul.f32 %v1684_v52, %v233_v44  ;;  %1843 = vperm.xlu0 %8318, %v553_v45   ;;  %6430 = vmatpush1.bf16.msra.mxu0 %v2427_v47  ;;  %v8473_v42 = vld [vmem:[%s12589_s2 + $0x77c] ss:$72 sps:$4 sm:$0xff]   ;;  %v8472_v48 = vld [vmem:[%s12589_s2 + $0x98] ss:$72 sps:$4 sm:$0xff]   ;;  %v84_v52 = vld [vmem:[%s12588_s0 + $0x228] sm:$0xff] }
 0x1b8   :  { %6431 = vmatprep.subr.bf16.mxu0 %v8968_v0  ;;  %6300 = vmatprep.mubr.bf16.mxu0 %v8461_v46 }
 0x1b9   :  { %v2428_v63 = vpack.c.bf16 %v2250_v51, %v2249_v56  ;;  %v1699_v1 = vpop.permute.xlu1 %1698  ;;  %v83_v56 = vld [vmem:[%s12588_s0 + $0x220] sm:$0xff] }
 0x1ba   :  { %v2252_v2 = vmul.f32 %v1699_v1, %v236_v57  ;;  %v1694_v3 = vpop.permute.xlu0 %1693  ;;  %5272 = vmatmul.mubr.bf16.gmra.mrb[92].mxu1 %v8460_v55  ;;  %1858 = vperm.xlu1 %8319, %v556_v58   ;;  %v404_v55 = vld [vmem:[%s12587_s1 + $0x328] sm:$0xff]  ;;  %v403_v57 = vld [vmem:[%s12587_s1 + $0x320] sm:$0xff] }
 0x1bb   :  { %v2251_v5 = vmul.f32 %v1694_v3, %v235_v59  ;;  %1853 = vperm.xlu0 %8318, %v555_v60   ;;  %6432 = vmatpush1.bf16.msra.mxu0 %v2428_v63  ;;  %v8476_v58 = vld [vmem:[%s12589_s2 + $0x12c] ss:$72 sps:$4 sm:$0xff]   ;;  %v8475_v1 = vld [vmem:[%s12589_s2 + $0x778] ss:$72 sps:$4 sm:$0xff]  }
 0x1bc   :  { %6433 = vmatprep.subr.bf16.mxu0 %v8968_v0  ;;  %5312 = vmatprep.mubr.bf16.mxu1 %v8466_v62  ;;  %v86_v3 = vld [vmem:[%s12588_s0 + $0x238] sm:$0xff] }
 0x1bd   :  { %v2429_v15 = vpack.c.bf16 %v2252_v2, %v2251_v5  ;;  %v1709_v17 = vpop.permute.xlu1 %1708  ;;  %v85_v5 = vld [vmem:[%s12588_s0 + $0x230] sm:$0xff] }
 0x1be   :  { %v2254_v18 = vmul.f32 %v1709_v17, %v238_v6  ;;  %v1704_v19 = vpop.permute.xlu0 %1703  ;;  %6301 = vmatmul.mubr.bf16.gmra.mrb[44].mxu0 %v8463_v4  ;;  %1868 = vperm.xlu1 %8319, %v558_v9   ;;  %v406_v4 = vld [vmem:[%s12587_s1 + $0x338] sm:$0xff]  ;;  %v405_v6 = vld [vmem:[%s12587_s1 + $0x330] sm:$0xff] }
 0x1bf   :  { %v2253_v21 = vmul.f32 %v1704_v19, %v237_v11  ;;  %1863 = vperm.xlu0 %8318, %v557_v12   ;;  %6434 = vmatpush1.bf16.msra.mxu0 %v2429_v15  ;;  %v8479_v9 = vld [vmem:[%s12589_s2 + $0x80c] ss:$72 sps:$4 sm:$0xff]   ;;  %v8478_v17 = vld [vmem:[%s12589_s2 + $0x128] ss:$72 sps:$4 sm:$0xff]  }
 0x1c0   :  { %6435 = vmatprep.subr.bf16.mxu0 %v8968_v0  ;;  %6308 = vmatprep.mubr.bf16.mxu0 %v8467_v13  ;;  %v88_v19 = vld [vmem:[%s12588_s0 + $0x248] sm:$0xff] }
 0x1c1   :  { %v2430_v29 = vpack.c.bf16 %v2254_v18, %v2253_v21  ;;  %v919_v32 = vpop.permute.xlu1 %918  ;;  %v87_v21 = vld [vmem:[%s12588_s0 + $0x240] sm:$0xff] }
 0x1c2   :  { %v2096_v33 = vmul.f32 %v919_v32, %v80_v22  ;;  %v914_v34 = vpop.permute.xlu0 %913  ;;  %5313 = vmatmul.mubr.bf16.vlgmr.msra.gmra.mrb[0].mxu1 %v8464_v20  ;;  %1078 = vperm.xlu1 %8319, %v400_v23   ;;  %v408_v20 = vld [vmem:[%s12587_s1 + $0x348] sm:$0xff]  ;;  %v407_v22 = vld [vmem:[%s12587_s1 + $0x340] sm:$0xff] }
 0x1c3   :  { %v2095_v37 = vmul.f32 %v914_v34, %v79_v24  ;;  %1073 = vperm.xlu0 %8318, %v399_v26   ;;  %6436 = vmatpush1.bf16.msra.mxu0 %v2430_v29  ;;  %v8482_v23 = vld [vmem:[%s12589_s2 + $0x1bc] ss:$72 sps:$4 sm:$0xff]   ;;  %v8481_v32 = vld [vmem:[%s12589_s2 + $0x808] ss:$72 sps:$4 sm:$0xff]  }
 0x1c4   :  { %5320 = vmatprep.mubr.bf16.mxu1 %v8470_v27  ;;  %6630 = vmatprep.subr.bf16.mxu0 %v8968_v0  ;;  %v90_v34 = vld [vmem:[%s12588_s0 + $0x258] sm:$0xff] }
 0x1c5   :  { %v2351_v44 = vpack.c.bf16 %v2096_v33, %v2095_v37  ;;  %v929_v45 = vpop.permute.xlu1 %928  ;;  %v89_v37 = vld [vmem:[%s12588_s0 + $0x250] sm:$0xff] }
 0x1c6   :  { %v2098_v46 = vmul.f32 %v929_v45, %v82_v38  ;;  %v924_v47 = vpop.permute.xlu0 %923  ;;  %6309 = vmatmul.mubr.bf16.gmra.mrb[48].mxu0 %v8469_v36  ;;  %1088 = vperm.xlu1 %8319, %v402_v39   ;;  %v410_v36 = vld [vmem:[%s12587_s1 + $0x358] sm:$0xff]  ;;  %v409_v38 = vld [vmem:[%s12587_s1 + $0x350] sm:$0xff] }
 0x1c7   :  { %v2097_v51 = vmul.f32 %v924_v47, %v81_v40  ;;  %1083 = vperm.xlu0 %8318, %v401_v41   ;;  %5506 = vmatpush1.bf16.msra.mxu1 %v2351_v44  ;;  %v8485_v39 = vld [vmem:[%s12589_s2 + $0x89c] ss:$72 sps:$4 sm:$0xff]   ;;  %v8484_v45 = vld [vmem:[%s12589_s2 + $0x1b8] ss:$72 sps:$4 sm:$0xff]   ;;  %v92_v47 = vld [vmem:[%s12588_s0 + $0x268] sm:$0xff] }
 0x1c8   :  { %5507 = vmatprep.subr.bf16.mxu1 %v8968_v0  ;;  %6316 = vmatprep.mubr.bf16.mxu0 %v8473_v42 }
 0x1c9   :  { %v2352_v59 = vpack.c.bf16 %v2098_v46, %v2097_v51  ;;  %v939_v60 = vpop.permute.xlu1 %938  ;;  %v91_v51 = vld [vmem:[%s12588_s0 + $0x260] sm:$0xff] }
 0x1ca   :  { %v2100_v62 = vmul.f32 %v939_v60, %v84_v52  ;;  %v934_v63 = vpop.permute.xlu0 %933  ;;  %5321 = vmatmul.mubr.bf16.gmra.mrb[4].mxu1 %v8472_v48  ;;  %1098 = vperm.xlu1 %8319, %v404_v55   ;;  %v412_v48 = vld [vmem:[%s12587_s1 + $0x368] sm:$0xff]  ;;  %v411_v52 = vld [vmem:[%s12587_s1 + $0x360] sm:$0xff] }
 0x1cb   :  { %v2099_v2 = vmul.f32 %v934_v63, %v83_v56  ;;  %1093 = vperm.xlu0 %8318, %v403_v57   ;;  %5508 = vmatpush1.bf16.msra.mxu1 %v2352_v59  ;;  %v8488_v55 = vld [vmem:[%s12589_s2 + $0x24c] ss:$72 sps:$4 sm:$0xff]   ;;  %v8487_v60 = vld [vmem:[%s12589_s2 + $0x898] ss:$72 sps:$4 sm:$0xff]  }
 0x1cc   :  { %5509 = vmatprep.subr.bf16.mxu1 %v8968_v0  ;;  %5328 = vmatprep.mubr.bf16.mxu1 %v8476_v58  ;;  %v94_v63 = vld [vmem:[%s12588_s0 + $0x278] sm:$0xff] }
 0x1cd   :  { %v2353_v11 = vpack.c.bf16 %v2100_v62, %v2099_v2  ;;  %v949_v12 = vpop.permute.xlu1 %948  ;;  %v93_v2 = vld [vmem:[%s12588_s0 + $0x270] sm:$0xff] }
 0x1ce   :  { %v2102_v13 = vmul.f32 %v949_v12, %v86_v3  ;;  %v944_v15 = vpop.permute.xlu0 %943  ;;  %6317 = vmatmul.mubr.bf16.gmra.mrb[52].mxu0 %v8475_v1  ;;  %1108 = vperm.xlu1 %8319, %v406_v4   ;;  %v414_v1 = vld [vmem:[%s12587_s1 + $0x378] sm:$0xff]  ;;  %v413_v3 = vld [vmem:[%s12587_s1 + $0x370] sm:$0xff] }
 0x1cf   :  { %v2101_v18 = vmul.f32 %v944_v15, %v85_v5  ;;  %1103 = vperm.xlu0 %8318, %v405_v6   ;;  %5510 = vmatpush1.bf16.msra.mxu1 %v2353_v11  ;;  %v8491_v4 = vld [vmem:[%s12589_s2 + $0x92c] ss:$72 sps:$4 sm:$0xff]   ;;  %v8490_v12 = vld [vmem:[%s12589_s2 + $0x248] ss:$72 sps:$4 sm:$0xff]  }
 0x1d0   :  { %5511 = vmatprep.subr.bf16.mxu1 %v8968_v0  ;;  %6324 = vmatprep.mubr.bf16.mxu0 %v8479_v9  ;;  %v96_v15 = vld [vmem:[%s12588_s0 + $0x288] sm:$0xff] }
 0x1d1   :  { %v2354_v24 = vpack.c.bf16 %v2102_v13, %v2101_v18  ;;  %v959_v26 = vpop.permute.xlu1 %958  ;;  %v95_v18 = vld [vmem:[%s12588_s0 + $0x280] sm:$0xff] }
 0x1d2   :  { %v2104_v27 = vmul.f32 %v959_v26, %v88_v19  ;;  %v954_v29 = vpop.permute.xlu0 %953  ;;  %5329 = vmatmul.mubr.bf16.gmra.mrb[8].mxu1 %v8478_v17  ;;  %1118 = vperm.xlu1 %8319, %v408_v20   ;;  %v416_v17 = vld [vmem:[%s12587_s1 + $0x388] sm:$0xff]  ;;  %v415_v19 = vld [vmem:[%s12587_s1 + $0x380] sm:$0xff] }
 0x1d3   :  { %v2103_v33 = vmul.f32 %v954_v29, %v87_v21  ;;  %1113 = vperm.xlu0 %8318, %v407_v22   ;;  %5512 = vmatpush1.bf16.msra.mxu1 %v2354_v24  ;;  %v8494_v20 = vld [vmem:[%s12589_s2 + $0x2dc] ss:$72 sps:$4 sm:$0xff]   ;;  %v8493_v26 = vld [vmem:[%s12589_s2 + $0x928] ss:$72 sps:$4 sm:$0xff]  }
 0x1d4   :  { %5513 = vmatprep.subr.bf16.mxu1 %v8968_v0  ;;  %5336 = vmatprep.mubr.bf16.mxu1 %v8482_v23  ;;  %v98_v29 = vld [vmem:[%s12588_s0 + $0x298] sm:$0xff] }
 0x1d5   :  { %v2355_v40 = vpack.c.bf16 %v2104_v27, %v2103_v33  ;;  %v969_v41 = vpop.permute.xlu1 %968  ;;  %v97_v33 = vld [vmem:[%s12588_s0 + $0x290] sm:$0xff] }
 0x1d6   :  { %v2106_v42 = vmul.f32 %v969_v41, %v90_v34  ;;  %v964_v44 = vpop.permute.xlu0 %963  ;;  %6325 = vmatmul.mubr.bf16.gmra.mrb[56].mxu0 %v8481_v32  ;;  %1128 = vperm.xlu1 %8319, %v410_v36   ;;  %v418_v32 = vld [vmem:[%s12587_s1 + $0x398] sm:$0xff]  ;;  %v417_v34 = vld [vmem:[%s12587_s1 + $0x390] sm:$0xff] }
 0x1d7   :  { %v2105_v46 = vmul.f32 %v964_v44, %v89_v37  ;;  %1123 = vperm.xlu0 %8318, %v409_v38   ;;  %5514 = vmatpush1.bf16.msra.mxu1 %v2355_v40  ;;  %v8497_v36 = vld [vmem:[%s12589_s2 + $0x9bc] ss:$72 sps:$4 sm:$0xff]   ;;  %v8496_v41 = vld [vmem:[%s12589_s2 + $0x2d8] ss:$72 sps:$4 sm:$0xff]   ;;  %v100_v44 = vld [vmem:[%s12588_s0 + $0x2a8] sm:$0xff] }
 0x1d8   :  { %5515 = vmatprep.subr.bf16.mxu1 %v8968_v0  ;;  %6332 = vmatprep.mubr.bf16.mxu0 %v8485_v39 }
 0x1d9   :  { %v2356_v56 = vpack.c.bf16 %v2106_v42, %v2105_v46  ;;  %v979_v57 = vpop.permute.xlu1 %978  ;;  %v99_v46 = vld [vmem:[%s12588_s0 + $0x2a0] sm:$0xff] }
 0x1da   :  { %v2108_v58 = vmul.f32 %v979_v57, %v92_v47  ;;  %v974_v59 = vpop.permute.xlu0 %973  ;;  %5337 = vmatmul.mubr.bf16.gmra.mrb[12].mxu1 %v8484_v45  ;;  %1138 = vperm.xlu1 %8319, %v412_v48   ;;  %v420_v45 = vld [vmem:[%s12587_s1 + $0x3a8] sm:$0xff]  ;;  %v419_v47 = vld [vmem:[%s12587_s1 + $0x3a0] sm:$0xff] }
 0x1db   :  { %v2107_v62 = vmul.f32 %v974_v59, %v91_v51  ;;  %1133 = vperm.xlu0 %8318, %v411_v52   ;;  %5516 = vmatpush1.bf16.msra.mxu1 %v2356_v56  ;;  %v8500_v48 = vld [vmem:[%s12589_s2 + $0x36c] ss:$72 sps:$4 sm:$0xff]   ;;  %v8499_v57 = vld [vmem:[%s12589_s2 + $0x9b8] ss:$72 sps:$4 sm:$0xff]  }
 0x1dc   :  { %5517 = vmatprep.subr.bf16.mxu1 %v8968_v0  ;;  %5344 = vmatprep.mubr.bf16.mxu1 %v8488_v55  ;;  %v102_v59 = vld [vmem:[%s12588_s0 + $0x2b8] sm:$0xff] }
 0x1dd   :  { %v2357_v5 = vpack.c.bf16 %v2108_v58, %v2107_v62  ;;  %v989_v6 = vpop.permute.xlu1 %988  ;;  %v101_v62 = vld [vmem:[%s12588_s0 + $0x2b0] sm:$0xff] }
 0x1de   :  { %v2110_v9 = vmul.f32 %v989_v6, %v94_v63  ;;  %v984_v11 = vpop.permute.xlu0 %983  ;;  %6333 = vmatmul.mubr.bf16.gmra.mrb[60].mxu0 %v8487_v60  ;;  %1148 = vperm.xlu1 %8319, %v414_v1   ;;  %v422_v60 = vld [vmem:[%s12587_s1 + $0x3b8] sm:$0xff]  ;;  %v421_v63 = vld [vmem:[%s12587_s1 + $0x3b0] sm:$0xff] }
 0x1df   :  { %v2109_v13 = vmul.f32 %v984_v11, %v93_v2  ;;  %1143 = vperm.xlu0 %8318, %v413_v3   ;;  %5518 = vmatpush1.bf16.msra.mxu1 %v2357_v5  ;;  %v8503_v1 = vld [vmem:[%s12589_s2 + $0xa4c] ss:$72 sps:$4 sm:$0xff]   ;;  %v8502_v6 = vld [vmem:[%s12589_s2 + $0x368] ss:$72 sps:$4 sm:$0xff]  }
 0x1e0   :  { %5519 = vmatprep.subr.bf16.mxu1 %v8968_v0  ;;  %6340 = vmatprep.mubr.bf16.mxu0 %v8491_v4  ;;  %v104_v11 = vld [vmem:[%s12588_s0 + $0x2c8] sm:$0xff] }
 0x1e1   :  { %v2358_v21 = vpack.c.bf16 %v2110_v9, %v2109_v13  ;;  %v999_v22 = vpop.permute.xlu1 %998  ;;  %v103_v13 = vld [vmem:[%s12588_s0 + $0x2c0] sm:$0xff] }
 0x1e2   :  { %v2112_v23 = vmul.f32 %v999_v22, %v96_v15  ;;  %v994_v24 = vpop.permute.xlu0 %993  ;;  %5345 = vmatmul.mubr.bf16.gmra.mrb[16].mxu1 %v8490_v12  ;;  %1158 = vperm.xlu1 %8319, %v416_v17   ;;  %v424_v12 = vld [vmem:[%s12587_s1 + $0x3c8] sm:$0xff]  ;;  %v423_v15 = vld [vmem:[%s12587_s1 + $0x3c0] sm:$0xff] }
 0x1e3   :  { %v2111_v27 = vmul.f32 %v994_v24, %v95_v18  ;;  %1153 = vperm.xlu0 %8318, %v415_v19   ;;  %5520 = vmatpush1.bf16.msra.mxu1 %v2358_v21  ;;  %v8506_v17 = vld [vmem:[%s12589_s2 + $0x3fc] ss:$72 sps:$4 sm:$0xff]   ;;  %v8505_v22 = vld [vmem:[%s12589_s2 + $0xa48] ss:$72 sps:$4 sm:$0xff]  }
 0x1e4   :  { %5521 = vmatprep.subr.bf16.mxu1 %v8968_v0  ;;  %5352 = vmatprep.mubr.bf16.mxu1 %v8494_v20  ;;  %v106_v24 = vld [vmem:[%s12588_s0 + $0x2d8] sm:$0xff] }
 0x1e5   :  { %v2359_v37 = vpack.c.bf16 %v2112_v23, %v2111_v27  ;;  %v1009_v38 = vpop.permute.xlu1 %1008  ;;  %v105_v27 = vld [vmem:[%s12588_s0 + $0x2d0] sm:$0xff] }
 0x1e6   :  { %v2114_v39 = vmul.f32 %v1009_v38, %v98_v29  ;;  %v1004_v40 = vpop.permute.xlu0 %1003  ;;  %6341 = vmatmul.mubr.bf16.gmra.mrb[64].mxu0 %v8493_v26  ;;  %1168 = vperm.xlu1 %8319, %v418_v32   ;;  %v426_v26 = vld [vmem:[%s12587_s1 + $0x3d8] sm:$0xff]  ;;  %v425_v29 = vld [vmem:[%s12587_s1 + $0x3d0] sm:$0xff] }
 0x1e7   :  { %v2113_v42 = vmul.f32 %v1004_v40, %v97_v33  ;;  %1163 = vperm.xlu0 %8318, %v417_v34   ;;  %5522 = vmatpush1.bf16.msra.mxu1 %v2359_v37  ;;  %v8509_v32 = vld [vmem:[%s12589_s2 + $0xadc] ss:$72 sps:$4 sm:$0xff]   ;;  %v8508_v38 = vld [vmem:[%s12589_s2 + $0x3f8] ss:$72 sps:$4 sm:$0xff]   ;;  %v108_v40 = vld [vmem:[%s12588_s0 + $0x2e8] sm:$0xff] }
 0x1e8   :  { %5523 = vmatprep.subr.bf16.mxu1 %v8968_v0  ;;  %6348 = vmatprep.mubr.bf16.mxu0 %v8497_v36 }
 0x1e9   :  { %v2360_v51 = vpack.c.bf16 %v2114_v39, %v2113_v42  ;;  %v1019_v52 = vpop.permute.xlu1 %1018  ;;  %v107_v42 = vld [vmem:[%s12588_s0 + $0x2e0] sm:$0xff] }
 0x1ea   :  { %v2116_v55 = vmul.f32 %v1019_v52, %v100_v44  ;;  %v1014_v56 = vpop.permute.xlu0 %1013  ;;  %5353 = vmatmul.mubr.bf16.gmra.mrb[20].mxu1 %v8496_v41  ;;  %1178 = vperm.xlu1 %8319, %v420_v45   ;;  %v428_v41 = vld [vmem:[%s12587_s1 + $0x3e8] sm:$0xff]  ;;  %v427_v44 = vld [vmem:[%s12587_s1 + $0x3e0] sm:$0xff] }
 0x1eb   :  { %v2115_v58 = vmul.f32 %v1014_v56, %v99_v46  ;;  %1173 = vperm.xlu0 %8318, %v419_v47   ;;  %5524 = vmatpush1.bf16.msra.mxu1 %v2360_v51  ;;  %v8512_v45 = vld [vmem:[%s12589_s2 + $0x48c] ss:$72 sps:$4 sm:$0xff]   ;;  %v8511_v52 = vld [vmem:[%s12589_s2 + $0xad8] ss:$72 sps:$4 sm:$0xff]  }
 0x1ec   :  { %5525 = vmatprep.subr.bf16.mxu1 %v8968_v0  ;;  %5360 = vmatprep.mubr.bf16.mxu1 %v8500_v48  ;;  %v110_v56 = vld [vmem:[%s12588_s0 + $0x2f8] sm:$0xff] }
 0x1ed   :  { %v2361_v2 = vpack.c.bf16 %v2116_v55, %v2115_v58  ;;  %v1029_v3 = vpop.permute.xlu1 %1028  ;;  %v109_v58 = vld [vmem:[%s12588_s0 + $0x2f0] sm:$0xff] }
 0x1ee   :  { %v2118_v4 = vmul.f32 %v1029_v3, %v102_v59  ;;  %v1024_v5 = vpop.permute.xlu0 %1023  ;;  %6349 = vmatmul.mubr.bf16.gmra.mrb[68].mxu0 %v8499_v57  ;;  %1188 = vperm.xlu1 %8319, %v422_v60   ;;  %v430_v57 = vld [vmem:[%s12587_s1 + $0x3f8] sm:$0xff]  ;;  %v429_v59 = vld [vmem:[%s12587_s1 + $0x3f0] sm:$0xff] }
 0x1ef   :  { %v2117_v9 = vmul.f32 %v1024_v5, %v101_v62  ;;  %1183 = vperm.xlu0 %8318, %v421_v63   ;;  %5526 = vmatpush1.bf16.msra.mxu1 %v2361_v2  ;;  %v8515_v60 = vld [vmem:[%s12589_s2 + $0xb6c] ss:$72 sps:$4 sm:$0xff]   ;;  %v8514_v3 = vld [vmem:[%s12589_s2 + $0x488] ss:$72 sps:$4 sm:$0xff]  }
 0x1f0   :  { %5527 = vmatprep.subr.bf16.mxu1 %v8968_v0  ;;  %6356 = vmatprep.mubr.bf16.mxu0 %v8503_v1  ;;  %v560_v5 = vld [vmem:[%s12587_s1 + $0x808] sm:$0xff] }
 0x1f1   :  { %v2362_v18 = vpack.c.bf16 %v2118_v4, %v2117_v9  ;;  %v1039_v19 = vpop.permute.xlu1 %1038  ;;  %v8518_v9 = vld [vmem:[%s12589_s2 + $0x51c] ss:$72 sps:$4 sm:$0xff]  }
 0x1f2   :  { %v2120_v20 = vmul.f32 %v1039_v19, %v104_v11  ;;  %v1034_v21 = vpop.permute.xlu0 %1033  ;;  %5361 = vmatmul.mubr.bf16.gmra.mrb[24].mxu1 %v8502_v6  ;;  %1198 = vperm.xlu1 %8319, %v424_v12   ;;  %v559_v6 = vld [vmem:[%s12587_s1 + $0x800] sm:$0xff]  ;;  %v561_v19 = vld [vmem:[%s12587_s1 + $0x810] sm:$0xff] }
 0x1f3   :  { %v2119_v23 = vmul.f32 %v1034_v21, %v103_v13  ;;  %1193 = vperm.xlu0 %8318, %v423_v15   ;;  %5528 = vmatpush1.bf16.msra.mxu1 %v2362_v18  ;;  %v8517_v15 = vld [vmem:[%s12589_s2 + $0xb68] ss:$72 sps:$4 sm:$0xff]   ;;  %v8521_v18 = vld [vmem:[%s12589_s2 + $0xbfc] ss:$72 sps:$4 sm:$0xff]  }
 0x1f4   :  { %5529 = vmatprep.subr.bf16.mxu1 %v8968_v0  ;;  %5368 = vmatprep.mubr.bf16.mxu1 %v8506_v17  ;;  %v562_v17 = vld [vmem:[%s12587_s1 + $0x818] sm:$0xff] }
 0x1f5   :  { %v2363_v33 = vpack.c.bf16 %v2120_v20, %v2119_v23  ;;  %v1049_v34 = vpop.permute.xlu1 %1048  ;;  %v564_v23 = vld [vmem:[%s12587_s1 + $0x828] sm:$0xff] }
 0x1f6   :  { %v2122_v36 = vmul.f32 %v1049_v34, %v106_v24  ;;  %v1044_v37 = vpop.permute.xlu0 %1043  ;;  %6357 = vmatmul.mubr.bf16.gmra.mrb[72].mxu0 %v8505_v22  ;;  %1208 = vperm.xlu1 %8319, %v426_v26   ;;  %v8520_v22 = vld [vmem:[%s12589_s2 + $0x518] ss:$72 sps:$4 sm:$0xff]   ;;  %v8524_v24 = vld [vmem:[%s12589_s2 + $0x5ac] ss:$72 sps:$4 sm:$0xff]  }
 0x1f7   :  { %v2121_v39 = vmul.f32 %v1044_v37, %v105_v27  ;;  %1203 = vperm.xlu0 %8318, %v425_v29   ;;  %5530 = vmatpush1.bf16.msra.mxu1 %v2363_v33  ;;  %v563_v26 = vld [vmem:[%s12587_s1 + $0x820] sm:$0xff]  ;;  %v566_v33 = vld [vmem:[%s12587_s1 + $0x838] sm:$0xff]  ;;  %v8527_v34 = vld [vmem:[%s12589_s2 + $0xc8c] ss:$72 sps:$4 sm:$0xff]  }
 0x1f8   :  { %5531 = vmatprep.subr.bf16.mxu1 %v8968_v0  ;;  %6364 = vmatprep.mubr.bf16.mxu0 %v8509_v32  ;;  %v8523_v32 = vld [vmem:[%s12589_s2 + $0xbf8] ss:$72 sps:$4 sm:$0xff]  }
 0x1f9   :  { %v2364_v46 = vpack.c.bf16 %v2122_v36, %v2121_v39  ;;  %v1059_v47 = vpop.permute.xlu1 %1058  ;;  %v565_v36 = vld [vmem:[%s12587_s1 + $0x830] sm:$0xff] }
 0x1fa   :  { %v2124_v48 = vmul.f32 %v1059_v47, %v108_v40  ;;  %v1054_v51 = vpop.permute.xlu0 %1053  ;;  %5369 = vmatmul.mubr.bf16.gmra.mrb[28].mxu1 %v8508_v38  ;;  %1218 = vperm.xlu1 %8319, %v428_v41   ;;  %v8526_v39 = vld [vmem:[%s12589_s2 + $0x5a8] ss:$72 sps:$4 sm:$0xff]   ;;  %v8530_v41 = vld [vmem:[%s12589_s2 + $0x63c] ss:$72 sps:$4 sm:$0xff]  }
 0x1fb   :  { %v2123_v55 = vmul.f32 %v1054_v51, %v107_v42  ;;  %1213 = vperm.xlu0 %8318, %v427_v44   ;;  %5532 = vmatpush1.bf16.msra.mxu1 %v2364_v46  ;;  %v568_v40 = vld [vmem:[%s12587_s1 + $0x848] sm:$0xff]  ;;  %v567_v42 = vld [vmem:[%s12587_s1 + $0x840] sm:$0xff]  ;;  %v569_v51 = vld [vmem:[%s12587_s1 + $0x850] sm:$0xff] }
 0x1fc   :  { %5533 = vmatprep.subr.bf16.mxu1 %v8968_v0  ;;  %5376 = vmatprep.mubr.bf16.mxu1 %v8512_v45  ;;  %v8529_v44 = vld [vmem:[%s12589_s2 + $0xc88] ss:$72 sps:$4 sm:$0xff]   ;;  %v570_v45 = vld [vmem:[%s12587_s1 + $0x858] sm:$0xff] }
 0x1fd   :  { %v2365_v62 = vpack.c.bf16 %v2124_v48, %v2123_v55  ;;  %v1069_v63 = vpop.permute.xlu1 %1068  ;;  %v8533_v46 = vld [vmem:[%s12589_s2 + $0xd1c] ss:$72 sps:$4 sm:$0xff]   ;;  %v572_v55 = vld [vmem:[%s12587_s1 + $0x868] sm:$0xff] }
 0x1fe   :  { %v2126_v1 = vmul.f32 %v1069_v63, %v110_v56  ;;  %v1064_v2 = vpop.permute.xlu0 %1063  ;;  %6365 = vmatmul.mubr.bf16.gmra.mrb[76].mxu0 %v8511_v52  ;;  %1228 = vperm.xlu1 %8319, %v430_v57   ;;  %v8532_v52 = vld [vmem:[%s12589_s2 + $0x638] ss:$72 sps:$4 sm:$0xff]   ;;  %v8536_v56 = vld [vmem:[%s12589_s2 + $0x6cc] ss:$72 sps:$4 sm:$0xff]  }
 0x1ff   :  { %v2125_v4 = vmul.f32 %v1064_v2, %v109_v58  ;;  %1223 = vperm.xlu0 %8318, %v429_v59   ;;  %5534 = vmatpush1.bf16.msra.mxu1 %v2365_v62  ;;  %v571_v57 = vld [vmem:[%s12587_s1 + $0x860] sm:$0xff]  ;;  %v574_v62 = vld [vmem:[%s12587_s1 + $0x878] sm:$0xff]  ;;  %v240_v2 = vld [vmem:[%s12588_s0 + $0x708] sm:$0xff] }
 0x200   :  { %5535 = vmatprep.subr.bf16.mxu1 %v8968_v0  ;;  %6372 = vmatprep.mubr.bf16.mxu0 %v8515_v60  ;;  %v8535_v60 = vld [vmem:[%s12589_s2 + $0xd18] ss:$72 sps:$4 sm:$0xff]   ;;  %v8541_v63 = vld [vmem:[%s12589_s2 + $0x34] ss:$72 sps:$4 sm:$0xff]  }
 0x201   :  { %v2366_v11 = vpack.c.bf16 %v2126_v1, %v2125_v4  ;;  %v10882_v12 = vpop.permute.xlu1 %1718  ;;  %v573_v1 = vld [vmem:[%s12587_s1 + $0x870] sm:$0xff] }
 0x202   :  { %v10884_v13 = vpop.permute.xlu0 %1713  ;;  %5377 = vmatmul.mubr.bf16.gmra.mrb[32].mxu1 %v8514_v3  ;;  %1878 = vperm.xlu1 %8319, %v560_v5   ;;  %v239_v3 = vld [vmem:[%s12588_s0 + $0x700] sm:$0xff]  ;;  %v8538_v4 = vld [vmem:[%s12589_s2 + $0x6c8] ss:$72 sps:$4 sm:$0xff]  }
 0x203   :  { %1873 = vperm.xlu0 %8318, %v559_v6   ;;  %5536 = vmatpush1.bf16.msra.mxu1 %v2366_v11  ;;  %v576_v5 = vld [vmem:[%s12587_s1 + $0x888] sm:$0xff]  ;;  %v8542_v6 = vld [vmem:[%s12589_s2 + $0x75c] ss:$72 sps:$4 sm:$0xff]  }
 0x204   :  { %5384 = vmatprep.mubr.bf16.mxu1 %v8518_v9  ;;  %5730 = vmatprep.subr.bf16.mxu1 %v8968_v0 }
 0x205   :  { %v10899_v20 = vpop.permute.xlu1 %1728 }
 0x206   :  { %v10901_v21 = vpop.permute.xlu0 %1723  ;;  %6373 = vmatmul.mubr.bf16.gmra.mrb[80].mxu0 %v8517_v15  ;;  %1888 = vperm.xlu1 %8319, %v562_v17   ;;  %v575_v15 = vld [vmem:[%s12587_s1 + $0x880] sm:$0xff]  ;;  %v2256_v17 = vmul.f32 %v10882_v12, %v240_v2  ;;  %v578_v12 = vld [vmem:[%s12587_s1 + $0x898] sm:$0xff]  ;;  %v248_v2 = vld [vmem:[%s12588_s0 + $0x748] sm:$0xff] }
 0x207   :  { %1883 = vperm.xlu0 %8318, %v561_v19   ;;  %6380 = vmatprep.mubr.bf16.mxu0 %v8521_v18  ;;  %v2255_v18 = vmul.f32 %v10884_v13, %v239_v3  ;;  %v242_v19 = vld [vmem:[%s12588_s0 + $0x718] sm:$0xff]  ;;  %v577_v13 = vld [vmem:[%s12587_s1 + $0x890] sm:$0xff]  ;;  %v247_v3 = vld [vmem:[%s12588_s0 + $0x740] sm:$0xff] }
 0x209   :  { %v10915_v27 = vpop.permute.xlu1 %1738 }
 0x20a   :  { %v10917_v29 = vpop.permute.xlu0 %1733  ;;  %5385 = vmatmul.mubr.bf16.gmra.mrb[36].mxu1 %v8520_v22  ;;  %1898 = vperm.xlu1 %8319, %v564_v23   ;;  %v241_v22 = vld [vmem:[%s12588_s0 + $0x710] sm:$0xff] }
 0x20b   :  { %1893 = vperm.xlu0 %8318, %v563_v26   ;;  %5392 = vmatprep.mubr.bf16.mxu1 %v8524_v24  ;;  %v8539_v23 = vld [vmem:[%s12589_s2 + $0x30] ss:$72 sps:$4 sm:$0xff]   ;;  %v8545_v24 = vld [vmem:[%s12589_s2 + $0xc4] ss:$72 sps:$4 sm:$0xff]   ;;  %v2431_v26 = vpack.c.bf16 %v2256_v17, %v2255_v18 }
 0x20c   :  { %v250_v18 = vld [vmem:[%s12588_s0 + $0x758] sm:$0xff] }
 0x20d   :  { %v10931_v37 = vpop.permute.xlu1 %1748 }
 0x20e   :  { %v10933_v38 = vpop.permute.xlu0 %1743  ;;  %6381 = vmatmul.mubr.bf16.gmra.mrb[84].mxu0 %v8523_v32  ;;  %1908 = vperm.xlu1 %8319, %v566_v33   ;;  %v2258_v32 = vmul.f32 %v10899_v20, %v242_v19  ;;  %v2257_v33 = vmul.f32 %v10901_v21, %v241_v22  ;;  %v8544_v20 = vld [vmem:[%s12589_s2 + $0x758] ss:$72 sps:$4 sm:$0xff]   ;;  %v580_v21 = vld [vmem:[%s12587_s1 + $0x8a8] sm:$0xff]  ;;  %v249_v19 = vld [vmem:[%s12588_s0 + $0x750] sm:$0xff] }
 0x20f   :  { %1903 = vperm.xlu0 %8318, %v565_v36   ;;  %6388 = vmatprep.mubr.bf16.mxu0 %v8527_v34  ;;  %v244_v34 = vld [vmem:[%s12588_s0 + $0x728] sm:$0xff]  ;;  %v243_v36 = vld [vmem:[%s12588_s0 + $0x720] sm:$0xff] }
 0x211   :  { %v10956_v47 = vpop.permute.xlu1 %1758 }
 0x212   :  { %5393 = vmatmul.mubr.bf16.gmra.mrb[40].mxu1 %v8526_v39  ;;  %1918 = vperm.xlu1 %8319, %v568_v40   ;;  %v10958_v48 = vpop.permute.xlu0 %1753 }
 0x213   :  { %1913 = vperm.xlu0 %8318, %v567_v42   ;;  %5400 = vmatprep.mubr.bf16.mxu1 %v8530_v41  ;;  %v579_v41 = vld [vmem:[%s12587_s1 + $0x8a0] sm:$0xff]  ;;  %v8548_v42 = vld [vmem:[%s12589_s2 + $0x7ec] ss:$72 sps:$4 sm:$0xff]   ;;  %v2263_v17 = vmul.f32 %v10958_v48, %v247_v3  ;;  %v586_v48 = vld [vmem:[%s12587_s1 + $0x8d8] sm:$0xff] }
 0x214   :  { %v8562_v3 = vld [vmem:[%s12589_s2 + $0x908] ss:$72 sps:$4 sm:$0xff]  }
 0x215   :  { %v10975_v58 = vpop.permute.xlu1 %1768 }
 0x216   :  { %6389 = vmatmul.mubr.bf16.gmra.mrb[88].mxu0 %v8529_v44  ;;  %1928 = vperm.xlu1 %8319, %v570_v45   ;;  %v10977_v59 = vpop.permute.xlu0 %1763  ;;  %v2432_v44 = vpack.c.bf16 %v2258_v32, %v2257_v33  ;;  %v2260_v45 = vmul.f32 %v10915_v27, %v244_v34  ;;  %v582_v27 = vld [vmem:[%s12587_s1 + $0x8b8] sm:$0xff]  ;;  %v252_v33 = vld [vmem:[%s12588_s0 + $0x768] sm:$0xff]  ;;  %v251_v34 = vld [vmem:[%s12588_s0 + $0x760] sm:$0xff] }
 0x217   :  { %1923 = vperm.xlu0 %8318, %v569_v51   ;;  %6396 = vmatprep.mubr.bf16.mxu0 %v8533_v46  ;;  %v2259_v46 = vmul.f32 %v10917_v29, %v243_v36  ;;  %v246_v51 = vld [vmem:[%s12588_s0 + $0x738] sm:$0xff]  ;;  %v2265_v32 = vmul.f32 %v10977_v59, %v249_v19 }
 0x218   :  { %v8556_v36 = vld [vmem:[%s12589_s2 + $0x878] ss:$72 sps:$4 sm:$0xff]  }
 0x219   :  { %v11006_v9 = vpop.permute.xlu1 %1778 }
 0x21a   :  { %5401 = vmatmul.mubr.bf16.gmra.mrb[44].mxu1 %v8532_v52  ;;  %1938 = vperm.xlu1 %8319, %v572_v55   ;;  %v11008_v11 = vpop.permute.xlu0 %1773  ;;  %v245_v52 = vld [vmem:[%s12588_s0 + $0x730] sm:$0xff]  ;;  %v8547_v55 = vld [vmem:[%s12589_s2 + $0xc0] ss:$72 sps:$4 sm:$0xff]  }
 0x21b   :  { %1933 = vperm.xlu0 %8318, %v571_v57   ;;  %5408 = vmatprep.mubr.bf16.mxu1 %v8536_v56  ;;  %v581_v57 = vld [vmem:[%s12587_s1 + $0x8b0] sm:$0xff] }
 0x21d   :  { %v11041_v39 = vpop.permute.xlu1 %1788 }
 0x21e   :  { %6397 = vmatmul.mubr.bf16.gmra.mrb[92].mxu0 %v8535_v60  ;;  %1948 = vperm.xlu1 %8319, %v574_v62   ;;  %v11043_v40 = vpop.permute.xlu0 %1783  ;;  %v8551_v60 = vld [vmem:[%s12589_s2 + $0x154] ss:$72 sps:$4 sm:$0xff]   ;;  %v2433_v62 = vpack.c.bf16 %v2260_v45, %v2259_v46  ;;  %v2267_v45 = vmul.f32 %v11008_v11, %v251_v34 }
 0x21f   :  { %1943 = vperm.xlu0 %8318, %v573_v1   ;;  %6437 = vmatprep.mubr.bf16.mxu0 %v8541_v63  ;;  %v2262_v63 = vmul.f32 %v10931_v37, %v246_v51  ;;  %v2261_v1 = vmul.f32 %v10933_v38, %v245_v52  ;;  %v584_v37 = vld [vmem:[%s12587_s1 + $0x8c8] sm:$0xff]  ;;  %v583_v38 = vld [vmem:[%s12587_s1 + $0x8c0] sm:$0xff]  ;;  %v254_v46 = vld [vmem:[%s12588_s0 + $0x778] sm:$0xff] }
 0x220   :  { %v253_v51 = vld [vmem:[%s12588_s0 + $0x770] sm:$0xff]  ;;  %v8559_v52 = vld [vmem:[%s12589_s2 + $0x1e0] ss:$72 sps:$4 sm:$0xff]  }
 0x221   :  { %v11072_v29 = vpop.permute.xlu1 %1798  ;;  %v589_v11 = vld [vmem:[%s12587_s1 + $0x8f0] sm:$0xff] }
 0x222   :  { %5409 = vmatmul.mubr.bf16.gmra.mrb[48].mxu1 %v8538_v4  ;;  %1958 = vperm.xlu1 %8319, %v576_v5   ;;  %v11074_v56 = vpop.permute.xlu0 %1793  ;;  %v8550_v4 = vld [vmem:[%s12589_s2 + $0x7e8] ss:$72 sps:$4 sm:$0xff]   ;;  %v8554_v5 = vld [vmem:[%s12589_s2 + $0x87c] ss:$72 sps:$4 sm:$0xff]  }
 0x223   :  { %1953 = vperm.xlu0 %8318, %v575_v15   ;;  %5416 = vmatprep.mubr.bf16.mxu1 %v8542_v6  ;;  %v2434_v6 = vpack.c.bf16 %v2262_v63, %v2261_v1  ;;  %v2264_v15 = vmul.f32 %v10956_v47, %v248_v2  ;;  %v8553_v47 = vld [vmem:[%s12589_s2 + $0x150] ss:$72 sps:$4 sm:$0xff]   ;;  %v255_v63 = vld [vmem:[%s12588_s0 + $0x780] sm:$0xff] }
 0x225   :  { %v11112_v22 = vpop.permute.xlu1 %1808 }
 0x226   :  { %6438 = vmatmul.mubr.bf16.vlgmr.msra.gmra.mrb[0].mxu0 %v8539_v23  ;;  %1968 = vperm.xlu1 %8319, %v578_v12   ;;  %v11114_v23 = vpop.permute.xlu0 %1803  ;;  %v585_v12 = vld [vmem:[%s12587_s1 + $0x8d0] sm:$0xff] }
 0x227   :  { %6631 = vmatpush1.bf16.msra.mxu0 %v2431_v26  ;;  %1963 = vperm.xlu0 %8318, %v577_v13   ;;  %v8557_v13 = vld [vmem:[%s12589_s2 + $0x1e4] ss:$72 sps:$4 sm:$0xff]   ;;  %v2266_v26 = vmul.f32 %v10975_v58, %v250_v18 }
 0x228   :  { %6632 = vmatprep.subr.bf16.mxu0 %v8968_v0  ;;  %6445 = vmatprep.mubr.bf16.mxu0 %v8545_v24  ;;  %v2435_v24 = vpack.c.bf16 %v2264_v15, %v2263_v17  ;;  %v588_v58 = vld [vmem:[%s12587_s1 + $0x8e8] sm:$0xff] }
 0x229   :  { %v1819_v59 = vpop.permute.xlu1 %1818 }
 0x22a   :  { %5417 = vmatmul.mubr.bf16.gmra.mrb[52].mxu1 %v8544_v20  ;;  %1978 = vperm.xlu1 %8319, %v580_v21   ;;  %v1814_v20 = vpop.permute.xlu0 %1813  ;;  %v587_v21 = vld [vmem:[%s12587_s1 + $0x8e0] sm:$0xff] }
 0x22b   :  { %6633 = vmatpush1.bf16.msra.mxu0 %v2432_v44  ;;  %1973 = vperm.xlu0 %8318, %v579_v41   ;;  %v8560_v41 = vld [vmem:[%s12589_s2 + $0x90c] ss:$72 sps:$4 sm:$0xff]   ;;  %v2268_v44 = vmul.f32 %v11006_v9, %v252_v33  ;;  %v590_v9 = vld [vmem:[%s12587_s1 + $0x8f8] sm:$0xff] }
 0x22c   :  { %6634 = vmatprep.subr.bf16.mxu0 %v8968_v0  ;;  %5424 = vmatprep.mubr.bf16.mxu1 %v8548_v42  ;;  %v2436_v42 = vpack.c.bf16 %v2266_v26, %v2265_v32  ;;  %v262_v26 = vld [vmem:[%s12588_s0 + $0x7b8] sm:$0xff]  ;;  %v261_v32 = vld [vmem:[%s12588_s0 + $0x7b0] sm:$0xff] }
 0x22d   :  { %v1829_v1 = vpop.permute.xlu1 %1828 }
 0x22e   :  { %6446 = vmatmul.mubr.bf16.gmra.mrb[4].mxu0 %v8547_v55  ;;  %1988 = vperm.xlu1 %8319, %v582_v27   ;;  %v8563_v55 = vld [vmem:[%s12589_s2 + $0x274] ss:$72 sps:$4 sm:$0xff]   ;;  %v2437_v27 = vpack.c.bf16 %v2268_v44, %v2267_v45  ;;  %v1824_v2 = vpop.permute.xlu0 %1823  ;;  %v8574_v44 = vld [vmem:[%s12589_s2 + $0xa28] ss:$72 sps:$4 sm:$0xff]  }
 0x22f   :  { %6635 = vmatpush1.bf16.msra.mxu0 %v2433_v62  ;;  %1983 = vperm.xlu0 %8318, %v581_v57   ;;  %v2270_v57 = vmul.f32 %v11041_v39, %v254_v46  ;;  %v256_v62 = vld [vmem:[%s12588_s0 + $0x788] sm:$0xff]  ;;  %v8566_v39 = vld [vmem:[%s12589_s2 + $0x99c] ss:$72 sps:$4 sm:$0xff]  }
 0x230   :  { %6636 = vmatprep.subr.bf16.mxu0 %v8968_v0  ;;  %6453 = vmatprep.mubr.bf16.mxu0 %v8551_v60  ;;  %v2269_v60 = vmul.f32 %v11043_v40, %v253_v51  ;;  %v8578_v45 = vld [vmem:[%s12589_s2 + $0xabc] ss:$72 sps:$4 sm:$0xff]  }
 0x232   :  { %5425 = vmatmul.mubr.bf16.gmra.mrb[56].mxu1 %v8550_v4  ;;  %1998 = vperm.xlu1 %8319, %v584_v37   ;;  %v2438_v40 = vpack.c.bf16 %v2270_v57, %v2269_v60  ;;  %v2272_v4 = vmul.f32 %v11072_v29, %v256_v62  ;;  %v2271_v37 = vmul.f32 %v11074_v56, %v255_v63  ;;  %v8569_v29 = vld [vmem:[%s12589_s2 + $0x304] ss:$72 sps:$4 sm:$0xff]   ;;  %v1839_v56 = vpop.permute.xlu1 %1838  ;;  %v1834_v15 = vpop.permute.xlu0 %1833  ;;  %v8577_v57 = vld [vmem:[%s12589_s2 + $0x390] ss:$72 sps:$4 sm:$0xff]  }
 0x233   :  { %6637 = vmatpush1.bf16.msra.mxu0 %v2434_v6  ;;  %1993 = vperm.xlu0 %8318, %v583_v38   ;;  %v258_v38 = vld [vmem:[%s12588_s0 + $0x798] sm:$0xff]  ;;  %v8581_v60 = vld [vmem:[%s12589_s2 + $0x424] ss:$72 sps:$4 sm:$0xff]  }
 0x234   :  { %6638 = vmatprep.subr.bf16.mxu0 %v8968_v0  ;;  %5432 = vmatprep.mubr.bf16.mxu1 %v8554_v5  ;;  %v257_v5 = vld [vmem:[%s12588_s0 + $0x790] sm:$0xff]  ;;  %v2439_v17 = vpack.c.bf16 %v2272_v4, %v2271_v37  ;;  %v2274_v18 = vmul.f32 %v11112_v22, %v258_v38  ;;  %v8580_v4 = vld [vmem:[%s12589_s2 + $0xab8] ss:$72 sps:$4 sm:$0xff]  }
 0x235   :  { %v8565_v6 = vld [vmem:[%s12589_s2 + $0x270] ss:$72 sps:$4 sm:$0xff]   ;;  %v2273_v19 = vmul.f32 %v11114_v23, %v257_v5  ;;  %v8572_v22 = vld [vmem:[%s12589_s2 + $0xa2c] ss:$72 sps:$4 sm:$0xff]  }
 0x236   :  { %6454 = vmatmul.mubr.bf16.gmra.mrb[8].mxu0 %v8553_v47  ;;  %2008 = vperm.xlu1 %8319, %v586_v48   ;;  %v260_v47 = vld [vmem:[%s12588_s0 + $0x7a8] sm:$0xff]  ;;  %v259_v48 = vld [vmem:[%s12588_s0 + $0x7a0] sm:$0xff]  ;;  %v1849_v33 = vpop.permute.xlu1 %1848  ;;  %v1844_v34 = vpop.permute.xlu0 %1843 }
 0x237   :  { %6639 = vmatpush1.bf16.msra.mxu0 %v2435_v24  ;;  %2003 = vperm.xlu0 %8318, %v585_v12   ;;  %v8568_v12 = vld [vmem:[%s12589_s2 + $0x998] ss:$72 sps:$4 sm:$0xff]   ;;  %v2440_v23 = vpack.c.bf16 %v2274_v18, %v2273_v19  ;;  %v2275_v24 = vmul.f32 %v1814_v20, %v259_v48  ;;  %v2278_v20 = vmul.f32 %v1829_v1, %v262_v26  ;;  %v8584_v37 = vld [vmem:[%s12589_s2 + $0xb4c] ss:$72 sps:$4 sm:$0xff]  }
 0x238   :  { %6640 = vmatprep.subr.bf16.mxu0 %v8968_v0  ;;  %6461 = vmatprep.mubr.bf16.mxu0 %v8557_v13  ;;  %v2276_v13 = vmul.f32 %v1819_v59, %v260_v47 }
 0x23a   :  { %5433 = vmatmul.mubr.bf16.gmra.mrb[60].mxu1 %v8556_v36  ;;  %2018 = vperm.xlu1 %8319, %v588_v58   ;;  %v8571_v36 = vld [vmem:[%s12589_s2 + $0x300] ss:$72 sps:$4 sm:$0xff]   ;;  %v8575_v58 = vld [vmem:[%s12589_s2 + $0x394] ss:$72 sps:$4 sm:$0xff]   ;;  %v2441_v59 = vpack.c.bf16 %v2276_v13, %v2275_v24  ;;  %v1859_v46 = vpop.permute.xlu1 %1858  ;;  %v1854_v51 = vpop.permute.xlu0 %1853 }
 0x23b   :  { %6641 = vmatpush1.bf16.msra.mxu0 %v2436_v42  ;;  %2013 = vperm.xlu0 %8318, %v587_v21   ;;  %v2277_v21 = vmul.f32 %v1824_v2, %v261_v32  ;;  %v263_v42 = vld [vmem:[%s12588_s0 + $0x7c0] sm:$0xff]  ;;  %v268_v2 = vld [vmem:[%s12588_s0 + $0x7e8] sm:$0xff]  ;;  %v8589_v32 = vld [vmem:[%s12589_s2 + $0x4b0] ss:$72 sps:$4 sm:$0xff]  }
 0x23c   :  { %6642 = vmatprep.subr.bf16.mxu0 %v8968_v0  ;;  %5440 = vmatprep.mubr.bf16.mxu1 %v8560_v41  ;;  %v264_v41 = vld [vmem:[%s12588_s0 + $0x7c8] sm:$0xff]  ;;  %v2284_v5 = vmul.f32 %v1859_v46, %v268_v2  ;;  %v8601_v46 = vld [vmem:[%s12589_s2 + $0x5d0] ss:$72 sps:$4 sm:$0xff]  }
 0x23e   :  { %6462 = vmatmul.mubr.bf16.gmra.mrb[12].mxu0 %v8559_v52  ;;  %2028 = vperm.xlu1 %8319, %v590_v9   ;;  %v2442_v52 = vpack.c.bf16 %v2278_v20, %v2277_v21  ;;  %v2280_v9 = vmul.f32 %v1839_v56, %v264_v41  ;;  %v269_v56 = vld [vmem:[%s12588_s0 + $0x7f0] sm:$0xff]  ;;  %v8595_v20 = vld [vmem:[%s12589_s2 + $0x540] ss:$72 sps:$4 sm:$0xff]  }
 0x23f   :  { %6643 = vmatpush1.bf16.msra.mxu0 %v2437_v27  ;;  %2023 = vperm.xlu0 %8318, %v589_v11   ;;  %v2279_v11 = vmul.f32 %v1834_v15, %v263_v42  ;;  %v265_v27 = vld [vmem:[%s12588_s0 + $0x7d0] sm:$0xff]  ;;  %v8583_v15 = vld [vmem:[%s12589_s2 + $0x420] ss:$72 sps:$4 sm:$0xff]  }
 0x240   :  { %6644 = vmatprep.subr.bf16.mxu0 %v8968_v0  ;;  %6469 = vmatprep.mubr.bf16.mxu0 %v8563_v55  ;;  %v266_v55 = vld [vmem:[%s12588_s0 + $0x7d8] sm:$0xff]  ;;  %v2281_v1 = vmul.f32 %v1844_v34, %v265_v27  ;;  %v112_v27 = vld [vmem:[%s12588_s0 + $0x308] sm:$0xff] }
 0x241   :  { %v2443_v62 = vpack.c.bf16 %v2280_v9, %v2279_v11  ;;  %v2282_v63 = vmul.f32 %v1849_v33, %v266_v55  ;;  %v8593_v33 = vld [vmem:[%s12589_s2 + $0x544] ss:$72 sps:$4 sm:$0xff]   ;;  %v8592_v34 = vld [vmem:[%s12589_s2 + $0xbd8] ss:$72 sps:$4 sm:$0xff]   ;;  %v8599_v21 = vld [vmem:[%s12589_s2 + $0x5d4] ss:$72 sps:$4 sm:$0xff]  }
 0x242   :  { %5441 = vmatmul.mubr.bf16.gmra.mrb[64].mxu1 %v8562_v3  ;;  %v267_v3 = vld [vmem:[%s12588_s0 + $0x7e0] sm:$0xff]  ;;  %v8610_v55 = vld [vmem:[%s12589_s2 + $0x14] ss:$72 sps:$4 sm:$0xff]  }
 0x243   :  { %6645 = vmatpush1.bf16.msra.mxu0 %v2438_v40  ;;  %5448 = vmatprep.mubr.bf16.mxu1 %v8566_v39  ;;  %v1869_v39 = vpop.permute.xlu1 %1868  ;;  %v1864_v40 = vpop.permute.xlu0 %1863  ;;  %v2444_v38 = vpack.c.bf16 %v2282_v63, %v2281_v1  ;;  %v8604_v11 = vld [vmem:[%s12589_s2 + $0xcf8] ss:$72 sps:$4 sm:$0xff]   ;;  %v8611_v1 = vld [vmem:[%s12589_s2 + $0x6f4] ss:$72 sps:$4 sm:$0xff]  }
 0x244   :  { %6646 = vmatprep.subr.bf16.mxu0 %v8968_v0  ;;  %v8607_v63 = vld [vmem:[%s12589_s2 + $0x660] ss:$72 sps:$4 sm:$0xff]  }
 0x246   :  { %6470 = vmatmul.mubr.bf16.gmra.mrb[16].mxu0 %v8565_v6  ;;  %v2283_v6 = vmul.f32 %v1854_v51, %v267_v3  ;;  %v8605_v51 = vld [vmem:[%s12589_s2 + $0x664] ss:$72 sps:$4 sm:$0xff]  }
 0x247   :  { %6647 = vmatpush1.bf16.msra.mxu0 %v2439_v17  ;;  %6477 = vmatprep.mubr.bf16.mxu0 %v8569_v29  ;;  %v270_v29 = vld [vmem:[%s12588_s0 + $0x7f8] sm:$0xff]  ;;  %v1079_v18 = vpop.permute.xlu1 %1078  ;;  %v1074_v19 = vpop.permute.xlu0 %1073 }
 0x248   :  { %6648 = vmatprep.subr.bf16.mxu0 %v8968_v0  ;;  %v8587_v17 = vld [vmem:[%s12589_s2 + $0x4b4] ss:$72 sps:$4 sm:$0xff]   ;;  %v2445_v47 = vpack.c.bf16 %v2284_v5, %v2283_v6  ;;  %v2286_v48 = vmul.f32 %v1869_v39, %v270_v29  ;;  %v2128_v2 = vmul.f32 %v1079_v18, %v112_v27  ;;  %v8613_v18 = vld [vmem:[%s12589_s2 + $0x6f0] ss:$72 sps:$4 sm:$0xff]  }
 0x249   :  { %v114_v39 = vld [vmem:[%s12588_s0 + $0x318] sm:$0xff] }
 0x24a   :  { %5449 = vmatmul.mubr.bf16.gmra.mrb[68].mxu1 %v8568_v12  ;;  %v2285_v12 = vmul.f32 %v1864_v40, %v269_v56  ;;  %v113_v40 = vld [vmem:[%s12588_s0 + $0x310] sm:$0xff] }
 0x24b   :  { %6649 = vmatpush1.bf16.msra.mxu0 %v2440_v23  ;;  %5456 = vmatprep.mubr.bf16.mxu1 %v8572_v22  ;;  %v8586_v22 = vld [vmem:[%s12589_s2 + $0xb48] ss:$72 sps:$4 sm:$0xff]   ;;  %v8590_v23 = vld [vmem:[%s12589_s2 + $0xbdc] ss:$72 sps:$4 sm:$0xff]   ;;  %v1089_v24 = vpop.permute.xlu1 %1088  ;;  %v1084_v26 = vpop.permute.xlu0 %1083 }
 0x24c   :  { %6650 = vmatprep.subr.bf16.mxu0 %v8968_v0  ;;  %v2446_v13 = vpack.c.bf16 %v2286_v48, %v2285_v12  ;;  %v2130_v29 = vmul.f32 %v1089_v24, %v114_v39  ;;  %v2129_v56 = vmul.f32 %v1084_v26, %v113_v40  ;;  %v8616_v26 = vld [vmem:[%s12589_s2 + $0xa0] ss:$72 sps:$4 sm:$0xff]   ;;  %v8625_v39 = vld [vmem:[%s12589_s2 + $0x810] ss:$72 sps:$4 sm:$0xff]  }
 0x24e   :  { %6478 = vmatmul.mubr.bf16.gmra.mrb[20].mxu0 %v8571_v36  ;;  %v8596_v36 = vld [vmem:[%s12589_s2 + $0xc6c] ss:$72 sps:$4 sm:$0xff]  }
 0x24f   :  { %6651 = vmatpush1.bf16.msra.mxu0 %v2441_v59  ;;  %6485 = vmatprep.mubr.bf16.mxu0 %v8575_v58  ;;  %v1099_v58 = vpop.permute.xlu1 %1098  ;;  %v1094_v59 = vpop.permute.xlu0 %1093 }
 0x250   :  { %6652 = vmatprep.subr.bf16.mxu0 %v8968_v0 }
 0x252   :  { %5457 = vmatmul.mubr.bf16.gmra.mrb[72].mxu1 %v8574_v44  ;;  %v8598_v44 = vld [vmem:[%s12589_s2 + $0xc68] ss:$72 sps:$4 sm:$0xff]  }
 0x253   :  { %6653 = vmatpush1.bf16.msra.mxu0 %v2442_v52  ;;  %5464 = vmatprep.mubr.bf16.mxu1 %v8578_v45  ;;  %v1109_v41 = vpop.permute.xlu1 %1108  ;;  %v1104_v42 = vpop.permute.xlu0 %1103  ;;  %v8602_v45 = vld [vmem:[%s12589_s2 + $0xcfc] ss:$72 sps:$4 sm:$0xff]  }
 0x254   :  { %6654 = vmatprep.subr.bf16.mxu0 %v8968_v0 }
 0x256   :  { %6486 = vmatmul.mubr.bf16.gmra.mrb[24].mxu0 %v8577_v57  ;;  %v111_v57 = vld [vmem:[%s12588_s0 + $0x300] sm:$0xff] }
 0x257   :  { %6655 = vmatpush1.bf16.msra.mxu0 %v2443_v62  ;;  %6493 = vmatprep.mubr.bf16.mxu0 %v8581_v60  ;;  %v1119_v52 = vpop.permute.xlu1 %1118  ;;  %v1114_v9 = vpop.permute.xlu0 %1113  ;;  %v2127_v3 = vmul.f32 %v1074_v19, %v111_v57  ;;  %v8617_v19 = vld [vmem:[%s12589_s2 + $0x784] ss:$72 sps:$4 sm:$0xff]  }
 0x258   :  { %6656 = vmatprep.subr.bf16.mxu0 %v8968_v0 }
 0x259   :  { %v2367_v6 = vpack.c.bf16 %v2128_v2, %v2127_v3 }
 0x25a   :  { %5465 = vmatmul.mubr.bf16.gmra.mrb[76].mxu1 %v8580_v4  ;;  %v8608_v4 = vld [vmem:[%s12589_s2 + $0x10] ss:$72 sps:$4 sm:$0xff]  }
 0x25b   :  { %6657 = vmatpush1.bf16.msra.mxu0 %v2444_v38  ;;  %5472 = vmatprep.mubr.bf16.mxu1 %v8584_v37  ;;  %v11331_v60 = vpop.permute.xlu1 %1128  ;;  %v11333_v62 = vpop.permute.xlu0 %1123  ;;  %v8614_v37 = vld [vmem:[%s12589_s2 + $0xa4] ss:$72 sps:$4 sm:$0xff]  }
 0x25c   :  { %6658 = vmatprep.subr.bf16.mxu0 %v8968_v0 }
 0x25e   :  { %6494 = vmatmul.mubr.bf16.gmra.mrb[28].mxu0 %v8583_v15  ;;  %v116_v15 = vld [vmem:[%s12588_s0 + $0x328] sm:$0xff] }
 0x25f   :  { %6659 = vmatpush1.bf16.msra.mxu0 %v2445_v47  ;;  %6501 = vmatprep.mubr.bf16.mxu0 %v8587_v17  ;;  %v11353_v38 = vpop.permute.xlu1 %1138  ;;  %v11355_v5 = vpop.permute.xlu0 %1133  ;;  %v115_v17 = vld [vmem:[%s12588_s0 + $0x320] sm:$0xff]  ;;  %v2368_v47 = vpack.c.bf16 %v2130_v29, %v2129_v56  ;;  %v2132_v48 = vmul.f32 %v1099_v58, %v116_v15  ;;  %v120_v58 = vld [vmem:[%s12588_s0 + $0x348] sm:$0xff] }
 0x260   :  { %6660 = vmatprep.subr.bf16.mxu0 %v8968_v0  ;;  %v2131_v12 = vmul.f32 %v1094_v59, %v115_v17  ;;  %v119_v59 = vld [vmem:[%s12588_s0 + $0x340] sm:$0xff] }
 0x261   :  { %v8628_v29 = vld [vmem:[%s12589_s2 + $0x1c0] ss:$72 sps:$4 sm:$0xff]  }
 0x262   :  { %5473 = vmatmul.mubr.bf16.gmra.mrb[80].mxu1 %v8586_v22  ;;  %v118_v22 = vld [vmem:[%s12588_s0 + $0x338] sm:$0xff] }
 0x263   :  { %6661 = vmatpush1.bf16.msra.mxu0 %v2446_v13  ;;  %5480 = vmatprep.mubr.bf16.mxu1 %v8590_v23  ;;  %v117_v23 = vld [vmem:[%s12588_s0 + $0x330] sm:$0xff]  ;;  %v1149_v13 = vpop.permute.xlu1 %1148  ;;  %v1144_v24 = vpop.permute.xlu0 %1143 }
 0x264   :  { %6855 = vmatprep.subr.bf16.mxu0 %v8968_v0 }
 0x266   :  { %6502 = vmatmul.mubr.bf16.gmra.mrb[32].mxu0 %v8589_v32  ;;  %v8620_v32 = vld [vmem:[%s12589_s2 + $0x134] ss:$72 sps:$4 sm:$0xff]  }
 0x267   :  { %6509 = vmatprep.mubr.bf16.mxu0 %v8593_v33  ;;  %v2369_v33 = vpack.c.bf16 %v2132_v48, %v2131_v12  ;;  %v8631_v48 = vld [vmem:[%s12589_s2 + $0x8a0] ss:$72 sps:$4 sm:$0xff]   ;;  %v8635_v12 = vld [vmem:[%s12589_s2 + $0x934] ss:$72 sps:$4 sm:$0xff]  }
 0x26a   :  { %5481 = vmatmul.mubr.bf16.gmra.mrb[84].mxu1 %v8592_v34  ;;  %v2134_v34 = vmul.f32 %v1109_v41, %v118_v22  ;;  %v1159_v41 = vpop.permute.xlu1 %1158 }
 0x26b   :  { %5488 = vmatprep.mubr.bf16.mxu1 %v8596_v36  ;;  %v2133_v36 = vmul.f32 %v1104_v42, %v117_v23  ;;  %v1154_v42 = vpop.permute.xlu0 %1153 }
 0x26e   :  { %6510 = vmatmul.mubr.bf16.gmra.mrb[36].mxu0 %v8595_v20  ;;  %v8619_v20 = vld [vmem:[%s12589_s2 + $0x780] ss:$72 sps:$4 sm:$0xff]   ;;  %v1169_v2 = vpop.permute.xlu1 %1168 }
 0x26f   :  { %6517 = vmatprep.mubr.bf16.mxu0 %v8599_v21  ;;  %v8623_v21 = vld [vmem:[%s12589_s2 + $0x814] ss:$72 sps:$4 sm:$0xff]   ;;  %v1164_v3 = vpop.permute.xlu0 %1163 }
 0x272   :  { %5489 = vmatmul.mubr.bf16.gmra.mrb[88].mxu1 %v8598_v44  ;;  %v2370_v44 = vpack.c.bf16 %v2134_v34, %v2133_v36  ;;  %v8634_v34 = vld [vmem:[%s12589_s2 + $0x250] ss:$72 sps:$4 sm:$0xff]   ;;  %v8638_v36 = vld [vmem:[%s12589_s2 + $0x2e4] ss:$72 sps:$4 sm:$0xff]  }
 0x273   :  { %5496 = vmatprep.mubr.bf16.mxu1 %v8602_v45  ;;  %v2136_v45 = vmul.f32 %v1119_v52, %v120_v58  ;;  %v8626_v52 = vld [vmem:[%s12589_s2 + $0x1c4] ss:$72 sps:$4 sm:$0xff]   ;;  %v1174_v56 = vpop.permute.xlu0 %1173 }
 0x276   :  { %6518 = vmatmul.mubr.bf16.gmra.mrb[40].mxu0 %v8601_v46  ;;  %v2135_v46 = vmul.f32 %v1114_v9, %v119_v59 }
 0x277   :  { %6525 = vmatprep.mubr.bf16.mxu0 %v8605_v51  ;;  %v122_v51 = vld [vmem:[%s12588_s0 + $0x358] sm:$0xff] }
 0x278   :  { %v2371_v9 = vpack.c.bf16 %v2136_v45, %v2135_v46  ;;  %v2138_v27 = vmul.f32 %v11331_v60, %v122_v51  ;;  %v8629_v60 = vld [vmem:[%s12589_s2 + $0x8a4] ss:$72 sps:$4 sm:$0xff]  }
 0x27a   :  { %5497 = vmatmul.mubr.bf16.gmra.mrb[92].mxu1 %v8604_v11  ;;  %v121_v11 = vld [vmem:[%s12588_s0 + $0x350] sm:$0xff] }
 0x27b   :  { %5537 = vmatprep.mubr.bf16.mxu1 %v8610_v55  ;;  %v8622_v55 = vld [vmem:[%s12589_s2 + $0x130] ss:$72 sps:$4 sm:$0xff]   ;;  %v2137_v57 = vmul.f32 %v11333_v62, %v121_v11 }
 0x27d   :  { %v2372_v62 = vpack.c.bf16 %v2138_v27, %v2137_v57  ;;  %v8640_v27 = vld [vmem:[%s12589_s2 + $0x2e0] ss:$72 sps:$4 sm:$0xff]   ;;  %v8644_v57 = vld [vmem:[%s12589_s2 + $0x374] ss:$72 sps:$4 sm:$0xff]  }
 0x27e   :  { %6526 = vmatmul.mubr.bf16.gmra.mrb[44].mxu0 %v8607_v63  ;;  %v124_v63 = vld [vmem:[%s12588_s0 + $0x368] sm:$0xff] }
 0x27f   :  { %6533 = vmatprep.mubr.bf16.mxu0 %v8611_v1  ;;  %v123_v1 = vld [vmem:[%s12588_s0 + $0x360] sm:$0xff]  ;;  %v2140_v40 = vmul.f32 %v11353_v38, %v124_v63  ;;  %v8632_v38 = vld [vmem:[%s12589_s2 + $0x254] ss:$72 sps:$4 sm:$0xff]  }
 0x282   :  { %5538 = vmatmul.mubr.bf16.vlgmr.msra.gmra.mrb[0].mxu1 %v8608_v4  ;;  %v2139_v4 = vmul.f32 %v11355_v5, %v123_v1  ;;  %v1179_v5 = vpop.permute.xlu1 %1178 }
 0x283   :  { %5731 = vmatpush1.bf16.msra.mxu1 %v2367_v6  ;;  %5545 = vmatprep.mubr.bf16.mxu1 %v8614_v37  ;;  %v126_v37 = vld [vmem:[%s12588_s0 + $0x378] sm:$0xff]  ;;  %v125_v6 = vld [vmem:[%s12588_s0 + $0x370] sm:$0xff] }
 0x284   :  { %5732 = vmatprep.subr.bf16.mxu1 %v8968_v0  ;;  %v2373_v15 = vpack.c.bf16 %v2140_v40, %v2139_v4  ;;  %v2142_v17 = vmul.f32 %v1149_v13, %v126_v37  ;;  %v8643_v40 = vld [vmem:[%s12589_s2 + $0x9c0] ss:$72 sps:$4 sm:$0xff]   ;;  %v8647_v4 = vld [vmem:[%s12589_s2 + $0xa54] ss:$72 sps:$4 sm:$0xff]  }
 0x286   :  { %6534 = vmatmul.mubr.bf16.gmra.mrb[48].mxu0 %v8613_v18  ;;  %v2141_v18 = vmul.f32 %v1144_v24, %v125_v6  ;;  %v130_v24 = vld [vmem:[%s12588_s0 + $0x398] sm:$0xff] }
 0x287   :  { %5733 = vmatpush1.bf16.msra.mxu1 %v2368_v47  ;;  %6541 = vmatprep.mubr.bf16.mxu0 %v8617_v19  ;;  %v128_v19 = vld [vmem:[%s12588_s0 + $0x388] sm:$0xff]  ;;  %v127_v47 = vld [vmem:[%s12588_s0 + $0x380] sm:$0xff]  ;;  %v2146_v59 = vmul.f32 %v1169_v2, %v130_v24 }
 0x288   :  { %5734 = vmatprep.subr.bf16.mxu1 %v8968_v0  ;;  %v2374_v22 = vpack.c.bf16 %v2142_v17, %v2141_v18  ;;  %v2144_v23 = vmul.f32 %v1159_v41, %v128_v19  ;;  %v2143_v13 = vmul.f32 %v1154_v42, %v127_v47  ;;  %v131_v41 = vld [vmem:[%s12588_s0 + $0x3a0] sm:$0xff]  ;;  %v8637_v42 = vld [vmem:[%s12589_s2 + $0x930] ss:$72 sps:$4 sm:$0xff]  }
 0x28a   :  { %5546 = vmatmul.mubr.bf16.gmra.mrb[4].mxu1 %v8616_v26  ;;  %v129_v26 = vld [vmem:[%s12588_s0 + $0x390] sm:$0xff]  ;;  %v2375_v58 = vpack.c.bf16 %v2144_v23, %v2143_v13  ;;  %v8653_v13 = vld [vmem:[%s12589_s2 + $0xae4] ss:$72 sps:$4 sm:$0xff]  }
 0x28b   :  { %5735 = vmatpush1.bf16.msra.mxu1 %v2369_v33  ;;  %5553 = vmatprep.mubr.bf16.mxu1 %v8620_v32  ;;  %v1189_v32 = vpop.permute.xlu1 %1188  ;;  %v1184_v33 = vpop.permute.xlu0 %1183  ;;  %v8649_v23 = vld [vmem:[%s12589_s2 + $0xa50] ss:$72 sps:$4 sm:$0xff]  }
 0x28c   :  { %5736 = vmatprep.subr.bf16.mxu1 %v8968_v0 }
 0x28e   :  { %6542 = vmatmul.mubr.bf16.gmra.mrb[52].mxu0 %v8619_v20  ;;  %v2145_v20 = vmul.f32 %v1164_v3, %v129_v26  ;;  %v136_v3 = vld [vmem:[%s12588_s0 + $0x3c8] sm:$0xff] }
 0x28f   :  { %5737 = vmatpush1.bf16.msra.mxu1 %v2370_v44  ;;  %6549 = vmatprep.mubr.bf16.mxu0 %v8623_v21  ;;  %v132_v21 = vld [vmem:[%s12588_s0 + $0x3a8] sm:$0xff]  ;;  %v1199_v45 = vpop.permute.xlu1 %1198  ;;  %v1194_v46 = vpop.permute.xlu0 %1193 }
 0x290   :  { %5738 = vmatprep.subr.bf16.mxu1 %v8968_v0  ;;  %v8641_v44 = vld [vmem:[%s12589_s2 + $0x9c4] ss:$72 sps:$4 sm:$0xff]   ;;  %v2376_v51 = vpack.c.bf16 %v2146_v59, %v2145_v20  ;;  %v2148_v11 = vmul.f32 %v1179_v5, %v132_v21  ;;  %v2152_v6 = vmul.f32 %v1199_v45, %v136_v3  ;;  %v137_v5 = vld [vmem:[%s12588_s0 + $0x3d0] sm:$0xff]  ;;  %v8652_v59 = vld [vmem:[%s12589_s2 + $0x400] ss:$72 sps:$4 sm:$0xff]  }
 0x291   :  { %v8656_v20 = vld [vmem:[%s12589_s2 + $0x494] ss:$72 sps:$4 sm:$0xff]   ;;  %v8667_v3 = vld [vmem:[%s12589_s2 + $0xc00] ss:$72 sps:$4 sm:$0xff]  }
 0x292   :  { %5554 = vmatmul.mubr.bf16.gmra.mrb[8].mxu1 %v8622_v55  ;;  %v2147_v55 = vmul.f32 %v1174_v56, %v131_v41  ;;  %v8646_v56 = vld [vmem:[%s12589_s2 + $0x370] ss:$72 sps:$4 sm:$0xff]   ;;  %v8659_v45 = vld [vmem:[%s12589_s2 + $0xb74] ss:$72 sps:$4 sm:$0xff]  }
 0x293   :  { %5739 = vmatpush1.bf16.msra.mxu1 %v2371_v9  ;;  %5561 = vmatprep.mubr.bf16.mxu1 %v8626_v52  ;;  %v134_v52 = vld [vmem:[%s12588_s0 + $0x3b8] sm:$0xff]  ;;  %v133_v9 = vld [vmem:[%s12588_s0 + $0x3b0] sm:$0xff] }
 0x294   :  { %5740 = vmatprep.subr.bf16.mxu1 %v8968_v0  ;;  %v2377_v63 = vpack.c.bf16 %v2148_v11, %v2147_v55  ;;  %v2150_v1 = vmul.f32 %v1189_v32, %v134_v52  ;;  %v2149_v2 = vmul.f32 %v1184_v33, %v133_v9  ;;  %v8662_v11 = vld [vmem:[%s12589_s2 + $0x524] ss:$72 sps:$4 sm:$0xff]   ;;  %v8661_v9 = vld [vmem:[%s12589_s2 + $0xb70] ss:$72 sps:$4 sm:$0xff]  }
 0x296   :  { %6550 = vmatmul.mubr.bf16.gmra.mrb[56].mxu0 %v8625_v39  ;;  %v135_v39 = vld [vmem:[%s12588_s0 + $0x3c0] sm:$0xff]  ;;  %v2378_v37 = vpack.c.bf16 %v2150_v1, %v2149_v2  ;;  %v8668_v2 = vld [vmem:[%s12589_s2 + $0x5b4] ss:$72 sps:$4 sm:$0xff]  }
 0x297   :  { %5741 = vmatpush1.bf16.msra.mxu1 %v2372_v62  ;;  %6557 = vmatprep.mubr.bf16.mxu0 %v8629_v60  ;;  %v1209_v60 = vpop.permute.xlu1 %1208  ;;  %v1204_v62 = vpop.permute.xlu0 %1203  ;;  %v8664_v1 = vld [vmem:[%s12589_s2 + $0x520] ss:$72 sps:$4 sm:$0xff]  }
 0x298   :  { %5742 = vmatprep.subr.bf16.mxu1 %v8968_v0 }
 0x29a   :  { %5562 = vmatmul.mubr.bf16.gmra.mrb[12].mxu1 %v8628_v29  ;;  %v2151_v29 = vmul.f32 %v1194_v46, %v135_v39  ;;  %v8671_v39 = vld [vmem:[%s12589_s2 + $0xc94] ss:$72 sps:$4 sm:$0xff]  }
 0x29b   :  { %5743 = vmatpush1.bf16.msra.mxu1 %v2373_v15  ;;  %5569 = vmatprep.mubr.bf16.mxu1 %v8632_v38  ;;  %v138_v38 = vld [vmem:[%s12588_s0 + $0x3d8] sm:$0xff]  ;;  %v8650_v15 = vld [vmem:[%s12589_s2 + $0x404] ss:$72 sps:$4 sm:$0xff]   ;;  %v1219_v17 = vpop.permute.xlu1 %1218  ;;  %v1214_v18 = vpop.permute.xlu0 %1213 }
 0x29c   :  { %5744 = vmatprep.subr.bf16.mxu1 %v8968_v0  ;;  %v2379_v19 = vpack.c.bf16 %v2152_v6, %v2151_v29  ;;  %v2154_v47 = vmul.f32 %v1209_v60, %v138_v38  ;;  %v8673_v29 = vld [vmem:[%s12589_s2 + $0xc90] ss:$72 sps:$4 sm:$0xff]   ;;  %v8677_v38 = vld [vmem:[%s12589_s2 + $0xd24] ss:$72 sps:$4 sm:$0xff]  }
 0x29e   :  { %6558 = vmatmul.mubr.bf16.gmra.mrb[60].mxu0 %v8631_v48  ;;  %v2153_v48 = vmul.f32 %v1204_v62, %v137_v5  ;;  %v8676_v5 = vld [vmem:[%s12589_s2 + $0x640] ss:$72 sps:$4 sm:$0xff]  }
 0x29f   :  { %5745 = vmatpush1.bf16.msra.mxu1 %v2374_v22  ;;  %6565 = vmatprep.mubr.bf16.mxu0 %v8635_v12  ;;  %v140_v12 = vld [vmem:[%s12588_s0 + $0x3e8] sm:$0xff]  ;;  %v139_v22 = vld [vmem:[%s12588_s0 + $0x3e0] sm:$0xff]  ;;  %v1229_v33 = vpop.permute.xlu1 %1228 }
 0x2a0   :  { %5746 = vmatprep.subr.bf16.mxu1 %v8968_v0  ;;  %v2380_v24 = vpack.c.bf16 %v2154_v47, %v2153_v48  ;;  %v2156_v26 = vmul.f32 %v1219_v17, %v140_v12  ;;  %v2155_v32 = vmul.f32 %v1214_v18, %v139_v22  ;;  %v8679_v18 = vld [vmem:[%s12589_s2 + $0xd20] ss:$72 sps:$4 sm:$0xff]  }
 0x2a1   :  { %v272_v47 = vld [vmem:[%s12588_s0 + $0x808] sm:$0xff]  ;;  %v271_v48 = vld [vmem:[%s12588_s0 + $0x800] sm:$0xff] }
 0x2a2   :  { %5570 = vmatmul.mubr.bf16.gmra.mrb[16].mxu1 %v8634_v34  ;;  %v142_v34 = vld [vmem:[%s12588_s0 + $0x3f8] sm:$0xff]  ;;  %v2381_v21 = vpack.c.bf16 %v2156_v26, %v2155_v32 }
 0x2a3   :  { %5747 = vmatpush1.bf16.msra.mxu1 %v2375_v58  ;;  %5577 = vmatprep.mubr.bf16.mxu1 %v8638_v36  ;;  %v1224_v36 = vpop.permute.xlu0 %1223  ;;  %v141_v58 = vld [vmem:[%s12588_s0 + $0x3f0] sm:$0xff]  ;;  %v2158_v41 = vmul.f32 %v1229_v33, %v142_v34  ;;  %v1879_v55 = vpop.permute.xlu1 %1878  ;;  %v274_v32 = vld [vmem:[%s12588_s0 + $0x818] sm:$0xff] }
 0x2a4   :  { %5748 = vmatprep.subr.bf16.mxu1 %v8968_v0  ;;  %v273_v33 = vld [vmem:[%s12588_s0 + $0x810] sm:$0xff]  ;;  %v8683_v34 = vld [vmem:[%s12589_s2 + $0x38] ss:$72 sps:$4 sm:$0xff]  }
 0x2a6   :  { %6566 = vmatmul.mubr.bf16.gmra.mrb[64].mxu0 %v8637_v42  ;;  %v2157_v42 = vmul.f32 %v1224_v36, %v141_v58  ;;  %v8689_v36 = vld [vmem:[%s12589_s2 + $0xcc] ss:$72 sps:$4 sm:$0xff]  }
 0x2a7   :  { %5749 = vmatpush1.bf16.msra.mxu1 %v2376_v51  ;;  %6573 = vmatprep.mubr.bf16.mxu0 %v8641_v44  ;;  %v8655_v44 = vld [vmem:[%s12589_s2 + $0xae0] ss:$72 sps:$4 sm:$0xff]   ;;  %v8658_v51 = vld [vmem:[%s12589_s2 + $0x490] ss:$72 sps:$4 sm:$0xff]   ;;  %v1874_v52 = vpop.permute.xlu0 %1873 }
 0x2a8   :  { %5750 = vmatprep.subr.bf16.mxu1 %v8968_v0  ;;  %v2382_v46 = vpack.c.bf16 %v2158_v41, %v2157_v42  ;;  %v2287_v26 = vmul.f32 %v1874_v52, %v271_v48  ;;  %v276_v42 = vld [vmem:[%s12588_s0 + $0x828] sm:$0xff]  ;;  %v278_v52 = vld [vmem:[%s12588_s0 + $0x838] sm:$0xff] }
 0x2aa   :  { %5578 = vmatmul.mubr.bf16.gmra.mrb[20].mxu1 %v8640_v27  ;;  %v8665_v27 = vld [vmem:[%s12589_s2 + $0xc04] ss:$72 sps:$4 sm:$0xff]  }
 0x2ab   :  { %5751 = vmatpush1.bf16.msra.mxu1 %v2377_v63  ;;  %5585 = vmatprep.mubr.bf16.mxu1 %v8644_v57  ;;  %v1889_v57 = vpop.permute.xlu1 %1888  ;;  %v1884_v63 = vpop.permute.xlu0 %1883 }
 0x2ac   :  { %5752 = vmatprep.subr.bf16.mxu1 %v8968_v0  ;;  %v2289_v41 = vmul.f32 %v1884_v63, %v273_v33  ;;  %v8691_v63 = vld [vmem:[%s12589_s2 + $0xc8] ss:$72 sps:$4 sm:$0xff]  }
 0x2ae   :  { %6574 = vmatmul.mubr.bf16.gmra.mrb[68].mxu0 %v8643_v40  ;;  %v8670_v40 = vld [vmem:[%s12589_s2 + $0x5b0] ss:$72 sps:$4 sm:$0xff]  }
 0x2af   :  { %5753 = vmatpush1.bf16.msra.mxu1 %v2378_v37  ;;  %6581 = vmatprep.mubr.bf16.mxu0 %v8647_v4  ;;  %v1899_v60 = vpop.permute.xlu1 %1898  ;;  %v1894_v62 = vpop.permute.xlu0 %1893  ;;  %v8674_v4 = vld [vmem:[%s12589_s2 + $0x644] ss:$72 sps:$4 sm:$0xff]  }
 0x2b0   :  { %5754 = vmatprep.subr.bf16.mxu1 %v8968_v0 }
 0x2b2   :  { %5586 = vmatmul.mubr.bf16.gmra.mrb[24].mxu1 %v8646_v56  ;;  %v8680_v56 = vld [vmem:[%s12589_s2 + $0x6d4] ss:$72 sps:$4 sm:$0xff]  }
 0x2b3   :  { %5755 = vmatpush1.bf16.msra.mxu1 %v2379_v19  ;;  %5593 = vmatprep.mubr.bf16.mxu1 %v8650_v15  ;;  %v1909_v37 = vpop.permute.xlu1 %1908  ;;  %v1904_v6 = vpop.permute.xlu0 %1903  ;;  %v8685_v19 = vld [vmem:[%s12589_s2 + $0x3c] ss:$72 sps:$4 sm:$0xff]  }
 0x2b4   :  { %5756 = vmatprep.subr.bf16.mxu1 %v8968_v0 }
 0x2b6   :  { %6582 = vmatmul.mubr.bf16.gmra.mrb[72].mxu0 %v8649_v23  ;;  %v8682_v23 = vld [vmem:[%s12589_s2 + $0x6d0] ss:$72 sps:$4 sm:$0xff]  }
 0x2b7   :  { %5757 = vmatpush1.bf16.msra.mxu1 %v2380_v24  ;;  %6589 = vmatprep.mubr.bf16.mxu0 %v8653_v13  ;;  %v1919_v15 = vpop.permute.xlu1 %1918  ;;  %v1914_v17 = vpop.permute.xlu0 %1913  ;;  %v8686_v13 = vld [vmem:[%s12589_s2 + $0x764] ss:$72 sps:$4 sm:$0xff]   ;;  %v2288_v24 = vmul.f32 %v1879_v55, %v272_v47 }
 0x2b8   :  { %5758 = vmatprep.subr.bf16.mxu1 %v8968_v0 }
 0x2ba   :  { %5594 = vmatmul.mubr.bf16.gmra.mrb[28].mxu1 %v8652_v59 }
 0x2bb   :  { %5759 = vmatpush1.bf16.msra.mxu1 %v2381_v21  ;;  %5601 = vmatprep.mubr.bf16.mxu1 %v8656_v20  ;;  %v11605_v12 = vpop.permute.xlu1 %1928  ;;  %v11607_v22 = vpop.permute.xlu0 %1923  ;;  %v2447_v20 = vpack.c.bf16 %v2288_v24, %v2287_v26  ;;  %v2290_v21 = vmul.f32 %v1889_v57, %v274_v32  ;;  %v8700_v32 = vld [vmem:[%s12589_s2 + $0x880] ss:$72 sps:$4 sm:$0xff]  }
 0x2bc   :  { %5760 = vmatprep.subr.bf16.mxu1 %v8968_v0 }
 0x2be   :  { %6590 = vmatmul.mubr.bf16.gmra.mrb[76].mxu0 %v8655_v44  ;;  %v275_v44 = vld [vmem:[%s12588_s0 + $0x820] sm:$0xff] }
 0x2bf   :  { %5761 = vmatpush1.bf16.msra.mxu1 %v2382_v46  ;;  %6597 = vmatprep.mubr.bf16.mxu0 %v8659_v45  ;;  %v11627_v58 = vpop.permute.xlu1 %1938  ;;  %v11629_v59 = vpop.permute.xlu0 %1933  ;;  %v8688_v45 = vld [vmem:[%s12589_s2 + $0x760] ss:$72 sps:$4 sm:$0xff]   ;;  %v8692_v46 = vld [vmem:[%s12589_s2 + $0x7f4] ss:$72 sps:$4 sm:$0xff]   ;;  %v2291_v55 = vmul.f32 %v1894_v62, %v275_v44 }
 0x2c0   :  { %7565 = vmatprep.subr.bf16.mxu1 %v8968_v0  ;;  %v279_v62 = vld [vmem:[%s12588_s0 + $0x840] sm:$0xff] }
 0x2c2   :  { %5602 = vmatmul.mubr.bf16.gmra.mrb[32].mxu1 %v8658_v51  ;;  %v2448_v51 = vpack.c.bf16 %v2290_v21, %v2289_v41  ;;  %v8703_v21 = vld [vmem:[%s12589_s2 + $0x1e8] ss:$72 sps:$4 sm:$0xff]  }
 0x2c3   :  { %5609 = vmatprep.mubr.bf16.mxu1 %v8662_v11  ;;  %v2292_v11 = vmul.f32 %v1899_v60, %v276_v42  ;;  %v1944_v57 = vpop.permute.xlu0 %1943  ;;  %v280_v60 = vld [vmem:[%s12588_s0 + $0x848] sm:$0xff] }
 0x2c6   :  { %6598 = vmatmul.mubr.bf16.gmra.mrb[80].mxu0 %v8661_v9  ;;  %v277_v9 = vld [vmem:[%s12588_s0 + $0x830] sm:$0xff] }
 0x2c7   :  { %6605 = vmatprep.mubr.bf16.mxu0 %v8665_v27  ;;  %v1949_v27 = vpop.permute.xlu1 %1948 }
 0x2ca   :  { %5610 = vmatmul.mubr.bf16.gmra.mrb[36].mxu1 %v8664_v1  ;;  %v8695_v1 = vld [vmem:[%s12589_s2 + $0x15c] ss:$72 sps:$4 sm:$0xff]  }
 0x2cb   :  { %5617 = vmatprep.mubr.bf16.mxu1 %v8668_v2  ;;  %v2449_v2 = vpack.c.bf16 %v2292_v11, %v2291_v55  ;;  %v8706_v11 = vld [vmem:[%s12589_s2 + $0x910] ss:$72 sps:$4 sm:$0xff]   ;;  %v8710_v55 = vld [vmem:[%s12589_s2 + $0x9a4] ss:$72 sps:$4 sm:$0xff]  }
 0x2ce   :  { %6606 = vmatmul.mubr.bf16.gmra.mrb[84].mxu0 %v8667_v3  ;;  %v2294_v3 = vmul.f32 %v1909_v37, %v278_v52  ;;  %v1959_v37 = vpop.permute.xlu1 %1958 }
 0x2cf   :  { %6613 = vmatprep.mubr.bf16.mxu0 %v8671_v39  ;;  %v2293_v39 = vmul.f32 %v1904_v6, %v277_v9  ;;  %v1954_v6 = vpop.permute.xlu0 %1953 }
 0x2d2   :  { %5618 = vmatmul.mubr.bf16.gmra.mrb[40].mxu1 %v8670_v40  ;;  %v8694_v40 = vld [vmem:[%s12589_s2 + $0x7f0] ss:$72 sps:$4 sm:$0xff]   ;;  %v1969_v24 = vpop.permute.xlu1 %1968 }
 0x2d3   :  { %5625 = vmatprep.mubr.bf16.mxu1 %v8674_v4  ;;  %v8698_v4 = vld [vmem:[%s12589_s2 + $0x884] ss:$72 sps:$4 sm:$0xff]   ;;  %v1964_v26 = vpop.permute.xlu0 %1963 }
 0x2d6   :  { %6614 = vmatmul.mubr.bf16.gmra.mrb[88].mxu0 %v8673_v29  ;;  %v2450_v29 = vpack.c.bf16 %v2294_v3, %v2293_v39  ;;  %v8709_v3 = vld [vmem:[%s12589_s2 + $0x278] ss:$72 sps:$4 sm:$0xff]   ;;  %v8713_v39 = vld [vmem:[%s12589_s2 + $0x30c] ss:$72 sps:$4 sm:$0xff]  }
 0x2d7   :  { %6621 = vmatprep.mubr.bf16.mxu0 %v8677_v38  ;;  %v2296_v38 = vmul.f32 %v1919_v15, %v280_v60  ;;  %v8701_v15 = vld [vmem:[%s12589_s2 + $0x1ec] ss:$72 sps:$4 sm:$0xff]   ;;  %v1974_v41 = vpop.permute.xlu0 %1973 }
 0x2da   :  { %5626 = vmatmul.mubr.bf16.gmra.mrb[44].mxu1 %v8676_v5  ;;  %v2295_v5 = vmul.f32 %v1914_v17, %v279_v62 }
 0x2db   :  { %5633 = vmatprep.mubr.bf16.mxu1 %v8680_v56  ;;  %v282_v56 = vld [vmem:[%s12588_s0 + $0x858] sm:$0xff] }
 0x2dc   :  { %v2451_v17 = vpack.c.bf16 %v2296_v38, %v2295_v5  ;;  %v2298_v47 = vmul.f32 %v11605_v12, %v282_v56  ;;  %v8704_v12 = vld [vmem:[%s12589_s2 + $0x914] ss:$72 sps:$4 sm:$0xff]  }
 0x2de   :  { %6622 = vmatmul.mubr.bf16.gmra.mrb[92].mxu0 %v8679_v18  ;;  %v281_v18 = vld [vmem:[%s12588_s0 + $0x850] sm:$0xff] }
 0x2df   :  { %6662 = vmatprep.mubr.bf16.mxu0 %v8685_v19  ;;  %v8697_v19 = vld [vmem:[%s12589_s2 + $0x158] ss:$72 sps:$4 sm:$0xff]   ;;  %v2297_v48 = vmul.f32 %v11607_v22, %v281_v18 }
 0x2e1   :  { %v2452_v22 = vpack.c.bf16 %v2298_v47, %v2297_v48  ;;  %v8715_v47 = vld [vmem:[%s12589_s2 + $0x308] ss:$72 sps:$4 sm:$0xff]   ;;  %v8719_v48 = vld [vmem:[%s12589_s2 + $0x39c] ss:$72 sps:$4 sm:$0xff]  }
 0x2e2   :  { %5634 = vmatmul.mubr.bf16.gmra.mrb[48].mxu1 %v8682_v23  ;;  %v284_v23 = vld [vmem:[%s12588_s0 + $0x868] sm:$0xff] }
 0x2e3   :  { %5641 = vmatprep.mubr.bf16.mxu1 %v8686_v13  ;;  %v283_v13 = vld [vmem:[%s12588_s0 + $0x860] sm:$0xff]  ;;  %v2300_v33 = vmul.f32 %v11627_v58, %v284_v23 }
 0x2e4   :  { %v8707_v58 = vld [vmem:[%s12589_s2 + $0x27c] ss:$72 sps:$4 sm:$0xff]  }
 0x2e6   :  { %6663 = vmatmul.mubr.bf16.vlgmr.msra.gmra.mrb[0].mxu0 %v8683_v34  ;;  %v2299_v34 = vmul.f32 %v11629_v59, %v283_v13  ;;  %v1979_v59 = vpop.permute.xlu1 %1978 }
 0x2e7   :  { %6856 = vmatpush1.bf16.msra.mxu0 %v2447_v20  ;;  %6670 = vmatprep.mubr.bf16.mxu0 %v8689_v36  ;;  %v286_v36 = vld [vmem:[%s12588_s0 + $0x878] sm:$0xff]  ;;  %v285_v20 = vld [vmem:[%s12588_s0 + $0x870] sm:$0xff] }
 0x2e8   :  { %6857 = vmatprep.subr.bf16.mxu0 %v8968_v0  ;;  %v2453_v42 = vpack.c.bf16 %v2300_v33, %v2299_v34  ;;  %v2302_v44 = vmul.f32 %v1949_v27, %v286_v36  ;;  %v8718_v33 = vld [vmem:[%s12589_s2 + $0xa30] ss:$72 sps:$4 sm:$0xff]   ;;  %v8722_v34 = vld [vmem:[%s12589_s2 + $0xac4] ss:$72 sps:$4 sm:$0xff]  }
 0x2ea   :  { %5642 = vmatmul.mubr.bf16.gmra.mrb[52].mxu1 %v8688_v45  ;;  %v2301_v45 = vmul.f32 %v1944_v57, %v285_v20  ;;  %v290_v57 = vld [vmem:[%s12588_s0 + $0x898] sm:$0xff] }
 0x2eb   :  { %6858 = vmatpush1.bf16.msra.mxu0 %v2448_v51  ;;  %5649 = vmatprep.mubr.bf16.mxu1 %v8692_v46  ;;  %v288_v46 = vld [vmem:[%s12588_s0 + $0x888] sm:$0xff]  ;;  %v287_v51 = vld [vmem:[%s12588_s0 + $0x880] sm:$0xff]  ;;  %v2306_v62 = vmul.f32 %v1969_v24, %v290_v57 }
 0x2ec   :  { %6859 = vmatprep.subr.bf16.mxu0 %v8968_v0  ;;  %v2454_v52 = vpack.c.bf16 %v2302_v44, %v2301_v45  ;;  %v2304_v9 = vmul.f32 %v1959_v37, %v288_v46  ;;  %v2303_v27 = vmul.f32 %v1954_v6, %v287_v51  ;;  %v291_v37 = vld [vmem:[%s12588_s0 + $0x8a0] sm:$0xff] }
 0x2ed   :  { %v8712_v6 = vld [vmem:[%s12589_s2 + $0x9a0] ss:$72 sps:$4 sm:$0xff]  }
 0x2ee   :  { %6671 = vmatmul.mubr.bf16.gmra.mrb[4].mxu0 %v8691_v63  ;;  %v289_v63 = vld [vmem:[%s12588_s0 + $0x890] sm:$0xff]  ;;  %v2455_v60 = vpack.c.bf16 %v2304_v9, %v2303_v27  ;;  %v8724_v9 = vld [vmem:[%s12589_s2 + $0xac0] ss:$72 sps:$4 sm:$0xff]  }
 0x2ef   :  { %6860 = vmatpush1.bf16.msra.mxu0 %v2449_v2  ;;  %6678 = vmatprep.mubr.bf16.mxu0 %v8695_v1  ;;  %v1989_v1 = vpop.permute.xlu1 %1988  ;;  %v1984_v2 = vpop.permute.xlu0 %1983  ;;  %v8728_v27 = vld [vmem:[%s12589_s2 + $0xb54] ss:$72 sps:$4 sm:$0xff]  }
 0x2f0   :  { %6861 = vmatprep.subr.bf16.mxu0 %v8968_v0 }
 0x2f2   :  { %5650 = vmatmul.mubr.bf16.gmra.mrb[56].mxu1 %v8694_v40  ;;  %v2305_v40 = vmul.f32 %v1964_v26, %v289_v63  ;;  %v296_v26 = vld [vmem:[%s12588_s0 + $0x8c8] sm:$0xff] }
 0x2f3   :  { %6862 = vmatpush1.bf16.msra.mxu0 %v2450_v29  ;;  %5657 = vmatprep.mubr.bf16.mxu1 %v8698_v4  ;;  %v292_v4 = vld [vmem:[%s12588_s0 + $0x8a8] sm:$0xff]  ;;  %v8716_v29 = vld [vmem:[%s12589_s2 + $0xa34] ss:$72 sps:$4 sm:$0xff]   ;;  %v1999_v38 = vpop.permute.xlu1 %1998  ;;  %v1994_v5 = vpop.permute.xlu0 %1993 }
 0x2f4   :  { %6863 = vmatprep.subr.bf16.mxu0 %v8968_v0  ;;  %v2456_v56 = vpack.c.bf16 %v2306_v62, %v2305_v40  ;;  %v2308_v18 = vmul.f32 %v1979_v59, %v292_v4  ;;  %v2312_v20 = vmul.f32 %v1999_v38, %v296_v26  ;;  %v297_v59 = vld [vmem:[%s12588_s0 + $0x8d0] sm:$0xff]  ;;  %v8731_v40 = vld [vmem:[%s12589_s2 + $0x4bc] ss:$72 sps:$4 sm:$0xff]   ;;  %v8748_v26 = vld [vmem:[%s12589_s2 + $0xd00] ss:$72 sps:$4 sm:$0xff]  }
 0x2f5   :  { %v8727_v62 = vld [vmem:[%s12589_s2 + $0x428] ss:$72 sps:$4 sm:$0xff]   ;;  %v8734_v38 = vld [vmem:[%s12589_s2 + $0xbe4] ss:$72 sps:$4 sm:$0xff]  }
 0x2f6   :  { %6679 = vmatmul.mubr.bf16.gmra.mrb[8].mxu0 %v8697_v19  ;;  %v2307_v19 = vmul.f32 %v1974_v41, %v291_v37  ;;  %v8721_v41 = vld [vmem:[%s12589_s2 + $0x398] ss:$72 sps:$4 sm:$0xff]  }
 0x2f7   :  { %6864 = vmatpush1.bf16.msra.mxu0 %v2451_v17  ;;  %6686 = vmatprep.mubr.bf16.mxu0 %v8701_v15  ;;  %v294_v15 = vld [vmem:[%s12588_s0 + $0x8b8] sm:$0xff]  ;;  %v293_v17 = vld [vmem:[%s12588_s0 + $0x8b0] sm:$0xff] }
 0x2f8   :  { %6865 = vmatprep.subr.bf16.mxu0 %v8968_v0  ;;  %v2457_v23 = vpack.c.bf16 %v2308_v18, %v2307_v19  ;;  %v2310_v13 = vmul.f32 %v1989_v1, %v294_v15  ;;  %v2309_v24 = vmul.f32 %v1984_v2, %v293_v17  ;;  %v8737_v18 = vld [vmem:[%s12589_s2 + $0x54c] ss:$72 sps:$4 sm:$0xff]   ;;  %v8736_v19 = vld [vmem:[%s12589_s2 + $0xbe0] ss:$72 sps:$4 sm:$0xff]  }
 0x2f9   :  { %v8740_v15 = vld [vmem:[%s12589_s2 + $0xc74] ss:$72 sps:$4 sm:$0xff]   ;;  %v8739_v17 = vld [vmem:[%s12589_s2 + $0x548] ss:$72 sps:$4 sm:$0xff]  }
 0x2fa   :  { %5658 = vmatmul.mubr.bf16.gmra.mrb[60].mxu1 %v8700_v32  ;;  %v295_v32 = vld [vmem:[%s12588_s0 + $0x8c0] sm:$0xff]  ;;  %v2458_v36 = vpack.c.bf16 %v2310_v13, %v2309_v24  ;;  %v8749_v24 = vld [vmem:[%s12589_s2 + $0x66c] ss:$72 sps:$4 sm:$0xff]  }
 0x2fb   :  { %6866 = vmatpush1.bf16.msra.mxu0 %v2452_v22  ;;  %5665 = vmatprep.mubr.bf16.mxu1 %v8704_v12  ;;  %v2009_v12 = vpop.permute.xlu1 %2008  ;;  %v2004_v22 = vpop.permute.xlu0 %2003  ;;  %v8745_v13 = vld [vmem:[%s12589_s2 + $0x5d8] ss:$72 sps:$4 sm:$0xff]  }
 0x2fc   :  { %6867 = vmatprep.subr.bf16.mxu0 %v8968_v0 }
 0x2fe   :  { %6687 = vmatmul.mubr.bf16.gmra.mrb[12].mxu0 %v8703_v21  ;;  %v2311_v21 = vmul.f32 %v1994_v5, %v295_v32  ;;  %v8754_v32 = vld [vmem:[%s12589_s2 + $0x1c] ss:$72 sps:$4 sm:$0xff]  }
 0x2ff   :  { %6868 = vmatpush1.bf16.msra.mxu0 %v2453_v42  ;;  %6694 = vmatprep.mubr.bf16.mxu0 %v8707_v58  ;;  %v298_v58 = vld [vmem:[%s12588_s0 + $0x8d8] sm:$0xff]  ;;  %v8725_v42 = vld [vmem:[%s12589_s2 + $0x42c] ss:$72 sps:$4 sm:$0xff]   ;;  %v2019_v44 = vpop.permute.xlu1 %2018  ;;  %v2014_v45 = vpop.permute.xlu0 %2013 }
 0x300   :  { %6869 = vmatprep.subr.bf16.mxu0 %v8968_v0  ;;  %v2459_v46 = vpack.c.bf16 %v2312_v20, %v2311_v21  ;;  %v2314_v51 = vmul.f32 %v2009_v12, %v298_v58  ;;  %v8751_v12 = vld [vmem:[%s12589_s2 + $0x668] ss:$72 sps:$4 sm:$0xff]   ;;  %v8761_v20 = vld [vmem:[%s12589_s2 + $0x78c] ss:$72 sps:$4 sm:$0xff]   ;;  %v8764_v58 = vld [vmem:[%s12589_s2 + $0x13c] ss:$72 sps:$4 sm:$0xff]  }
 0x301   :  { %v8760_v21 = vld [vmem:[%s12589_s2 + $0xa8] ss:$72 sps:$4 sm:$0xff]  }
 0x302   :  { %5666 = vmatmul.mubr.bf16.gmra.mrb[64].mxu1 %v8706_v11  ;;  %v2313_v11 = vmul.f32 %v2004_v22, %v297_v59  ;;  %v8755_v22 = vld [vmem:[%s12589_s2 + $0x6fc] ss:$72 sps:$4 sm:$0xff]  }
 0x303   :  { %6870 = vmatpush1.bf16.msra.mxu0 %v2454_v52  ;;  %5673 = vmatprep.mubr.bf16.mxu1 %v8710_v55  ;;  %v300_v55 = vld [vmem:[%s12588_s0 + $0x8e8] sm:$0xff]  ;;  %v299_v52 = vld [vmem:[%s12588_s0 + $0x8e0] sm:$0xff]  ;;  %v2029_v2 = vpop.permute.xlu1 %2028 }
 0x304   :  { %6871 = vmatprep.subr.bf16.mxu0 %v8968_v0  ;;  %v2460_v57 = vpack.c.bf16 %v2314_v51, %v2313_v11  ;;  %v2316_v63 = vmul.f32 %v2019_v44, %v300_v55  ;;  %v2315_v1 = vmul.f32 %v2014_v45, %v299_v52  ;;  %v8767_v59 = vld [vmem:[%s12589_s2 + $0x81c] ss:$72 sps:$4 sm:$0xff]   ;;  %v8785_v51 = vld [vmem:[%s12589_s2 + $0x9cc] ss:$72 sps:$4 sm:$0xff]  }
 0x305   :  { %v8776_v44 = vld [vmem:[%s12589_s2 + $0x25c] ss:$72 sps:$4 sm:$0xff]   ;;  %v8794_v52 = vld [vmem:[%s12589_s2 + $0x40c] ss:$72 sps:$4 sm:$0xff]  }
 0x306   :  { %6695 = vmatmul.mubr.bf16.gmra.mrb[16].mxu0 %v8709_v3  ;;  %v302_v3 = vld [vmem:[%s12588_s0 + $0x8f8] sm:$0xff]  ;;  %v2461_v4 = vpack.c.bf16 %v2316_v63, %v2315_v1  ;;  %v8806_v63 = vld [vmem:[%s12589_s2 + $0x52c] ss:$72 sps:$4 sm:$0xff]  }
 0x307   :  { %6872 = vmatpush1.bf16.msra.mxu0 %v2455_v60  ;;  %6702 = vmatprep.mubr.bf16.mxu0 %v8713_v39  ;;  %v2024_v39 = vpop.permute.xlu0 %2023  ;;  %v301_v60 = vld [vmem:[%s12588_s0 + $0x8f0] sm:$0xff]  ;;  %v2318_v37 = vmul.f32 %v2029_v2, %v302_v3  ;;  %v8779_v45 = vld [vmem:[%s12589_s2 + $0x93c] ss:$72 sps:$4 sm:$0xff]  }
 0x308   :  { %6873 = vmatprep.subr.bf16.mxu0 %v8968_v0  ;;  %v8788_v11 = vld [vmem:[%s12589_s2 + $0x37c] ss:$72 sps:$4 sm:$0xff]   ;;  %v8811_v2 = vld [vmem:[%s12589_s2 + $0xc08] ss:$72 sps:$4 sm:$0xff]  }
 0x309   :  { %v8791_v55 = vld [vmem:[%s12589_s2 + $0xa5c] ss:$72 sps:$4 sm:$0xff]  }
 0x30a   :  { %5674 = vmatmul.mubr.bf16.gmra.mrb[68].mxu1 %v8712_v6  ;;  %v2317_v6 = vmul.f32 %v2024_v39, %v301_v60  ;;  %v8812_v1 = vld [vmem:[%s12589_s2 + $0x5bc] ss:$72 sps:$4 sm:$0xff]   ;;  %v8814_v39 = vld [vmem:[%s12589_s2 + $0x5b8] ss:$72 sps:$4 sm:$0xff]   ;;  %v8818_v60 = vld [vmem:[%s12589_s2 + $0x64c] ss:$72 sps:$4 sm:$0xff]  }
 0x30b   :  { %6874 = vmatpush1.bf16.msra.mxu0 %v2456_v56  ;;  %5681 = vmatprep.mubr.bf16.mxu1 %v8716_v29  ;;  %v8730_v29 = vld [vmem:[%s12589_s2 + $0xb50] ss:$72 sps:$4 sm:$0xff]   ;;  %v8815_v3 = vld [vmem:[%s12589_s2 + $0xc9c] ss:$72 sps:$4 sm:$0xff]  }
 0x30c   :  { %6875 = vmatprep.subr.bf16.mxu0 %v8968_v0  ;;  %v2462_v5 = vpack.c.bf16 %v2318_v37, %v2317_v6  ;;  %v8733_v56 = vld [vmem:[%s12589_s2 + $0x4b8] ss:$72 sps:$4 sm:$0xff]   ;;  %v8824_v37 = vld [vmem:[%s12589_s2 + $0x6dc] ss:$72 sps:$4 sm:$0xff]   ;;  %v8823_v6 = vld [vmem:[%s12589_s2 + $0xd28] ss:$72 sps:$4 sm:$0xff]  }
 0x30e   :  { %6703 = vmatmul.mubr.bf16.gmra.mrb[20].mxu0 %v8715_v47  ;;  %v8743_v47 = vld [vmem:[%s12589_s2 + $0x5dc] ss:$72 sps:$4 sm:$0xff]  }
 0x30f   :  { %6876 = vmatpush1.bf16.msra.mxu0 %v2457_v23  ;;  %6710 = vmatprep.mubr.bf16.mxu0 %v8719_v48  ;;  %v8742_v48 = vld [vmem:[%s12589_s2 + $0xc70] ss:$72 sps:$4 sm:$0xff]   ;;  %v8746_v23 = vld [vmem:[%s12589_s2 + $0xd04] ss:$72 sps:$4 sm:$0xff]  }
 0x310   :  { %6877 = vmatprep.subr.bf16.mxu0 %v8968_v0 }
 0x312   :  { %5682 = vmatmul.mubr.bf16.gmra.mrb[72].mxu1 %v8718_v33  ;;  %v8752_v33 = vld [vmem:[%s12589_s2 + $0x18] ss:$72 sps:$4 sm:$0xff]  }
 0x313   :  { %6878 = vmatpush1.bf16.msra.mxu0 %v2458_v36  ;;  %5689 = vmatprep.mubr.bf16.mxu1 %v8722_v34  ;;  %v8758_v34 = vld [vmem:[%s12589_s2 + $0xac] ss:$72 sps:$4 sm:$0xff]   ;;  %v8757_v36 = vld [vmem:[%s12589_s2 + $0x6f8] ss:$72 sps:$4 sm:$0xff]  }
 0x314   :  { %6879 = vmatprep.subr.bf16.mxu0 %v8968_v0 }
 0x316   :  { %6711 = vmatmul.mubr.bf16.gmra.mrb[24].mxu0 %v8721_v41  ;;  %v8770_v41 = vld [vmem:[%s12589_s2 + $0x1cc] ss:$72 sps:$4 sm:$0xff]  }
 0x317   :  { %6880 = vmatpush1.bf16.msra.mxu0 %v2459_v46  ;;  %6718 = vmatprep.mubr.bf16.mxu0 %v8725_v42  ;;  %v8773_v42 = vld [vmem:[%s12589_s2 + $0x8ac] ss:$72 sps:$4 sm:$0xff]  }
 0x318   :  { %6881 = vmatprep.subr.bf16.mxu0 %v8968_v0  ;;  %v8782_v46 = vld [vmem:[%s12589_s2 + $0x2ec] ss:$72 sps:$4 sm:$0xff]  }
 0x31a   :  { %5690 = vmatmul.mubr.bf16.gmra.mrb[76].mxu1 %v8724_v9  ;;  %v8797_v9 = vld [vmem:[%s12589_s2 + $0xaec] ss:$72 sps:$4 sm:$0xff]  }
 0x31b   :  { %6882 = vmatpush1.bf16.msra.mxu0 %v2460_v57  ;;  %5697 = vmatprep.mubr.bf16.mxu1 %v8728_v27  ;;  %v8800_v27 = vld [vmem:[%s12589_s2 + $0x49c] ss:$72 sps:$4 sm:$0xff]  }
 0x31c   :  { %6883 = vmatprep.subr.bf16.mxu0 %v8968_v0  ;;  %v8803_v57 = vld [vmem:[%s12589_s2 + $0xb7c] ss:$72 sps:$4 sm:$0xff]  }
 0x31e   :  { %6719 = vmatmul.mubr.bf16.gmra.mrb[28].mxu0 %v8727_v62  ;;  %v8817_v62 = vld [vmem:[%s12589_s2 + $0xc98] ss:$72 sps:$4 sm:$0xff]  }
 0x31f   :  { %6884 = vmatpush1.bf16.msra.mxu0 %v2461_v4  ;;  %6726 = vmatprep.mubr.bf16.mxu0 %v8731_v40  ;;  %v8821_v40 = vld [vmem:[%s12589_s2 + $0xd2c] ss:$72 sps:$4 sm:$0xff]   ;;  %v8820_v4 = vld [vmem:[%s12589_s2 + $0x648] ss:$72 sps:$4 sm:$0xff]  }
 0x320   :  { %6885 = vmatprep.subr.bf16.mxu0 %v8968_v0 }
 0x322   :  { %5698 = vmatmul.mubr.bf16.gmra.mrb[80].mxu1 %v8730_v29  ;;  %v8829_v29 = vld [vmem:[%s12589_s2 + $0x44] ss:$72 sps:$4 sm:$0xff]  }
 0x323   :  { %6886 = vmatpush1.bf16.msra.mxu0 %v2462_v5  ;;  %5705 = vmatprep.mubr.bf16.mxu1 %v8734_v38  ;;  %v8826_v38 = vld [vmem:[%s12589_s2 + $0x6d8] ss:$72 sps:$4 sm:$0xff]   ;;  %v8830_v5 = vld [vmem:[%s12589_s2 + $0x76c] ss:$72 sps:$4 sm:$0xff]  }
 0x326   :  { %6727 = vmatmul.mubr.bf16.gmra.mrb[32].mxu0 %v8733_v56  ;;  %v8827_v56 = vld [vmem:[%s12589_s2 + $0x40] ss:$72 sps:$4 sm:$0xff]  }
 0x327   :  { %6734 = vmatprep.mubr.bf16.mxu0 %v8737_v18  ;;  %v8833_v18 = vld [vmem:[%s12589_s2 + $0xd4] ss:$72 sps:$4 sm:$0xff]  }
 0x32a   :  { %5706 = vmatmul.mubr.bf16.gmra.mrb[84].mxu1 %v8736_v19  ;;  %v8832_v19 = vld [vmem:[%s12589_s2 + $0x768] ss:$72 sps:$4 sm:$0xff]  }
 0x32b   :  { %5713 = vmatprep.mubr.bf16.mxu1 %v8740_v15  ;;  %v8836_v15 = vld [vmem:[%s12589_s2 + $0x7fc] ss:$72 sps:$4 sm:$0xff]  }
 0x32e   :  { %6735 = vmatmul.mubr.bf16.gmra.mrb[36].mxu0 %v8739_v17  ;;  %v8835_v17 = vld [vmem:[%s12589_s2 + $0xd0] ss:$72 sps:$4 sm:$0xff]  }
 0x32f   :  { %6742 = vmatprep.mubr.bf16.mxu0 %v8743_v47  ;;  %v8839_v47 = vld [vmem:[%s12589_s2 + $0x164] ss:$72 sps:$4 sm:$0xff]  }
 0x332   :  { %5714 = vmatmul.mubr.bf16.gmra.mrb[88].mxu1 %v8742_v48  ;;  %v8838_v48 = vld [vmem:[%s12589_s2 + $0x7f8] ss:$72 sps:$4 sm:$0xff]  }
 0x333   :  { %5721 = vmatprep.mubr.bf16.mxu1 %v8746_v23  ;;  %v8842_v23 = vld [vmem:[%s12589_s2 + $0x88c] ss:$72 sps:$4 sm:$0xff]  }
 0x336   :  { %6743 = vmatmul.mubr.bf16.gmra.mrb[40].mxu0 %v8745_v13  ;;  %v8841_v13 = vld [vmem:[%s12589_s2 + $0x160] ss:$72 sps:$4 sm:$0xff]  }
 0x337   :  { %6750 = vmatprep.mubr.bf16.mxu0 %v8749_v24  ;;  %v8845_v24 = vld [vmem:[%s12589_s2 + $0x1f4] ss:$72 sps:$4 sm:$0xff]  }
 0x33a   :  { %5722 = vmatmul.mubr.bf16.gmra.mrb[92].mxu1 %v8748_v26  ;;  %v8844_v26 = vld [vmem:[%s12589_s2 + $0x888] ss:$72 sps:$4 sm:$0xff]  }
 0x33b   :  { %5762 = vmatprep.mubr.bf16.mxu1 %v8754_v32  ;;  %v8848_v32 = vld [vmem:[%s12589_s2 + $0x91c] ss:$72 sps:$4 sm:$0xff]  }
 0x33e   :  { %6751 = vmatmul.mubr.bf16.gmra.mrb[44].mxu0 %v8751_v12  ;;  %v8847_v12 = vld [vmem:[%s12589_s2 + $0x1f0] ss:$72 sps:$4 sm:$0xff]  }
 0x33f   :  { %6758 = vmatprep.mubr.bf16.mxu0 %v8755_v22  ;;  %v8851_v22 = vld [vmem:[%s12589_s2 + $0x284] ss:$72 sps:$4 sm:$0xff]  }
 0x342   :  { %5763 = vmatmul.mubr.bf16.vlgmr.msra.gmra.mrb[0].mxu1 %v8752_v33  ;;  %v8850_v33 = vld [vmem:[%s12589_s2 + $0x918] ss:$72 sps:$4 sm:$0xff]  }
 0x343   :  { %7581 = vmatpush1.bf16.msra.mxu1 %v9227_v25  ;;  %5770 = vmatprep.mubr.bf16.mxu1 %v8758_v34  ;;  %v8763_v25 = vld [vmem:[%s12589_s2 + $0x788] ss:$72 sps:$4 sm:$0xff]   ;;  %v8854_v34 = vld [vmem:[%s12589_s2 + $0x9ac] ss:$72 sps:$4 sm:$0xff]  }
 0x344   :  { %7566 = vmatprep.subr.bf16.mxu1 %v8968_v0 }
 0x346   :  { %6759 = vmatmul.mubr.bf16.gmra.mrb[48].mxu0 %v8757_v36  ;;  %v8853_v36 = vld [vmem:[%s12589_s2 + $0x280] ss:$72 sps:$4 sm:$0xff]  }
 0x347   :  { %7582 = vmatpush1.bf16.msra.mxu1 %v9256_v43  ;;  %6766 = vmatprep.mubr.bf16.mxu0 %v8761_v20  ;;  %v8766_v43 = vld [vmem:[%s12589_s2 + $0x138] ss:$72 sps:$4 sm:$0xff]   ;;  %v8857_v20 = vld [vmem:[%s12589_s2 + $0x314] ss:$72 sps:$4 sm:$0xff]  }
 0x348   :  { %7567 = vmatprep.subr.bf16.mxu1 %v8968_v0 }
 0x34a   :  { %5771 = vmatmul.mubr.bf16.gmra.mrb[4].mxu1 %v8760_v21  ;;  %v8856_v21 = vld [vmem:[%s12589_s2 + $0x9a8] ss:$72 sps:$4 sm:$0xff]  }
 0x34b   :  { %7583 = vmatpush1.bf16.msra.mxu1 %v9285_v61  ;;  %5778 = vmatprep.mubr.bf16.mxu1 %v8764_v58  ;;  %v8769_v61 = vld [vmem:[%s12589_s2 + $0x818] ss:$72 sps:$4 sm:$0xff]   ;;  %v8860_v58 = vld [vmem:[%s12589_s2 + $0xa3c] ss:$72 sps:$4 sm:$0xff]  }
 0x34c   :  { %7568 = vmatprep.subr.bf16.mxu1 %v8968_v0 }
 0x34e   :  { %6767 = vmatmul.mubr.bf16.gmra.mrb[52].mxu0 %v8763_v25  ;;  %v8859_v25 = vld [vmem:[%s12589_s2 + $0x310] ss:$72 sps:$4 sm:$0xff]  }
 0x34f   :  { %7584 = vmatpush1.bf16.msra.mxu1 %v9314_v16  ;;  %6774 = vmatprep.mubr.bf16.mxu0 %v8767_v59  ;;  %v8772_v16 = vld [vmem:[%s12589_s2 + $0x1c8] ss:$72 sps:$4 sm:$0xff]   ;;  %v8863_v59 = vld [vmem:[%s12589_s2 + $0x3a4] ss:$72 sps:$4 sm:$0xff]  }
 0x350   :  { %7569 = vmatprep.subr.bf16.mxu1 %v8968_v0 }
 0x352   :  { %5779 = vmatmul.mubr.bf16.gmra.mrb[8].mxu1 %v8766_v43  ;;  %v8862_v43 = vld [vmem:[%s12589_s2 + $0xa38] ss:$72 sps:$4 sm:$0xff]  }
 0x353   :  { %7585 = vmatpush1.bf16.msra.mxu1 %v9343_v35  ;;  %5786 = vmatprep.mubr.bf16.mxu1 %v8770_v41  ;;  %v8775_v35 = vld [vmem:[%s12589_s2 + $0x8a8] ss:$72 sps:$4 sm:$0xff]   ;;  %v8866_v41 = vld [vmem:[%s12589_s2 + $0xacc] ss:$72 sps:$4 sm:$0xff]  }
 0x354   :  { %7570 = vmatprep.subr.bf16.mxu1 %v8968_v0 }
 0x356   :  { %6775 = vmatmul.mubr.bf16.gmra.mrb[56].mxu0 %v8769_v61  ;;  %v8865_v61 = vld [vmem:[%s12589_s2 + $0x3a0] ss:$72 sps:$4 sm:$0xff]  }
 0x357   :  { %7586 = vmatpush1.bf16.msra.mxu1 %v9372_v54  ;;  %6782 = vmatprep.mubr.bf16.mxu0 %v8773_v42  ;;  %v8778_v54 = vld [vmem:[%s12589_s2 + $0x258] ss:$72 sps:$4 sm:$0xff]   ;;  %v8869_v42 = vld [vmem:[%s12589_s2 + $0x434] ss:$72 sps:$4 sm:$0xff]  }
 0x358   :  { %7571 = vmatprep.subr.bf16.mxu1 %v8968_v0 }
 0x35a   :  { %5787 = vmatmul.mubr.bf16.gmra.mrb[12].mxu1 %v8772_v16  ;;  %v8868_v16 = vld [vmem:[%s12589_s2 + $0xac8] ss:$72 sps:$4 sm:$0xff]  }
 0x35b   :  { %7587 = vmatpush1.bf16.msra.mxu1 %v9401_v10  ;;  %5794 = vmatprep.mubr.bf16.mxu1 %v8776_v44  ;;  %v8781_v10 = vld [vmem:[%s12589_s2 + $0x938] ss:$72 sps:$4 sm:$0xff]   ;;  %v8872_v44 = vld [vmem:[%s12589_s2 + $0xb5c] ss:$72 sps:$4 sm:$0xff]  }
 0x35c   :  { %7572 = vmatprep.subr.bf16.mxu1 %v8968_v0 }
 0x35e   :  { %6783 = vmatmul.mubr.bf16.gmra.mrb[60].mxu0 %v8775_v35  ;;  %v8871_v35 = vld [vmem:[%s12589_s2 + $0x430] ss:$72 sps:$4 sm:$0xff]  }
 0x35f   :  { %7588 = vmatpush1.bf16.msra.mxu1 %v9430_v30  ;;  %6790 = vmatprep.mubr.bf16.mxu0 %v8779_v45  ;;  %v8784_v30 = vld [vmem:[%s12589_s2 + $0x2e8] ss:$72 sps:$4 sm:$0xff]   ;;  %v8875_v45 = vld [vmem:[%s12589_s2 + $0x4c4] ss:$72 sps:$4 sm:$0xff]  }
 0x360   :  { %7573 = vmatprep.subr.bf16.mxu1 %v8968_v0 }
 0x362   :  { %5795 = vmatmul.mubr.bf16.gmra.mrb[16].mxu1 %v8778_v54  ;;  %v8874_v54 = vld [vmem:[%s12589_s2 + $0xb58] ss:$72 sps:$4 sm:$0xff]  }
 0x363   :  { %7589 = vmatpush1.bf16.msra.mxu1 %v9459_v50  ;;  %5802 = vmatprep.mubr.bf16.mxu1 %v8782_v46  ;;  %v8787_v50 = vld [vmem:[%s12589_s2 + $0x9c8] ss:$72 sps:$4 sm:$0xff]   ;;  %v8878_v46 = vld [vmem:[%s12589_s2 + $0xbec] ss:$72 sps:$4 sm:$0xff]  }
 0x364   :  { %7574 = vmatprep.subr.bf16.mxu1 %v8968_v0 }
 0x366   :  { %6791 = vmatmul.mubr.bf16.gmra.mrb[64].mxu0 %v8781_v10  ;;  %v8877_v10 = vld [vmem:[%s12589_s2 + $0x4c0] ss:$72 sps:$4 sm:$0xff]  }
 0x367   :  { %7590 = vmatpush1.bf16.msra.mxu1 %v9488_v7  ;;  %6798 = vmatprep.mubr.bf16.mxu0 %v8785_v51  ;;  %v8790_v7 = vld [vmem:[%s12589_s2 + $0x378] ss:$72 sps:$4 sm:$0xff]   ;;  %v8881_v51 = vld [vmem:[%s12589_s2 + $0x554] ss:$72 sps:$4 sm:$0xff]  }
 0x368   :  { %7575 = vmatprep.subr.bf16.mxu1 %v8968_v0 }
 0x36a   :  { %5803 = vmatmul.mubr.bf16.gmra.mrb[20].mxu1 %v8784_v30  ;;  %v8880_v30 = vld [vmem:[%s12589_s2 + $0xbe8] ss:$72 sps:$4 sm:$0xff]  }
 0x36b   :  { %7591 = vmatpush1.bf16.msra.mxu1 %v9517_v28  ;;  %5810 = vmatprep.mubr.bf16.mxu1 %v8788_v11  ;;  %v8793_v28 = vld [vmem:[%s12589_s2 + $0xa58] ss:$72 sps:$4 sm:$0xff]   ;;  %v8884_v11 = vld [vmem:[%s12589_s2 + $0xc7c] ss:$72 sps:$4 sm:$0xff]  }
 0x36c   :  { %7576 = vmatprep.subr.bf16.mxu1 %v8968_v0 }
 0x36e   :  { %6799 = vmatmul.mubr.bf16.gmra.mrb[68].mxu0 %v8787_v50  ;;  %v8883_v50 = vld [vmem:[%s12589_s2 + $0x550] ss:$72 sps:$4 sm:$0xff]  }
 0x36f   :  { %7592 = vmatpush1.bf16.msra.mxu1 %v9546_v49  ;;  %6806 = vmatprep.mubr.bf16.mxu0 %v8791_v55  ;;  %v8796_v49 = vld [vmem:[%s12589_s2 + $0x408] ss:$72 sps:$4 sm:$0xff]   ;;  %v8887_v55 = vld [vmem:[%s12589_s2 + $0x5e4] ss:$72 sps:$4 sm:$0xff]  }
 0x370   :  { %7577 = vmatprep.subr.bf16.mxu1 %v8968_v0 }
 0x372   :  { %5811 = vmatmul.mubr.bf16.gmra.mrb[24].mxu1 %v8790_v7  ;;  %v8886_v7 = vld [vmem:[%s12589_s2 + $0xc78] ss:$72 sps:$4 sm:$0xff]  }
 0x373   :  { %7593 = vmatpush1.bf16.msra.mxu1 %v9575_v8  ;;  %5818 = vmatprep.mubr.bf16.mxu1 %v8794_v52  ;;  %v8799_v8 = vld [vmem:[%s12589_s2 + $0xae8] ss:$72 sps:$4 sm:$0xff]   ;;  %v8890_v52 = vld [vmem:[%s12589_s2 + $0xd0c] ss:$72 sps:$4 sm:$0xff]  }
 0x374   :  { %7578 = vmatprep.subr.bf16.mxu1 %v8968_v0 }
 0x376   :  { %6807 = vmatmul.mubr.bf16.gmra.mrb[72].mxu0 %v8793_v28  ;;  %v8889_v28 = vld [vmem:[%s12589_s2 + $0x5e0] ss:$72 sps:$4 sm:$0xff]  }
 0x377   :  { %7594 = vmatpush1.bf16.msra.mxu1 %v9604_v31  ;;  %6814 = vmatprep.mubr.bf16.mxu0 %v8797_v9  ;;  %v8802_v31 = vld [vmem:[%s12589_s2 + $0x498] ss:$72 sps:$4 sm:$0xff]   ;;  %v8893_v9 = vld [vmem:[%s12589_s2 + $0x674] ss:$72 sps:$4 sm:$0xff]  }
 0x378   :  { %7579 = vmatprep.subr.bf16.mxu1 %v8968_v0 }
 0x37a   :  { %5819 = vmatmul.mubr.bf16.gmra.mrb[28].mxu1 %v8796_v49  ;;  %v8892_v49 = vld [vmem:[%s12589_s2 + $0xd08] ss:$72 sps:$4 sm:$0xff]  }
 0x37b   :  { %7595 = vmatpush1.bf16.msra.mxu1 %v9633_v53  ;;  %5826 = vmatprep.mubr.bf16.mxu1 %v8800_v27  ;;  %v8805_v53 = vld [vmem:[%s12589_s2 + $0xb78] ss:$72 sps:$4 sm:$0xff]   ;;  %v8898_v27 = vld [vmem:[%s12589_s2 + $0x6e4] ss:$72 sps:$4 sm:$0xff]  }
 0x37c   :  { %7580 = vmatprep.subr.bf16.mxu1 %v8968_v0  ;;  %v8809_v0 = vld [vmem:[%s12589_s2 + $0xc0c] ss:$72 sps:$4 sm:$0xff]  }
 0x37e   :  { %6815 = vmatmul.mubr.bf16.gmra.mrb[76].mxu0 %v8799_v8  ;;  %v8895_v8 = vld [vmem:[%s12589_s2 + $0x670] ss:$72 sps:$4 sm:$0xff]  }
 0x37f   :  { %7596 = vmatpush1.bf16.msra.mxu1 %v9665_v14  ;;  %6822 = vmatprep.mubr.bf16.mxu0 %v8803_v57  ;;  %v8808_v14 = vld [vmem:[%s12589_s2 + $0x528] ss:$72 sps:$4 sm:$0xff]   ;;  %v8899_v57 = vld [vmem:[%s12589_s2 + $0x704] ss:$72 sps:$4 sm:$0xff]  }
 0x382   :  { %5827 = vmatmul.mubr.bf16.gmra.mrb[32].mxu1 %v8802_v31  ;;  %v8896_v31 = vld [vmem:[%s12589_s2 + $0x6e0] ss:$72 sps:$4 sm:$0xff]  }
 0x383   :  { %5834 = vmatprep.mubr.bf16.mxu1 %v8806_v63  ;;  %v8902_v63 = vld [vmem:[%s12589_s2 + $0x774] ss:$72 sps:$4 sm:$0xff]  }
 0x386   :  { %6823 = vmatmul.mubr.bf16.gmra.mrb[80].mxu0 %v8805_v53  ;;  %v8901_v53 = vld [vmem:[%s12589_s2 + $0x700] ss:$72 sps:$4 sm:$0xff]  }
 0x387   :  { %6830 = vmatprep.mubr.bf16.mxu0 %v8809_v0  ;;  %v8905_v0 = vld [vmem:[%s12589_s2 + $0x794] ss:$72 sps:$4 sm:$0xff]  }
 0x38a   :  { %5835 = vmatmul.mubr.bf16.gmra.mrb[36].mxu1 %v8808_v14  ;;  %v8904_v14 = vld [vmem:[%s12589_s2 + $0x770] ss:$72 sps:$4 sm:$0xff]  }
 0x38b   :  { %5842 = vmatprep.mubr.bf16.mxu1 %v8812_v1  ;;  %v8908_v1 = vld [vmem:[%s12589_s2 + $0x804] ss:$72 sps:$4 sm:$0xff]  }
 0x38e   :  { %6831 = vmatmul.mubr.bf16.gmra.mrb[84].mxu0 %v8811_v2  ;;  %v8907_v2 = vld [vmem:[%s12589_s2 + $0x790] ss:$72 sps:$4 sm:$0xff]  }
 0x38f   :  { %6838 = vmatprep.mubr.bf16.mxu0 %v8815_v3  ;;  %v8911_v3 = vld [vmem:[%s12589_s2 + $0x824] ss:$72 sps:$4 sm:$0xff]  }
 0x392   :  { %5843 = vmatmul.mubr.bf16.gmra.mrb[40].mxu1 %v8814_v39  ;;  %v8910_v39 = vld [vmem:[%s12589_s2 + $0x800] ss:$72 sps:$4 sm:$0xff]  }
 0x393   :  { %5850 = vmatprep.mubr.bf16.mxu1 %v8818_v60  ;;  %v8914_v60 = vld [vmem:[%s12589_s2 + $0x894] ss:$72 sps:$4 sm:$0xff]  }
 0x396   :  { %6839 = vmatmul.mubr.bf16.gmra.mrb[88].mxu0 %v8817_v62  ;;  %v8913_v62 = vld [vmem:[%s12589_s2 + $0x820] ss:$72 sps:$4 sm:$0xff]  }
 0x397   :  { %6846 = vmatprep.mubr.bf16.mxu0 %v8821_v40  ;;  %v8917_v40 = vld [vmem:[%s12589_s2 + $0x8b4] ss:$72 sps:$4 sm:$0xff]  }
 0x39a   :  { %5851 = vmatmul.mubr.bf16.gmra.mrb[44].mxu1 %v8820_v4 }
 0x39b   :  { %5858 = vmatprep.mubr.bf16.mxu1 %v8824_v37 }
 0x39e   :  { %6847 = vmatmul.mubr.bf16.gmra.mrb[92].mxu0 %v8823_v6  ;;  %v8916_v6 = vld [vmem:[%s12589_s2 + $0x890] ss:$72 sps:$4 sm:$0xff]  }
 0x39f   :  { %6887 = vmatprep.mubr.bf16.mxu0 %v8829_v29 }
 0x3a2   :  { %5859 = vmatmul.mubr.bf16.gmra.mrb[48].mxu1 %v8826_v38  ;;  %v8920_v38 = vld [vmem:[%s12589_s2 + $0x924] ss:$72 sps:$4 sm:$0xff]  }
 0x3a3   :  { %5866 = vmatprep.mubr.bf16.mxu1 %v8830_v5 }
 0x3a6   :  { %6888 = vmatmul.mubr.bf16.vlgmr.msra.gmra.mrb[0].mxu0 %v8827_v56  ;;  %v8919_v56 = vld [vmem:[%s12589_s2 + $0x8b0] ss:$72 sps:$4 sm:$0xff]  }
 0x3a7   :  { %6895 = vmatprep.mubr.bf16.mxu0 %v8833_v18  ;;  %v8923_v18 = vld [vmem:[%s12589_s2 + $0x944] ss:$72 sps:$4 sm:$0xff]  }
 0x3aa   :  { %5867 = vmatmul.mubr.bf16.gmra.mrb[52].mxu1 %v8832_v19 }
 0x3ab   :  { %5874 = vmatprep.mubr.bf16.mxu1 %v8836_v15 }
 0x3ae   :  { %6896 = vmatmul.mubr.bf16.gmra.mrb[4].mxu0 %v8835_v17  ;;  %v8922_v17 = vld [vmem:[%s12589_s2 + $0x920] ss:$72 sps:$4 sm:$0xff]  }
 0x3af   :  { %6903 = vmatprep.mubr.bf16.mxu0 %v8839_v47 }
 0x3b2   :  { %5875 = vmatmul.mubr.bf16.gmra.mrb[56].mxu1 %v8838_v48  ;;  %v8926_v48 = vld [vmem:[%s12589_s2 + $0x9b4] ss:$72 sps:$4 sm:$0xff]  }
 0x3b3   :  { %5882 = vmatprep.mubr.bf16.mxu1 %v8842_v23 }
 0x3b6   :  { %6904 = vmatmul.mubr.bf16.gmra.mrb[8].mxu0 %v8841_v13  ;;  %v8925_v13 = vld [vmem:[%s12589_s2 + $0x940] ss:$72 sps:$4 sm:$0xff]  }
 0x3b7   :  { %6911 = vmatprep.mubr.bf16.mxu0 %v8845_v24  ;;  %v8929_v24 = vld [vmem:[%s12589_s2 + $0x9d4] ss:$72 sps:$4 sm:$0xff]  }
 0x3ba   :  { %5883 = vmatmul.mubr.bf16.gmra.mrb[60].mxu1 %v8844_v26 }
 0x3bb   :  { %5890 = vmatprep.mubr.bf16.mxu1 %v8848_v32 }
 0x3be   :  { %6912 = vmatmul.mubr.bf16.gmra.mrb[12].mxu0 %v8847_v12  ;;  %v8928_v12 = vld [vmem:[%s12589_s2 + $0x9b0] ss:$72 sps:$4 sm:$0xff]  }
 0x3bf   :  { %6919 = vmatprep.mubr.bf16.mxu0 %v8851_v22 }
 0x3c2   :  { %5891 = vmatmul.mubr.bf16.gmra.mrb[64].mxu1 %v8850_v33  ;;  %v8932_v33 = vld [vmem:[%s12589_s2 + $0xa44] ss:$72 sps:$4 sm:$0xff]  }
 0x3c3   :  { %5898 = vmatprep.mubr.bf16.mxu1 %v8854_v34 }
 0x3c6   :  { %6920 = vmatmul.mubr.bf16.gmra.mrb[16].mxu0 %v8853_v36  ;;  %v8931_v36 = vld [vmem:[%s12589_s2 + $0x9d0] ss:$72 sps:$4 sm:$0xff]  }
 0x3c7   :  { %6927 = vmatprep.mubr.bf16.mxu0 %v8857_v20  ;;  %v8935_v20 = vld [vmem:[%s12589_s2 + $0xa64] ss:$72 sps:$4 sm:$0xff]  }
 0x3ca   :  { %5899 = vmatmul.mubr.bf16.gmra.mrb[68].mxu1 %v8856_v21 }
 0x3cb   :  { %5906 = vmatprep.mubr.bf16.mxu1 %v8860_v58 }
 0x3ce   :  { %6928 = vmatmul.mubr.bf16.gmra.mrb[20].mxu0 %v8859_v25  ;;  %v8934_v25 = vld [vmem:[%s12589_s2 + $0xa40] ss:$72 sps:$4 sm:$0xff]  }
 0x3cf   :  { %6935 = vmatprep.mubr.bf16.mxu0 %v8863_v59 }
 0x3d2   :  { %5907 = vmatmul.mubr.bf16.gmra.mrb[72].mxu1 %v8862_v43  ;;  %v8938_v43 = vld [vmem:[%s12589_s2 + $0xad4] ss:$72 sps:$4 sm:$0xff]  }
 0x3d3   :  { %5914 = vmatprep.mubr.bf16.mxu1 %v8866_v41 }
 0x3d6   :  { %6936 = vmatmul.mubr.bf16.gmra.mrb[24].mxu0 %v8865_v61  ;;  %v8937_v61 = vld [vmem:[%s12589_s2 + $0xa60] ss:$72 sps:$4 sm:$0xff]  }
 0x3d7   :  { %6943 = vmatprep.mubr.bf16.mxu0 %v8869_v42  ;;  %v8941_v42 = vld [vmem:[%s12589_s2 + $0xaf4] ss:$72 sps:$4 sm:$0xff]  }
 0x3da   :  { %5915 = vmatmul.mubr.bf16.gmra.mrb[76].mxu1 %v8868_v16 }
 0x3db   :  { %5922 = vmatprep.mubr.bf16.mxu1 %v8872_v44 }
 0x3de   :  { %6944 = vmatmul.mubr.bf16.gmra.mrb[28].mxu0 %v8871_v35  ;;  %v8940_v35 = vld [vmem:[%s12589_s2 + $0xad0] ss:$72 sps:$4 sm:$0xff]  }
 0x3df   :  { %6951 = vmatprep.mubr.bf16.mxu0 %v8875_v45 }
 0x3e2   :  { %5923 = vmatmul.mubr.bf16.gmra.mrb[80].mxu1 %v8874_v54  ;;  %v8944_v54 = vld [vmem:[%s12589_s2 + $0xb64] ss:$72 sps:$4 sm:$0xff]  }
 0x3e3   :  { %5930 = vmatprep.mubr.bf16.mxu1 %v8878_v46 }
 0x3e6   :  { %6952 = vmatmul.mubr.bf16.gmra.mrb[32].mxu0 %v8877_v10  ;;  %v8943_v10 = vld [vmem:[%s12589_s2 + $0xaf0] ss:$72 sps:$4 sm:$0xff]  }
 0x3e7   :  { %6959 = vmatprep.mubr.bf16.mxu0 %v8881_v51  ;;  %v8947_v51 = vld [vmem:[%s12589_s2 + $0xb84] ss:$72 sps:$4 sm:$0xff]  }
 0x3ea   :  { %5931 = vmatmul.mubr.bf16.gmra.mrb[84].mxu1 %v8880_v30 }
 0x3eb   :  { %5938 = vmatprep.mubr.bf16.mxu1 %v8884_v11 }
 0x3ee   :  { %6960 = vmatmul.mubr.bf16.gmra.mrb[36].mxu0 %v8883_v50  ;;  %v8946_v50 = vld [vmem:[%s12589_s2 + $0xb60] ss:$72 sps:$4 sm:$0xff]  }
 0x3ef   :  { %6967 = vmatprep.mubr.bf16.mxu0 %v8887_v55 }
 0x3f2   :  { %5939 = vmatmul.mubr.bf16.gmra.mrb[88].mxu1 %v8886_v7  ;;  %v8950_v7 = vld [vmem:[%s12589_s2 + $0xbf4] ss:$72 sps:$4 sm:$0xff]  }
 0x3f3   :  { %5946 = vmatprep.mubr.bf16.mxu1 %v8890_v52 }
 0x3f6   :  { %6968 = vmatmul.mubr.bf16.gmra.mrb[40].mxu0 %v8889_v28  ;;  %v8949_v28 = vld [vmem:[%s12589_s2 + $0xb80] ss:$72 sps:$4 sm:$0xff]  }
 0x3f7   :  { %6975 = vmatprep.mubr.bf16.mxu0 %v8893_v9  ;;  %v8953_v9 = vld [vmem:[%s12589_s2 + $0xc14] ss:$72 sps:$4 sm:$0xff]  }
 0x3fa   :  { %5947 = vmatmul.mubr.bf16.gmra.mrb[92].mxu1 %v8892_v49 }
 0x3fb   :  { %6083 = vmatprep.mubr.bf16.mxu1 %v8898_v27 }
 0x3fe   :  { %6976 = vmatmul.mubr.bf16.gmra.mrb[44].mxu0 %v8895_v8  ;;  %v8952_v8 = vld [vmem:[%s12589_s2 + $0xbf0] ss:$72 sps:$4 sm:$0xff]  }
 0x3ff   :  { %6983 = vmatprep.mubr.bf16.mxu0 %v8899_v57 }
 0x402   :  { %6084 = vmatmul.mubr.bf16.vlgmr.msra.gmra.mrb[48].mxu1 %v8896_v31  ;;  %v8956_v31 = vld [vmem:[%s12589_s2 + $0xc84] ss:$72 sps:$4 sm:$0xff]  }
 0x403   :  { %6091 = vmatprep.mubr.bf16.mxu1 %v8902_v63 }
 0x406   :  { %6984 = vmatmul.mubr.bf16.gmra.mrb[48].mxu0 %v8901_v53  ;;  %v8955_v53 = vld [vmem:[%s12589_s2 + $0xc10] ss:$72 sps:$4 sm:$0xff]  }
 0x407   :  { %6991 = vmatprep.mubr.bf16.mxu0 %v8905_v0  ;;  %v8959_v0 = vld [vmem:[%s12589_s2 + $0xca4] ss:$72 sps:$4 sm:$0xff]  }
 0x40a   :  { %6092 = vmatmul.mubr.bf16.gmra.mrb[52].mxu1 %v8904_v14 }
 0x40b   :  { %6099 = vmatprep.mubr.bf16.mxu1 %v8908_v1 }
 0x40e   :  { %6992 = vmatmul.mubr.bf16.gmra.mrb[52].mxu0 %v8907_v2  ;;  %v8958_v2 = vld [vmem:[%s12589_s2 + $0xc80] ss:$72 sps:$4 sm:$0xff]  }
 0x40f   :  { %6999 = vmatprep.mubr.bf16.mxu0 %v8911_v3 }
 0x412   :  { %6100 = vmatmul.mubr.bf16.gmra.mrb[56].mxu1 %v8910_v39  ;;  %v8962_v39 = vld [vmem:[%s12589_s2 + $0xd14] ss:$72 sps:$4 sm:$0xff]  }
 0x413   :  { %6107 = vmatprep.mubr.bf16.mxu1 %v8914_v60 }
 0x415   :  { %v12221_v4 = vpop.f32.mrb[0].mxu1 }
 0x416   :  { %v5766_v37 = vpop.f32.mrb[1].mxu1  ;;  %7000 = vmatmul.mubr.bf16.gmra.mrb[56].mxu0 %v8913_v62  ;;  %v8961_v62 = vld [vmem:[%s12589_s2 + $0xca0] ss:$72 sps:$4 sm:$0xff]  }
 0x417   :  { %v12226_v29 = vpop.f32.mrb[2].mxu1  ;;  %7007 = vmatprep.mubr.bf16.mxu0 %v8917_v40  ;;  %v8965_v40 = vld [vmem:[%s12589_s2 + $0xd34] ss:$72 sps:$4 sm:$0xff]  }
 0x418   :  { %v5769_v5 = vpop.f32.mrb[3].mxu1 }
 0x41a   :  { %6108 = vmatmul.mubr.bf16.gmra.mrb[60].mxu1 %v8916_v6 }
 0x41b   :  { %6115 = vmatprep.mubr.bf16.mxu1 %v8920_v38  ;;  %v8964_v38 = vld [vmem:[%s12589_s2 + $0xd10] ss:$72 sps:$4 sm:$0xff]  }
 0x41d   :  { %v12237_v19 = vpop.f32.mrb[4].mxu1 }
 0x41e   :  { %v5774_v15 = vpop.f32.mrb[5].mxu1  ;;  %7008 = vmatmul.mubr.bf16.gmra.mrb[60].mxu0 %v8919_v56 }
 0x41f   :  { %v12242_v47 = vpop.f32.mrb[6].mxu1  ;;  %7015 = vmatprep.mubr.bf16.mxu0 %v8923_v18  ;;  %v8967_v18 = vld [vmem:[%s12589_s2 + $0xd30] ss:$72 sps:$4 sm:$0xff]  }
 0x420   :  { %v5777_v23 = vpop.f32.mrb[7].mxu1 }
 0x422   :  { %6116 = vmatmul.mubr.bf16.gmra.mrb[64].mxu1 %v8922_v17 }
 0x423   :  { %6123 = vmatprep.mubr.bf16.mxu1 %v8926_v48 }
 0x425   :  { %v12253_v26 = vpop.f32.mrb[8].mxu1 }
 0x426   :  { %v5782_v32 = vpop.f32.mrb[9].mxu1  ;;  %7016 = vmatmul.mubr.bf16.gmra.mrb[64].mxu0 %v8925_v13 }
 0x427   :  { %v12258_v22 = vpop.f32.mrb[10].mxu1  ;;  %7023 = vmatprep.mubr.bf16.mxu0 %v8929_v24 }
 0x428   :  { %v5785_v34 = vpop.f32.mrb[11].mxu1 }
 0x42a   :  { %6124 = vmatmul.mubr.bf16.gmra.mrb[68].mxu1 %v8928_v12 }
 0x42b   :  { %6131 = vmatprep.mubr.bf16.mxu1 %v8932_v33 }
 0x42d   :  { %v12269_v21 = vpop.f32.mrb[12].mxu1 }
 0x42e   :  { %v5790_v58 = vpop.f32.mrb[13].mxu1  ;;  %7024 = vmatmul.mubr.bf16.gmra.mrb[68].mxu0 %v8931_v36 }
 0x42f   :  { %v12274_v59 = vpop.f32.mrb[14].mxu1  ;;  %7031 = vmatprep.mubr.bf16.mxu0 %v8935_v20 }
 0x430   :  { %v5793_v41 = vpop.f32.mrb[15].mxu1 }
 0x432   :  { %6132 = vmatmul.mubr.bf16.gmra.mrb[72].mxu1 %v8934_v25 }
 0x433   :  { %6139 = vmatprep.mubr.bf16.mxu1 %v8938_v43 }
 0x435   :  { %v12285_v16 = vpop.f32.mrb[16].mxu1 }
 0x436   :  { %v5798_v44 = vpop.f32.mrb[17].mxu1  ;;  %7032 = vmatmul.mubr.bf16.gmra.mrb[72].mxu0 %v8937_v61 }
 0x437   :  { %v12290_v45 = vpop.f32.mrb[18].mxu1  ;;  %7039 = vmatprep.mubr.bf16.mxu0 %v8941_v42 }
 0x438   :  { %v5801_v46 = vpop.f32.mrb[19].mxu1 }
 0x43a   :  { %6140 = vmatmul.mubr.bf16.gmra.mrb[76].mxu1 %v8940_v35 }
 0x43b   :  { %6147 = vmatprep.mubr.bf16.mxu1 %v8944_v54 }
 0x43d   :  { %v12301_v30 = vpop.f32.mrb[20].mxu1 }
 0x43e   :  { %v5806_v11 = vpop.f32.mrb[21].mxu1  ;;  %7040 = vmatmul.mubr.bf16.gmra.mrb[76].mxu0 %v8943_v10 }
 0x43f   :  { %v12306_v55 = vpop.f32.mrb[22].mxu1  ;;  %7047 = vmatprep.mubr.bf16.mxu0 %v8947_v51 }
 0x440   :  { %v5809_v52 = vpop.f32.mrb[23].mxu1 }
 0x442   :  { %6148 = vmatmul.mubr.bf16.gmra.mrb[80].mxu1 %v8946_v50 }
 0x443   :  { %6155 = vmatprep.mubr.bf16.mxu1 %v8950_v7 }
 0x445   :  { %v12317_v49 = vpop.f32.mrb[24].mxu1 }
 0x446   :  { %v5814_v27 = vpop.f32.mrb[25].mxu1  ;;  %7048 = vmatmul.mubr.bf16.gmra.mrb[80].mxu0 %v8949_v28 }
 0x447   :  { %v12322_v57 = vpop.f32.mrb[26].mxu1  ;;  %7055 = vmatprep.mubr.bf16.mxu0 %v8953_v9 }
 0x448   :  { %v5817_v63 = vpop.f32.mrb[27].mxu1 }
 0x44a   :  { %6156 = vmatmul.mubr.bf16.gmra.mrb[84].mxu1 %v8952_v8 }
 0x44b   :  { %6163 = vmatprep.mubr.bf16.mxu1 %v8956_v31 }
 0x44d   :  { %v12333_v14 = vpop.f32.mrb[28].mxu1 }
 0x44e   :  { %v5822_v1 = vpop.f32.mrb[29].mxu1  ;;  %7056 = vmatmul.mubr.bf16.gmra.mrb[84].mxu0 %v8955_v53 }
 0x44f   :  { %v12338_v3 = vpop.f32.mrb[30].mxu1  ;;  %7063 = vmatprep.mubr.bf16.mxu0 %v8959_v0 }
 0x450   :  { %v5825_v60 = vpop.f32.mrb[31].mxu1 }
 0x452   :  { %6164 = vmatmul.mubr.bf16.gmra.mrb[88].mxu1 %v8958_v2 }
 0x453   :  { %6171 = vmatprep.mubr.bf16.mxu1 %v8962_v39 }
 0x455   :  { %v12349_v37 = vpop.f32.mrb[32].mxu1 }
 0x456   :  { %v5830_v6 = vpop.f32.mrb[33].mxu1  ;;  %7064 = vmatmul.mubr.bf16.gmra.mrb[88].mxu0 %v8961_v62 }
 0x457   :  { %v12354_v5 = vpop.f32.mrb[34].mxu1  ;;  %7071 = vmatprep.mubr.bf16.mxu0 %v8965_v40 }
 0x458   :  { %v5833_v56 = vpop.f32.mrb[35].mxu1 }
 0x45a   :  { %6172 = vmatmul.mubr.bf16.gmra.mrb[92].mxu1 %v8964_v38 }
 0x45d   :  { %v12359_v15 = vpop.f32.mrb[36].mxu1 }
 0x45e   :  { %v5838_v17 = vpop.f32.mrb[37].mxu1  ;;  %7072 = vmatmul.mubr.bf16.gmra.mrb[92].mxu0 %v8967_v18 }
 0x45f   :  { %v12361_v48 = vpop.f32.mrb[38].mxu1 }
 0x460   :  { %v5841_v23 = vpop.f32.mrb[39].mxu1 }
 0x465   :  { %v12363_v13 = vpop.f32.mrb[40].mxu1 }
 0x466   :  { %v5846_v24 = vpop.f32.mrb[41].mxu1 }
 0x467   :  { %v12365_v32 = vpop.f32.mrb[42].mxu1 }
 0x468   :  { %v5849_v12 = vpop.f32.mrb[43].mxu1 }
 0x46d   :  { %v12367_v33 = vpop.f32.mrb[44].mxu1 }
 0x46e   :  { %v5854_v34 = vpop.f32.mrb[45].mxu1 }
 0x46f   :  { %v12369_v36 = vpop.f32.mrb[46].mxu1 }
 0x470   :  { %v5857_v20 = vpop.f32.mrb[47].mxu1 }
 0x479   :  { %v6889_v58 = vpop.f32.mrb[0].mxu0 }
 0x47a   :  { %v7597_v25 = vadd.f32 %v6889_v58, %v12221_v4  ;;  %v6891_v43 = vpop.f32.mrb[1].mxu0 }
 0x47b   :  { %v6892_v41 = vpop.f32.mrb[2].mxu0 }
 0x47c   :  { %7081 = vst.msk [vmem:[%s12590_s3] sm:$0xff] %vm7080_vm0, %v7597_v25  ;;  %v7598_v61 = vadd.f32 %v6892_v41, %v12226_v29  ;;  %v6894_v42 = vpop.f32.mrb[3].mxu0 }
 0x47e   :  { %7082 = vst.msk [vmem:[%s12590_s3 + $0x8] sm:$0xff] %vm7080_vm0, %v7598_v61 }
 0x481   :  { %v6897_v44 = vpop.f32.mrb[4].mxu0 }
 0x482   :  { %v7599_v35 = vadd.f32 %v6897_v44, %v12237_v19  ;;  %v6899_v54 = vpop.f32.mrb[5].mxu0 }
 0x483   :  { %v6900_v4 = vpop.f32.mrb[6].mxu0 }
 0x484   :  { %7083 = vst.msk [vmem:[%s12590_s3 + $0x10] sm:$0xff] %vm7080_vm0, %v7599_v35  ;;  %v7600_v46 = vadd.f32 %v6900_v4, %v12242_v47  ;;  %v6902_v10 = vpop.f32.mrb[7].mxu0 }
 0x486   :  { %7084 = vst.msk [vmem:[%s12590_s3 + $0x18] sm:$0xff] %vm7080_vm0, %v7600_v46 }
 0x489   :  { %v6905_v29 = vpop.f32.mrb[8].mxu0 }
 0x48a   :  { %v7601_v51 = vadd.f32 %v6905_v29, %v12253_v26  ;;  %v6907_v11 = vpop.f32.mrb[9].mxu0 }
 0x48b   :  { %v6908_v19 = vpop.f32.mrb[10].mxu0 }
 0x48c   :  { %7085 = vst.msk [vmem:[%s12590_s3 + $0x20] sm:$0xff] %vm7080_vm0, %v7601_v51  ;;  %v7602_v50 = vadd.f32 %v6908_v19, %v12258_v22  ;;  %v6910_v7 = vpop.f32.mrb[11].mxu0 }
 0x48e   :  { %7086 = vst.msk [vmem:[%s12590_s3 + $0x28] sm:$0xff] %vm7080_vm0, %v7602_v50 }
 0x491   :  { %v6913_v47 = vpop.f32.mrb[12].mxu0 }
 0x492   :  { %v7603_v52 = vadd.f32 %v6913_v47, %v12269_v21  ;;  %v6915_v28 = vpop.f32.mrb[13].mxu0 }
 0x493   :  { %v6916_v26 = vpop.f32.mrb[14].mxu0 }
 0x494   :  { %7087 = vst.msk [vmem:[%s12590_s3 + $0x30] sm:$0xff] %vm7080_vm0, %v7603_v52  ;;  %v7604_v9 = vadd.f32 %v6916_v26, %v12274_v59  ;;  %v6918_v27 = vpop.f32.mrb[15].mxu0 }
 0x496   :  { %7088 = vst.msk [vmem:[%s12590_s3 + $0x38] sm:$0xff] %vm7080_vm0, %v7604_v9 }
 0x499   :  { %v6921_v22 = vpop.f32.mrb[16].mxu0 }
 0x49a   :  { %v7605_v8 = vadd.f32 %v6921_v22, %v12285_v16  ;;  %v6923_v31 = vpop.f32.mrb[17].mxu0 }
 0x49b   :  { %v6924_v21 = vpop.f32.mrb[18].mxu0 }
 0x49c   :  { %7089 = vst.msk [vmem:[%s12590_s3 + $0x40] sm:$0xff] %vm7080_vm0, %v7605_v8  ;;  %v7606_v63 = vadd.f32 %v6924_v21, %v12290_v45  ;;  %v6926_v53 = vpop.f32.mrb[19].mxu0 }
 0x49e   :  { %7090 = vst.msk [vmem:[%s12590_s3 + $0x48] sm:$0xff] %vm7080_vm0, %v7606_v63 }
 0x4a1   :  { %v6929_v59 = vpop.f32.mrb[20].mxu0 }
 0x4a2   :  { %v7607_v0 = vadd.f32 %v6929_v59, %v12301_v30  ;;  %v6931_v1 = vpop.f32.mrb[21].mxu0 }
 0x4a3   :  { %v6932_v16 = vpop.f32.mrb[22].mxu0 }
 0x4a4   :  { %7091 = vst.msk [vmem:[%s12590_s3 + $0x50] sm:$0xff] %vm7080_vm0, %v7607_v0  ;;  %v7608_v2 = vadd.f32 %v6932_v16, %v12306_v55  ;;  %v6934_v39 = vpop.f32.mrb[23].mxu0 }
 0x4a6   :  { %7092 = vst.msk [vmem:[%s12590_s3 + $0x58] sm:$0xff] %vm7080_vm0, %v7608_v2 }
 0x4a9   :  { %v6937_v45 = vpop.f32.mrb[24].mxu0 }
 0x4aa   :  { %v7609_v60 = vadd.f32 %v6937_v45, %v12317_v49  ;;  %v6939_v62 = vpop.f32.mrb[25].mxu0 }
 0x4ab   :  { %v6940_v30 = vpop.f32.mrb[26].mxu0 }
 0x4ac   :  { %7093 = vst.msk [vmem:[%s12590_s3 + $0x60] sm:$0xff] %vm7080_vm0, %v7609_v60  ;;  %v7610_v40 = vadd.f32 %v6940_v30, %v12322_v57  ;;  %v6942_v6 = vpop.f32.mrb[27].mxu0 }
 0x4ae   :  { %7094 = vst.msk [vmem:[%s12590_s3 + $0x68] sm:$0xff] %vm7080_vm0, %v7610_v40 }
 0x4b1   :  { %v6945_v55 = vpop.f32.mrb[28].mxu0 }
 0x4b2   :  { %v7611_v38 = vadd.f32 %v6945_v55, %v12333_v14  ;;  %v6947_v56 = vpop.f32.mrb[29].mxu0 }
 0x4b3   :  { %v6948_v49 = vpop.f32.mrb[30].mxu0 }
 0x4b4   :  { %7095 = vst.msk [vmem:[%s12590_s3 + $0x70] sm:$0xff] %vm7080_vm0, %v7611_v38  ;;  %v7612_v18 = vadd.f32 %v6948_v49, %v12338_v3  ;;  %v6950_v17 = vpop.f32.mrb[31].mxu0 }
 0x4b6   :  { %7096 = vst.msk [vmem:[%s12590_s3 + $0x78] sm:$0xff] %vm7080_vm0, %v7612_v18 }
 0x4b9   :  { %v6953_v57 = vpop.f32.mrb[32].mxu0 }
 0x4ba   :  { %v7613_v23 = vadd.f32 %v6953_v57, %v12349_v37  ;;  %v6955_v24 = vpop.f32.mrb[33].mxu0 }
 0x4bb   :  { %v6956_v14 = vpop.f32.mrb[34].mxu0 }
 0x4bc   :  { %7097 = vst.msk [vmem:[%s12590_s3 + $0x80] sm:$0xff] %vm7080_vm0, %v7613_v23  ;;  %v7614_v12 = vadd.f32 %v6956_v14, %v12354_v5  ;;  %v6958_v34 = vpop.f32.mrb[35].mxu0 }
 0x4be   :  { %7098 = vst.msk [vmem:[%s12590_s3 + $0x88] sm:$0xff] %vm7080_vm0, %v7614_v12 }
 0x4c1   :  { %v6961_v3 = vpop.f32.mrb[36].mxu0 }
 0x4c2   :  { %v7615_v20 = vadd.f32 %v6961_v3, %v12359_v15  ;;  %v6963_v58 = vpop.f32.mrb[37].mxu0 }
 0x4c3   :  { %v6964_v37 = vpop.f32.mrb[38].mxu0 }
 0x4c4   :  { %7099 = vst.msk [vmem:[%s12590_s3 + $0x90] sm:$0xff] %vm7080_vm0, %v7615_v20  ;;  %v7616_v25 = vadd.f32 %v6964_v37, %v12361_v48  ;;  %v6966_v43 = vpop.f32.mrb[39].mxu0 }
 0x4c6   :  { %7100 = vst.msk [vmem:[%s12590_s3 + $0x98] sm:$0xff] %vm7080_vm0, %v7616_v25 }
 0x4c9   :  { %v6969_v5 = vpop.f32.mrb[40].mxu0 }
 0x4ca   :  { %v7617_v41 = vadd.f32 %v6969_v5, %v12363_v13  ;;  %v6971_v61 = vpop.f32.mrb[41].mxu0 }
 0x4cb   :  { %v6972_v15 = vpop.f32.mrb[42].mxu0 }
 0x4cc   :  { %7101 = vst.msk [vmem:[%s12590_s3 + $0xa0] sm:$0xff] %vm7080_vm0, %v7617_v41  ;;  %v7618_v42 = vadd.f32 %v6972_v15, %v12365_v32  ;;  %v6974_v44 = vpop.f32.mrb[43].mxu0 }
 0x4ce   :  { %7102 = vst.msk [vmem:[%s12590_s3 + $0xa8] sm:$0xff] %vm7080_vm0, %v7618_v42 }
 0x4d1   :  { %v6977_v48 = vpop.f32.mrb[44].mxu0 }
 0x4d2   :  { %v7619_v35 = vadd.f32 %v6977_v48, %v12367_v33  ;;  %v6979_v54 = vpop.f32.mrb[45].mxu0 }
 0x4d3   :  { %v6980_v13 = vpop.f32.mrb[46].mxu0 }
 0x4d4   :  { %7103 = vst.msk [vmem:[%s12590_s3 + $0xb0] sm:$0xff] %vm7080_vm0, %v7619_v35  ;;  %v7620_v4 = vadd.f32 %v6980_v13, %v12369_v36  ;;  %v6982_v46 = vpop.f32.mrb[47].mxu0 }
 0x4d5   :  { %v6085_v32 = vpop.f32.mrb[48].mxu1 }
 0x4d6   :  { %7104 = vst.msk [vmem:[%s12590_s3 + $0xb8] sm:$0xff] %vm7080_vm0, %v7620_v4  ;;  %v6087_v10 = vpop.f32.mrb[49].mxu1 }
 0x4d7   :  { %v6088_v29 = vpop.f32.mrb[50].mxu1 }
 0x4d8   :  { %v6090_v51 = vpop.f32.mrb[51].mxu1 }
 0x4d9   :  { %v6985_v33 = vpop.f32.mrb[48].mxu0 }
 0x4da   :  { %v7621_v11 = vadd.f32 %v6985_v33, %v6085_v32  ;;  %v6987_v19 = vpop.f32.mrb[49].mxu0 }
 0x4db   :  { %v6988_v50 = vpop.f32.mrb[50].mxu0 }
 0x4dc   :  { %7105 = vst.msk [vmem:[%s12590_s3 + $0xc0] sm:$0xff] %vm7080_vm0, %v7621_v11  ;;  %v7622_v36 = vadd.f32 %v6988_v50, %v6088_v29  ;;  %v6990_v7 = vpop.f32.mrb[51].mxu0 }
 0x4dd   :  { %v6093_v47 = vpop.f32.mrb[52].mxu1 }
 0x4de   :  { %7106 = vst.msk [vmem:[%s12590_s3 + $0xc8] sm:$0xff] %vm7080_vm0, %v7622_v36  ;;  %v6095_v52 = vpop.f32.mrb[53].mxu1 }
 0x4df   :  { %v6096_v28 = vpop.f32.mrb[54].mxu1 }
 0x4e0   :  { %v6098_v26 = vpop.f32.mrb[55].mxu1 }
 0x4e1   :  { %v6993_v9 = vpop.f32.mrb[52].mxu0 }
 0x4e2   :  { %v7623_v27 = vadd.f32 %v6993_v9, %v6093_v47  ;;  %v6995_v22 = vpop.f32.mrb[53].mxu0 }
 0x4e3   :  { %v6996_v8 = vpop.f32.mrb[54].mxu0 }
 0x4e4   :  { %7107 = vst.msk [vmem:[%s12590_s3 + $0xd0] sm:$0xff] %vm7080_vm0, %v7623_v27  ;;  %v7624_v31 = vadd.f32 %v6996_v8, %v6096_v28  ;;  %v6998_v21 = vpop.f32.mrb[55].mxu0 }
 0x4e5   :  { %v6101_v63 = vpop.f32.mrb[56].mxu1 }
 0x4e6   :  { %7108 = vst.msk [vmem:[%s12590_s3 + $0xd8] sm:$0xff] %vm7080_vm0, %v7624_v31  ;;  %v6103_v53 = vpop.f32.mrb[57].mxu1 }
 0x4e7   :  { %v6104_v59 = vpop.f32.mrb[58].mxu1 }
 0x4e8   :  { %v6106_v0 = vpop.f32.mrb[59].mxu1 }
 0x4e9   :  { %v7001_v1 = vpop.f32.mrb[56].mxu0 }
 0x4ea   :  { %v7625_v16 = vadd.f32 %v7001_v1, %v6101_v63  ;;  %v7003_v2 = vpop.f32.mrb[57].mxu0 }
 0x4eb   :  { %v7004_v39 = vpop.f32.mrb[58].mxu0 }
 0x4ec   :  { %7109 = vst.msk [vmem:[%s12590_s3 + $0xe0] sm:$0xff] %vm7080_vm0, %v7625_v16  ;;  %v7626_v45 = vadd.f32 %v7004_v39, %v6104_v59  ;;  %v7006_v60 = vpop.f32.mrb[59].mxu0 }
 0x4ed   :  { %v6109_v62 = vpop.f32.mrb[60].mxu1 }
 0x4ee   :  { %7110 = vst.msk [vmem:[%s12590_s3 + $0xe8] sm:$0xff] %vm7080_vm0, %v7626_v45  ;;  %v6111_v30 = vpop.f32.mrb[61].mxu1 }
 0x4ef   :  { %v6112_v40 = vpop.f32.mrb[62].mxu1 }
 0x4f0   :  { %v6114_v6 = vpop.f32.mrb[63].mxu1 }
 0x4f1   :  { %v7009_v55 = vpop.f32.mrb[60].mxu0 }
 0x4f2   :  { %v7627_v38 = vadd.f32 %v7009_v55, %v6109_v62  ;;  %v7011_v56 = vpop.f32.mrb[61].mxu0 }
 0x4f3   :  { %v7012_v49 = vpop.f32.mrb[62].mxu0 }
 0x4f4   :  { %7111 = vst.msk [vmem:[%s12590_s3 + $0xf0] sm:$0xff] %vm7080_vm0, %v7627_v38  ;;  %v7628_v18 = vadd.f32 %v7012_v49, %v6112_v40  ;;  %v7014_v17 = vpop.f32.mrb[63].mxu0 }
 0x4f5   :  { %v6117_v57 = vpop.f32.mrb[64].mxu1 }
 0x4f6   :  { %7112 = vst.msk [vmem:[%s12590_s3 + $0xf8] sm:$0xff] %vm7080_vm0, %v7628_v18  ;;  %v6119_v23 = vpop.f32.mrb[65].mxu1 }
 0x4f7   :  { %v6120_v24 = vpop.f32.mrb[66].mxu1 }
 0x4f8   :  { %v6122_v14 = vpop.f32.mrb[67].mxu1 }
 0x4f9   :  { %v7017_v12 = vpop.f32.mrb[64].mxu0 }
 0x4fa   :  { %v7629_v34 = vadd.f32 %v7017_v12, %v6117_v57  ;;  %v7019_v3 = vpop.f32.mrb[65].mxu0 }
 0x4fb   :  { %v7020_v20 = vpop.f32.mrb[66].mxu0 }
 0x4fc   :  { %7113 = vst.msk [vmem:[%s12590_s3 + $0x100] sm:$0xff] %vm7080_vm0, %v7629_v34  ;;  %v7630_v58 = vadd.f32 %v7020_v20, %v6120_v24  ;;  %v7022_v37 = vpop.f32.mrb[67].mxu0 }
 0x4fd   :  { %v6125_v25 = vpop.f32.mrb[68].mxu1 }
 0x4fe   :  { %7114 = vst.msk [vmem:[%s12590_s3 + $0x108] sm:$0xff] %vm7080_vm0, %v7630_v58  ;;  %v6127_v43 = vpop.f32.mrb[69].mxu1 }
 0x4ff   :  { %v6128_v5 = vpop.f32.mrb[70].mxu1 }
 0x500   :  { %v6130_v41 = vpop.f32.mrb[71].mxu1 }
 0x501   :  { %v7025_v61 = vpop.f32.mrb[68].mxu0 }
 0x502   :  { %v7631_v15 = vadd.f32 %v7025_v61, %v6125_v25  ;;  %v7027_v42 = vpop.f32.mrb[69].mxu0 }
 0x503   :  { %v7028_v44 = vpop.f32.mrb[70].mxu0 }
 0x504   :  { %7115 = vst.msk [vmem:[%s12590_s3 + $0x110] sm:$0xff] %vm7080_vm0, %v7631_v15  ;;  %v7632_v48 = vadd.f32 %v7028_v44, %v6128_v5  ;;  %v7030_v35 = vpop.f32.mrb[71].mxu0 }
 0x505   :  { %v6133_v54 = vpop.f32.mrb[72].mxu1 }
 0x506   :  { %7116 = vst.msk [vmem:[%s12590_s3 + $0x118] sm:$0xff] %vm7080_vm0, %v7632_v48  ;;  %v6135_v13 = vpop.f32.mrb[73].mxu1 }
 0x507   :  { %v6136_v4 = vpop.f32.mrb[74].mxu1 }
 0x508   :  { %v6138_v46 = vpop.f32.mrb[75].mxu1 }
 0x509   :  { %v7033_v32 = vpop.f32.mrb[72].mxu0 }
 0x50a   :  { %v7633_v10 = vadd.f32 %v7033_v32, %v6133_v54  ;;  %v7035_v29 = vpop.f32.mrb[73].mxu0 }
 0x50b   :  { %v7036_v51 = vpop.f32.mrb[74].mxu0 }
 0x50c   :  { %7117 = vst.msk [vmem:[%s12590_s3 + $0x120] sm:$0xff] %vm7080_vm0, %v7633_v10  ;;  %v7634_v33 = vadd.f32 %v7036_v51, %v6136_v4  ;;  %v7038_v11 = vpop.f32.mrb[75].mxu0 }
 0x50d   :  { %v6141_v19 = vpop.f32.mrb[76].mxu1 }
 0x50e   :  { %7118 = vst.msk [vmem:[%s12590_s3 + $0x128] sm:$0xff] %vm7080_vm0, %v7634_v33  ;;  %v6143_v50 = vpop.f32.mrb[77].mxu1 }
 0x50f   :  { %v6144_v36 = vpop.f32.mrb[78].mxu1 }
 0x510   :  { %v6146_v7 = vpop.f32.mrb[79].mxu1 }
 0x511   :  { %v7041_v47 = vpop.f32.mrb[76].mxu0 }
 0x512   :  { %v7635_v52 = vadd.f32 %v7041_v47, %v6141_v19  ;;  %v7043_v28 = vpop.f32.mrb[77].mxu0 }
 0x513   :  { %v7044_v26 = vpop.f32.mrb[78].mxu0 }
 0x514   :  { %7119 = vst.msk [vmem:[%s12590_s3 + $0x130] sm:$0xff] %vm7080_vm0, %v7635_v52  ;;  %v7636_v9 = vadd.f32 %v7044_v26, %v6144_v36  ;;  %v7046_v27 = vpop.f32.mrb[79].mxu0 }
 0x515   :  { %v6149_v22 = vpop.f32.mrb[80].mxu1 }
 0x516   :  { %7120 = vst.msk [vmem:[%s12590_s3 + $0x138] sm:$0xff] %vm7080_vm0, %v7636_v9  ;;  %v6151_v8 = vpop.f32.mrb[81].mxu1 }
 0x517   :  { %v6152_v31 = vpop.f32.mrb[82].mxu1 }
 0x518   :  { %v6154_v21 = vpop.f32.mrb[83].mxu1 }
 0x519   :  { %v7049_v63 = vpop.f32.mrb[80].mxu0 }
 0x51a   :  { %v7637_v53 = vadd.f32 %v7049_v63, %v6149_v22  ;;  %v7051_v59 = vpop.f32.mrb[81].mxu0 }
 0x51b   :  { %v7052_v0 = vpop.f32.mrb[82].mxu0 }
 0x51c   :  { %7121 = vst.msk [vmem:[%s12590_s3 + $0x140] sm:$0xff] %vm7080_vm0, %v7637_v53  ;;  %v7638_v1 = vadd.f32 %v7052_v0, %v6152_v31  ;;  %v7054_v16 = vpop.f32.mrb[83].mxu0 }
 0x51d   :  { %v6157_v2 = vpop.f32.mrb[84].mxu1 }
 0x51e   :  { %7122 = vst.msk [vmem:[%s12590_s3 + $0x148] sm:$0xff] %vm7080_vm0, %v7638_v1  ;;  %v6159_v39 = vpop.f32.mrb[85].mxu1 }
 0x51f   :  { %v6160_v45 = vpop.f32.mrb[86].mxu1 }
 0x520   :  { %v6162_v60 = vpop.f32.mrb[87].mxu1 }
 0x521   :  { %v7057_v62 = vpop.f32.mrb[84].mxu0 }
 0x522   :  { %v7639_v30 = vadd.f32 %v7057_v62, %v6157_v2  ;;  %v7059_v40 = vpop.f32.mrb[85].mxu0 }
 0x523   :  { %v7060_v6 = vpop.f32.mrb[86].mxu0 }
 0x524   :  { %7123 = vst.msk [vmem:[%s12590_s3 + $0x150] sm:$0xff] %vm7080_vm0, %v7639_v30  ;;  %v7640_v55 = vadd.f32 %v7060_v6, %v6160_v45  ;;  %v7062_v38 = vpop.f32.mrb[87].mxu0 }
 0x525   :  { %v6165_v56 = vpop.f32.mrb[88].mxu1 }
 0x526   :  { %7124 = vst.msk [vmem:[%s12590_s3 + $0x158] sm:$0xff] %vm7080_vm0, %v7640_v55  ;;  %v6167_v49 = vpop.f32.mrb[89].mxu1 }
 0x527   :  { %v6168_v18 = vpop.f32.mrb[90].mxu1 }
 0x528   :  { %v6170_v17 = vpop.f32.mrb[91].mxu1 }
 0x529   :  { %v7065_v57 = vpop.f32.mrb[88].mxu0 }
 0x52a   :  { %v7641_v23 = vadd.f32 %v7065_v57, %v6165_v56  ;;  %v7067_v24 = vpop.f32.mrb[89].mxu0 }
 0x52b   :  { %v7068_v14 = vpop.f32.mrb[90].mxu0 }
 0x52c   :  { %7125 = vst.msk [vmem:[%s12590_s3 + $0x160] sm:$0xff] %vm7080_vm0, %v7641_v23  ;;  %v7642_v12 = vadd.f32 %v7068_v14, %v6168_v18  ;;  %v7070_v34 = vpop.f32.mrb[91].mxu0 }
 0x52d   :  { %v6173_v3 = vpop.f32.mrb[92].mxu1 }
 0x52e   :  { %7126 = vst.msk [vmem:[%s12590_s3 + $0x168] sm:$0xff] %vm7080_vm0, %v7642_v12  ;;  %v6175_v20 = vpop.f32.mrb[93].mxu1 }
 0x52f   :  { %v6176_v58 = vpop.f32.mrb[94].mxu1 }
 0x530   :  { %v6178_v37 = vpop.f32.mrb[95].mxu1 }
 0x531   :  { %v7073_v25 = vpop.f32.mrb[92].mxu0 }
 0x532   :  { %v7643_v43 = vadd.f32 %v7073_v25, %v6173_v3  ;;  %v7075_v5 = vpop.f32.mrb[93].mxu0 }
 0x533   :  { %v7076_v41 = vpop.f32.mrb[94].mxu0 }
 0x534   :  { %7127 = vst.msk [vmem:[%s12590_s3 + $0x170] sm:$0xff] %vm7080_vm0, %v7643_v43  ;;  %v7644_v61 = vadd.f32 %v7076_v41, %v6176_v58  ;;  %v7078_v15 = vpop.f32.mrb[95].mxu0 }
 0x536   :  { %7128 = vst.msk [vmem:[%s12590_s3 + $0x178] sm:$0xff] %vm7080_vm0, %v7644_v61 }

</bundles_post_ra>
